<compile_context>
chip_gen: v5e
topology: v5e:2x2
jax: 0.10.0
libtpu: 0.0.40
codegen_flags: <defaults>
</compile_context>

<pallas_src>
import math
import functools

import jax
import jax.numpy as jnp
from jax.experimental import pallas as pl
from jax.experimental.pallas import tpu as pltpu


# ---------------------------------------------------------------------------
# Fused Pallas kernel
# ---------------------------------------------------------------------------

def _build_model_kernel(S, B, H, num_layers):
    """Builds the fused kernel for static (S, B_pad, H, num_layers).

    Kernel ref layout:
      inputs : x_all (S*B, Din),
               per layer: wih_f (Din_l,4H), whh_f (H,4H), b_f (1,4H),
                          wih_r (Din_l,4H), whh_r (H,4H), b_r (1,4H),
               out_w (1,H), out_b (1,1)
      outputs: out (B, 1)
      scratch: hf_buf (S*B, H), hr_buf (S*B, H)
    """
    n_in = 1 + 6 * num_layers + 2

    def kernel(*refs):
        in_refs = refs[:n_in]
        out_ref = refs[n_in]
        hf_buf = refs[n_in + 1]
        hr_buf = refs[n_in + 2]

        x_ref = in_refs[0]
        out_w_ref = in_refs[1 + 6 * num_layers]
        out_b_ref = in_refs[2 + 6 * num_layers]

        def run_direction(gx_all, whh, reverse, seq_buf):
            """Serial recurrence over pre-projected gates gx_all (S*B, 4H)."""
            h = jnp.zeros((B, H), jnp.float32)
            c = jnp.zeros((B, H), jnp.float32)
            ts = range(S - 1, -1, -1) if reverse else range(S)
            for t in ts:                                    # static unroll
                gates = (gx_all[t * B:(t + 1) * B, :]
                         + jnp.dot(h, whh, preferred_element_type=jnp.float32))
                i_g = jax.nn.sigmoid(gates[:, 0 * H:1 * H])
                f_g = jax.nn.sigmoid(gates[:, 1 * H:2 * H])
                g_g = jnp.tanh(gates[:, 2 * H:3 * H])
                o_g = jax.nn.sigmoid(gates[:, 3 * H:4 * H])
                c = f_g * c + i_g * g_g
                h = o_g * jnp.tanh(c)
                if seq_buf is not None:
                    seq_buf[t * B:(t + 1) * B, :] = h       # aligned sublane store
            return h

        hfin_rev = None
        for layer in range(num_layers):
            base = 1 + 6 * layer
            wih_f, whh_f, b_f, wih_r, whh_r, b_r = in_refs[base:base + 6]
            last = layer == num_layers - 1

            # ---- hoisted input projection (one big matmul per direction) ----
            if layer == 0:
                x_all = x_ref[...]                          # (S*B, Din)

                def proj(wih_ref, b_ref, _x=x_all):
                    return (jnp.dot(_x, wih_ref[...],
                                    preferred_element_type=jnp.float32)
                            + b_ref[...])
            else:
                hf_all = hf_buf[...]                        # (S*B, H) prev layer fwd
                hr_all = hr_buf[...]                        # (S*B, H) prev layer rev

                def proj(wih_ref, b_ref, _hf=hf_all, _hr=hr_all):
                    w = wih_ref[...]                        # (2H, 4H)
                    return (jnp.dot(_hf, w[:H, :],
                                    preferred_element_type=jnp.float32)
                            + jnp.dot(_hr, w[H:, :],
                                      preferred_element_type=jnp.float32)
                            + b_ref[...])

            # Reverse direction is always needed (hidden[-1] comes from it).
            gx_r = proj(wih_r, b_r)
            if last:
                # Last layer: forward direction & per-step stores are dead work.
                hfin_rev = run_direction(gx_r, whh_r[...], reverse=True,
                                         seq_buf=None)
            else:
                gx_f = proj(wih_f, b_f)
                run_direction(gx_f, whh_f[...], reverse=False, seq_buf=hf_buf)
                run_direction(gx_r, whh_r[...], reverse=True, seq_buf=hr_buf)

        # Linear head: out = hfin_rev @ W^T + b  (W is (1, H) -> lane reduce)
        out = (jnp.sum(hfin_rev * out_w_ref[...], axis=-1, keepdims=True)
               + out_b_ref[...])
        out_ref[...] = out.astype(out_ref.dtype)

    return kernel


# ---------------------------------------------------------------------------
# Wrapper
# ---------------------------------------------------------------------------

_VMEM = pl.BlockSpec(memory_space=pltpu.MemorySpace.VMEM)


@functools.partial(jax.jit, static_argnums=(2,))
def model_lstm_forward(x, params, num_layers):
    """x: (batch, seq, input_size) -> (batch, 1). Matches ModelLstm.forward."""
    x = x.astype(jnp.float32)
    B, S, Din = x.shape
    H = params["out_w"].shape[1]
    B_pad = max(8, ((B + 7) // 8) * 8)                 # fill sublanes

    # time-major, batch-padded, flattened to a lane/sublane-friendly 2-D slab
    x_tm = jnp.transpose(x, (1, 0, 2))                 # (S, B, Din)
    if B_pad != B:
        x_tm = jnp.pad(x_tm, ((0, 0), (0, B_pad - B), (0, 0)))
    x_all = x_tm.reshape(S * B_pad, Din)               # (S*B_pad, Din)

    inputs = [x_all]
    for layer in range(num_layers):
        for d in ("fwd", "rev"):
            p = params["layers"][layer][d]
            inputs.append(jnp.transpose(p["w_ih"]))                    # (Din_l, 4H)
            inputs.append(jnp.transpose(p["w_hh"]))                    # (H, 4H)
            inputs.append((p["b_ih"] + p["b_hh"]).reshape(1, 4 * H))   # fused bias
    inputs.append(params["out_w"])                                     # (1, H)
    inputs.append(params["out_b"].reshape(1, 1))                       # (1, 1)

    kernel = _build_model_kernel(S, B_pad, H, num_layers)
    out_pad = pl.pallas_call(
        kernel,
        out_shape=jax.ShapeDtypeStruct((B_pad, 1), jnp.float32),
        in_specs=[_VMEM] * len(inputs),
        out_specs=_VMEM,
        scratch_shapes=[pltpu.VMEM((S * B_pad, H), jnp.float32),
                        pltpu.VMEM((S * B_pad, H), jnp.float32)],
    )(*inputs)
    return out_pad[:B]


# ---------------------------------------------------------------------------
# Parameter init (PyTorch-shaped) + pure-JAX reference
# ---------------------------------------------------------------------------

def init_params(key, input_size, num_hidden, num_layers):
    k = 1.0 / math.sqrt(num_hidden)
    params = {"layers": []}
    for layer in range(num_layers):
        d_in = input_size if layer == 0 else 2 * num_hidden
        layer_p = {}
        for direction in ("fwd", "rev"):
            key, k1, k2, k3, k4 = jax.random.split(key, 5)
            layer_p[direction] = {
                "w_ih": jax.random.uniform(k1, (4 * num_hidden, d_in),
                                           jnp.float32, -k, k),
                "w_hh": jax.random.uniform(k2, (4 * num_hidden, num_hidden),
                                           jnp.float32, -k, k),
                "b_ih": jax.random.uniform(k3, (4 * num_hidden,),
                                           jnp.float32, -k, k),
                "b_hh": jax.random.uniform(k4, (4 * num_hidden,),
                                           jnp.float32, -k, k),
            }
        params["layers"].append(layer_p)
    key, k5, k6 = jax.random.split(key, 3)
    params["out_w"] = jax.random.uniform(k5, (1, num_hidden), jnp.float32, -k, k)
    params["out_b"] = jax.random.uniform(k6, (1,), jnp.float32, -k, k)
    return params


def reference_forward(x, params, num_layers):
    """Plain-JAX reference matching PyTorch semantics (for correctness check)."""
    x = x.astype(jnp.float32)
    B, S, _ = x.shape
    H = params["out_w"].shape[1]
    seq = x
    h_last_rev = None
    for layer in range(num_layers):
        outs = []
        for d, rev in (("fwd", False), ("rev", True)):
            p = params["layers"][layer][d]
            b = p["b_ih"] + p["b_hh"]
            h = jnp.zeros((B, H), jnp.float32)
            c = jnp.zeros((B, H), jnp.float32)
            hs = [None] * S
            ts = range(S - 1, -1, -1) if rev else range(S)
            for t in ts:
                g = seq[:, t, :] @ p["w_ih"].T + h @ p["w_hh"].T + b
                i = jax.nn.sigmoid(g[:, :H])
                f = jax.nn.sigmoid(g[:, H:2 * H])
                gg = jnp.tanh(g[:, 2 * H:3 * H])
                o = jax.nn.sigmoid(g[:, 3 * H:])
                c = f * c + i * gg
                h = o * jnp.tanh(c)
                hs[t] = h
            outs.append(jnp.stack(hs, axis=1))
            if rev and layer == num_layers - 1:
                h_last_rev = h
        seq = jnp.concatenate(outs, axis=-1)
    return h_last_rev @ params["out_w"].T + params["out_b"]


# ---------------------------------------------------------------------------
# main
# ---------------------------------------------------------------------------

if __name__ == "__main__":
    INPUT_SIZE = 16
    NUM_HIDDEN = 32
    NUM_LAYERS = 2
    BATCH = 2
    SEQ = 8

    key = jax.random.PRNGKey(0)
    key, pkey, xkey = jax.random.split(key, 3)

    params = init_params(pkey, INPUT_SIZE, NUM_HIDDEN, NUM_LAYERS)
    x = jax.random.normal(xkey, (BATCH, SEQ, INPUT_SIZE), dtype=jnp.float32)

    out = model_lstm_forward(x, params, NUM_LAYERS)
    out = jax.block_until_ready(out)

    assert out.shape == (BATCH, 1), out.shape
    assert out.dtype == jnp.float32
    assert bool(jnp.all(jnp.isfinite(out)))

    ref = reference_forward(x, params, NUM_LAYERS)
    assert bool(jnp.allclose(out, ref, atol=1e-3, rtol=1e-3)), (out, ref)

    print("KERNEL_OK")
</pallas_src>

<mosaic_0001>
module attributes {stable_mosaic.version = 11 : i64} {
  func.func @kernel(%arg0: memref<64x16xf32, #tpu.memory_space<vmem>>, %arg1: memref<16x128xf32, #tpu.memory_space<vmem>>, %arg2: memref<32x128xf32, #tpu.memory_space<vmem>>, %arg3: memref<1x128xf32, #tpu.memory_space<vmem>>, %arg4: memref<16x128xf32, #tpu.memory_space<vmem>>, %arg5: memref<32x128xf32, #tpu.memory_space<vmem>>, %arg6: memref<1x128xf32, #tpu.memory_space<vmem>>, %arg7: memref<64x128xf32, #tpu.memory_space<vmem>>, %arg8: memref<32x128xf32, #tpu.memory_space<vmem>>, %arg9: memref<1x128xf32, #tpu.memory_space<vmem>>, %arg10: memref<64x128xf32, #tpu.memory_space<vmem>>, %arg11: memref<32x128xf32, #tpu.memory_space<vmem>>, %arg12: memref<1x128xf32, #tpu.memory_space<vmem>>, %arg13: memref<1x32xf32, #tpu.memory_space<vmem>>, %arg14: memref<1x1xf32, #tpu.memory_space<vmem>>, %arg15: memref<8x1xf32, #tpu.memory_space<vmem>>, %arg16: memref<64x32xf32, #tpu.memory_space<vmem>>, %arg17: memref<64x32xf32, #tpu.memory_space<vmem>>) attributes {dimension_semantics = [], scalar_prefetch = 0 : i64, scratch_operands = 2 : i64, tpu.core_type = #tpu.core_type<tc>} {
    %c0 = arith.constant 0 : index
    %c0_0 = arith.constant 0 : index
    %0 = vector.load %arg0[%c0, %c0_0] : memref<64x16xf32, #tpu.memory_space<vmem>>, vector<64x16xf32>
    %c0_1 = arith.constant 0 : index
    %c0_2 = arith.constant 0 : index
    %1 = vector.load %arg4[%c0_1, %c0_2] : memref<16x128xf32, #tpu.memory_space<vmem>>, vector<16x128xf32>
    %cst = arith.constant dense<0.000000e+00> : vector<64x128xf32>
    %2 = tpu.matmul %0, %1, %cst {dimension_numbers = #tpu.dot_dimension_numbers<[1], [0], [0], [1], [0, 0, 1, 1], [], []>} : vector<64x16xf32>, vector<16x128xf32>, vector<64x128xf32> -> vector<64x128xf32>
    %c0_3 = arith.constant 0 : index
    %c0_4 = arith.constant 0 : index
    %3 = vector.load %arg6[%c0_3, %c0_4] : memref<1x128xf32, #tpu.memory_space<vmem>>, vector<1x128xf32>
    %4 = vector.broadcast %3 : vector<1x128xf32> to vector<64x128xf32>
    %5 = arith.addf %2, %4 : vector<64x128xf32>
    %c0_5 = arith.constant 0 : index
    %c0_6 = arith.constant 0 : index
    %6 = vector.load %arg1[%c0_5, %c0_6] : memref<16x128xf32, #tpu.memory_space<vmem>>, vector<16x128xf32>
    %cst_7 = arith.constant dense<0.000000e+00> : vector<64x128xf32>
    %7 = tpu.matmul %0, %6, %cst_7 {dimension_numbers = #tpu.dot_dimension_numbers<[1], [0], [0], [1], [0, 0, 1, 1], [], []>} : vector<64x16xf32>, vector<16x128xf32>, vector<64x128xf32> -> vector<64x128xf32>
    %c0_8 = arith.constant 0 : index
    %c0_9 = arith.constant 0 : index
    %8 = vector.load %arg3[%c0_8, %c0_9] : memref<1x128xf32, #tpu.memory_space<vmem>>, vector<1x128xf32>
    %9 = vector.broadcast %8 : vector<1x128xf32> to vector<64x128xf32>
    %10 = arith.addf %7, %9 : vector<64x128xf32>
    %c0_10 = arith.constant 0 : index
    %c0_11 = arith.constant 0 : index
    %11 = vector.load %arg2[%c0_10, %c0_11] : memref<32x128xf32, #tpu.memory_space<vmem>>, vector<32x128xf32>
    %cst_12 = arith.constant 0.000000e+00 : f32
    %12 = vector.broadcast %cst_12 : f32 to vector<8x32xf32>
    %cst_13 = arith.constant 0.000000e+00 : f32
    %13 = vector.broadcast %cst_13 : f32 to vector<8x32xf32>
    %14 = vector.extract_strided_slice %10 {offsets = [0, 0], sizes = [8, 128], strides = [1, 1]} : vector<64x128xf32> to vector<8x128xf32>
    %cst_14 = arith.constant dense<0.000000e+00> : vector<8x128xf32>
    %15 = tpu.matmul %12, %11, %cst_14 {dimension_numbers = #tpu.dot_dimension_numbers<[1], [0], [0], [1], [0, 0, 1, 1], [], []>} : vector<8x32xf32>, vector<32x128xf32>, vector<8x128xf32> -> vector<8x128xf32>
    %16 = arith.addf %14, %15 : vector<8x128xf32>
    %17 = vector.extract_strided_slice %16 {offsets = [0, 0], sizes = [8, 32], strides = [1, 1]} : vector<8x128xf32> to vector<8x32xf32>
    %18 = arith.negf %17 : vector<8x32xf32>
    %19 = math.exp %18 : vector<8x32xf32>
    %cst_15 = arith.constant 1.000000e+00 : f32
    %20 = vector.broadcast %cst_15 : f32 to vector<8x32xf32>
    %21 = arith.addf %20, %19 : vector<8x32xf32>
    %22 = arith.divf %20, %21 : vector<8x32xf32>
    %23 = vector.extract_strided_slice %16 {offsets = [0, 32], sizes = [8, 32], strides = [1, 1]} : vector<8x128xf32> to vector<8x32xf32>
    %24 = arith.negf %23 : vector<8x32xf32>
    %25 = math.exp %24 : vector<8x32xf32>
    %cst_16 = arith.constant 1.000000e+00 : f32
    %26 = vector.broadcast %cst_16 : f32 to vector<8x32xf32>
    %27 = arith.addf %26, %25 : vector<8x32xf32>
    %28 = arith.divf %26, %27 : vector<8x32xf32>
    %29 = vector.extract_strided_slice %16 {offsets = [0, 64], sizes = [8, 32], strides = [1, 1]} : vector<8x128xf32> to vector<8x32xf32>
    %30 = math.tanh %29 : vector<8x32xf32>
    %31 = vector.extract_strided_slice %16 {offsets = [0, 96], sizes = [8, 32], strides = [1, 1]} : vector<8x128xf32> to vector<8x32xf32>
    %32 = arith.negf %31 : vector<8x32xf32>
    %33 = math.exp %32 : vector<8x32xf32>
    %cst_17 = arith.constant 1.000000e+00 : f32
    %34 = vector.broadcast %cst_17 : f32 to vector<8x32xf32>
    %35 = arith.addf %34, %33 : vector<8x32xf32>
    %36 = arith.divf %34, %35 : vector<8x32xf32>
    %37 = arith.mulf %28, %13 : vector<8x32xf32>
    %38 = arith.mulf %22, %30 : vector<8x32xf32>
    %39 = arith.addf %37, %38 : vector<8x32xf32>
    %40 = math.tanh %39 : vector<8x32xf32>
    %41 = arith.mulf %36, %40 : vector<8x32xf32>
    %c0_18 = arith.constant 0 : index
    %c0_19 = arith.constant 0 : index
    %42 = vector.load %arg16[%c0_18, %c0_19] : memref<64x32xf32, #tpu.memory_space<vmem>>, vector<8x32xf32>
    tpu.vector_store %arg16[%c0_18, %c0_19], %41 {strides = array<i32>} : memref<64x32xf32, #tpu.memory_space<vmem>>, vector<8x32xf32>,
    %43 = vector.extract_strided_slice %10 {offsets = [8, 0], sizes = [8, 128], strides = [1, 1]} : vector<64x128xf32> to vector<8x128xf32>
    %cst_20 = arith.constant dense<0.000000e+00> : vector<8x128xf32>
    %44 = tpu.matmul %41, %11, %cst_20 {dimension_numbers = #tpu.dot_dimension_numbers<[1], [0], [0], [1], [0, 0, 1, 1], [], []>} : vector<8x32xf32>, vector<32x128xf32>, vector<8x128xf32> -> vector<8x128xf32>
    %45 = arith.addf %43, %44 : vector<8x128xf32>
    %46 = vector.extract_strided_slice %45 {offsets = [0, 0], sizes = [8, 32], strides = [1, 1]} : vector<8x128xf32> to vector<8x32xf32>
    %47 = arith.negf %46 : vector<8x32xf32>
    %48 = math.exp %47 : vector<8x32xf32>
    %cst_21 = arith.constant 1.000000e+00 : f32
    %49 = vector.broadcast %cst_21 : f32 to vector<8x32xf32>
    %50 = arith.addf %49, %48 : vector<8x32xf32>
    %51 = arith.divf %49, %50 : vector<8x32xf32>
    %52 = vector.extract_strided_slice %45 {offsets = [0, 32], sizes = [8, 32], strides = [1, 1]} : vector<8x128xf32> to vector<8x32xf32>
    %53 = arith.negf %52 : vector<8x32xf32>
    %54 = math.exp %53 : vector<8x32xf32>
    %cst_22 = arith.constant 1.000000e+00 : f32
    %55 = vector.broadcast %cst_22 : f32 to vector<8x32xf32>
    %56 = arith.addf %55, %54 : vector<8x32xf32>
    %57 = arith.divf %55, %56 : vector<8x32xf32>
    %58 = vector.extract_strided_slice %45 {offsets = [0, 64], sizes = [8, 32], strides = [1, 1]} : vector<8x128xf32> to vector<8x32xf32>
    %59 = math.tanh %58 : vector<8x32xf32>
    %60 = vector.extract_strided_slice %45 {offsets = [0, 96], sizes = [8, 32], strides = [1, 1]} : vector<8x128xf32> to vector<8x32xf32>
    %61 = arith.negf %60 : vector<8x32xf32>
    %62 = math.exp %61 : vector<8x32xf32>
    %cst_23 = arith.constant 1.000000e+00 : f32
    %63 = vector.broadcast %cst_23 : f32 to vector<8x32xf32>
    %64 = arith.addf %63, %62 : vector<8x32xf32>
    %65 = arith.divf %63, %64 : vector<8x32xf32>
    %66 = arith.mulf %57, %39 : vector<8x32xf32>
    %67 = arith.mulf %51, %59 : vector<8x32xf32>
    %68 = arith.addf %66, %67 : vector<8x32xf32>
    %69 = math.tanh %68 : vector<8x32xf32>
    %70 = arith.mulf %65, %69 : vector<8x32xf32>
    %c8 = arith.constant 8 : index
    %c0_24 = arith.constant 0 : index
    %71 = vector.load %arg16[%c8, %c0_24] : memref<64x32xf32, #tpu.memory_space<vmem>>, vector<8x32xf32>
    tpu.vector_store %arg16[%c8, %c0_24], %70 {strides = array<i32>} : memref<64x32xf32, #tpu.memory_space<vmem>>, vector<8x32xf32>,
    %72 = vector.extract_strided_slice %10 {offsets = [16, 0], sizes = [8, 128], strides = [1, 1]} : vector<64x128xf32> to vector<8x128xf32>
    %cst_25 = arith.constant dense<0.000000e+00> : vector<8x128xf32>
    %73 = tpu.matmul %70, %11, %cst_25 {dimension_numbers = #tpu.dot_dimension_numbers<[1], [0], [0], [1], [0, 0, 1, 1], [], []>} : vector<8x32xf32>, vector<32x128xf32>, vector<8x128xf32> -> vector<8x128xf32>
    %74 = arith.addf %72, %73 : vector<8x128xf32>
    %75 = vector.extract_strided_slice %74 {offsets = [0, 0], sizes = [8, 32], strides = [1, 1]} : vector<8x128xf32> to vector<8x32xf32>
    %76 = arith.negf %75 : vector<8x32xf32>
    %77 = math.exp %76 : vector<8x32xf32>
    %cst_26 = arith.constant 1.000000e+00 : f32
    %78 = vector.broadcast %cst_26 : f32 to vector<8x32xf32>
    %79 = arith.addf %78, %77 : vector<8x32xf32>
    %80 = arith.divf %78, %79 : vector<8x32xf32>
    %81 = vector.extract_strided_slice %74 {offsets = [0, 32], sizes = [8, 32], strides = [1, 1]} : vector<8x128xf32> to vector<8x32xf32>
    %82 = arith.negf %81 : vector<8x32xf32>
    %83 = math.exp %82 : vector<8x32xf32>
    %cst_27 = arith.constant 1.000000e+00 : f32
    %84 = vector.broadcast %cst_27 : f32 to vector<8x32xf32>
    %85 = arith.addf %84, %83 : vector<8x32xf32>
    %86 = arith.divf %84, %85 : vector<8x32xf32>
    %87 = vector.extract_strided_slice %74 {offsets = [0, 64], sizes = [8, 32], strides = [1, 1]} : vector<8x128xf32> to vector<8x32xf32>
    %88 = math.tanh %87 : vector<8x32xf32>
    %89 = vector.extract_strided_slice %74 {offsets = [0, 96], sizes = [8, 32], strides = [1, 1]} : vector<8x128xf32> to vector<8x32xf32>
    %90 = arith.negf %89 : vector<8x32xf32>
    %91 = math.exp %90 : vector<8x32xf32>
    %cst_28 = arith.constant 1.000000e+00 : f32
    %92 = vector.broadcast %cst_28 : f32 to vector<8x32xf32>
    %93 = arith.addf %92, %91 : vector<8x32xf32>
    %94 = arith.divf %92, %93 : vector<8x32xf32>
    %95 = arith.mulf %86, %68 : vector<8x32xf32>
    %96 = arith.mulf %80, %88 : vector<8x32xf32>
    %97 = arith.addf %95, %96 : vector<8x32xf32>
    %98 = math.tanh %97 : vector<8x32xf32>
    %99 = arith.mulf %94, %98 : vector<8x32xf32>
    %c16 = arith.constant 16 : index
    %c0_29 = arith.constant 0 : index
    %100 = vector.load %arg16[%c16, %c0_29] : memref<64x32xf32, #tpu.memory_space<vmem>>, vector<8x32xf32>
    tpu.vector_store %arg16[%c16, %c0_29], %99 {strides = array<i32>} : memref<64x32xf32, #tpu.memory_space<vmem>>, vector<8x32xf32>,
    %101 = vector.extract_strided_slice %10 {offsets = [24, 0], sizes = [8, 128], strides = [1, 1]} : vector<64x128xf32> to vector<8x128xf32>
    %cst_30 = arith.constant dense<0.000000e+00> : vector<8x128xf32>
    %102 = tpu.matmul %99, %11, %cst_30 {dimension_numbers = #tpu.dot_dimension_numbers<[1], [0], [0], [1], [0, 0, 1, 1], [], []>} : vector<8x32xf32>, vector<32x128xf32>, vector<8x128xf32> -> vector<8x128xf32>
    %103 = arith.addf %101, %102 : vector<8x128xf32>
    %104 = vector.extract_strided_slice %103 {offsets = [0, 0], sizes = [8, 32], strides = [1, 1]} : vector<8x128xf32> to vector<8x32xf32>
    %105 = arith.negf %104 : vector<8x32xf32>
    %106 = math.exp %105 : vector<8x32xf32>
    %cst_31 = arith.constant 1.000000e+00 : f32
    %107 = vector.broadcast %cst_31 : f32 to vector<8x32xf32>
    %108 = arith.addf %107, %106 : vector<8x32xf32>
    %109 = arith.divf %107, %108 : vector<8x32xf32>
    %110 = vector.extract_strided_slice %103 {offsets = [0, 32], sizes = [8, 32], strides = [1, 1]} : vector<8x128xf32> to vector<8x32xf32>
    %111 = arith.negf %110 : vector<8x32xf32>
    %112 = math.exp %111 : vector<8x32xf32>
    %cst_32 = arith.constant 1.000000e+00 : f32
    %113 = vector.broadcast %cst_32 : f32 to vector<8x32xf32>
    %114 = arith.addf %113, %112 : vector<8x32xf32>
    %115 = arith.divf %113, %114 : vector<8x32xf32>
    %116 = vector.extract_strided_slice %103 {offsets = [0, 64], sizes = [8, 32], strides = [1, 1]} : vector<8x128xf32> to vector<8x32xf32>
    %117 = math.tanh %116 : vector<8x32xf32>
    %118 = vector.extract_strided_slice %103 {offsets = [0, 96], sizes = [8, 32], strides = [1, 1]} : vector<8x128xf32> to vector<8x32xf32>
    %119 = arith.negf %118 : vector<8x32xf32>
    %120 = math.exp %119 : vector<8x32xf32>
    %cst_33 = arith.constant 1.000000e+00 : f32
    %121 = vector.broadcast %cst_33 : f32 to vector<8x32xf32>
    %122 = arith.addf %121, %120 : vector<8x32xf32>
    %123 = arith.divf %121, %122 : vector<8x32xf32>
    %124 = arith.mulf %115, %97 : vector<8x32xf32>
    %125 = arith.mulf %109, %117 : vector<8x32xf32>
    %126 = arith.addf %124, %125 : vector<8x32xf32>
    %127 = math.tanh %126 : vector<8x32xf32>
    %128 = arith.mulf %123, %127 : vector<8x32xf32>
    %c24 = arith.constant 24 : index
    %c0_34 = arith.constant 0 : index
    %129 = vector.load %arg16[%c24, %c0_34] : memref<64x32xf32, #tpu.memory_space<vmem>>, vector<8x32xf32>
    tpu.vector_store %arg16[%c24, %c0_34], %128 {strides = array<i32>} : memref<64x32xf32, #tpu.memory_space<vmem>>, vector<8x32xf32>,
    %130 = vector.extract_strided_slice %10 {offsets = [32, 0], sizes = [8, 128], strides = [1, 1]} : vector<64x128xf32> to vector<8x128xf32>
    %cst_35 = arith.constant dense<0.000000e+00> : vector<8x128xf32>
    %131 = tpu.matmul %128, %11, %cst_35 {dimension_numbers = #tpu.dot_dimension_numbers<[1], [0], [0], [1], [0, 0, 1, 1], [], []>} : vector<8x32xf32>, vector<32x128xf32>, vector<8x128xf32> -> vector<8x128xf32>
    %132 = arith.addf %130, %131 : vector<8x128xf32>
    %133 = vector.extract_strided_slice %132 {offsets = [0, 0], sizes = [8, 32], strides = [1, 1]} : vector<8x128xf32> to vector<8x32xf32>
    %134 = arith.negf %133 : vector<8x32xf32>
    %135 = math.exp %134 : vector<8x32xf32>
    %cst_36 = arith.constant 1.000000e+00 : f32
    %136 = vector.broadcast %cst_36 : f32 to vector<8x32xf32>
    %137 = arith.addf %136, %135 : vector<8x32xf32>
    %138 = arith.divf %136, %137 : vector<8x32xf32>
    %139 = vector.extract_strided_slice %132 {offsets = [0, 32], sizes = [8, 32], strides = [1, 1]} : vector<8x128xf32> to vector<8x32xf32>
    %140 = arith.negf %139 : vector<8x32xf32>
    %141 = math.exp %140 : vector<8x32xf32>
    %cst_37 = arith.constant 1.000000e+00 : f32
    %142 = vector.broadcast %cst_37 : f32 to vector<8x32xf32>
    %143 = arith.addf %142, %141 : vector<8x32xf32>
    %144 = arith.divf %142, %143 : vector<8x32xf32>
    %145 = vector.extract_strided_slice %132 {offsets = [0, 64], sizes = [8, 32], strides = [1, 1]} : vector<8x128xf32> to vector<8x32xf32>
    %146 = math.tanh %145 : vector<8x32xf32>
    %147 = vector.extract_strided_slice %132 {offsets = [0, 96], sizes = [8, 32], strides = [1, 1]} : vector<8x128xf32> to vector<8x32xf32>
    %148 = arith.negf %147 : vector<8x32xf32>
    %149 = math.exp %148 : vector<8x32xf32>
    %cst_38 = arith.constant 1.000000e+00 : f32
    %150 = vector.broadcast %cst_38 : f32 to vector<8x32xf32>
    %151 = arith.addf %150, %149 : vector<8x32xf32>
    %152 = arith.divf %150, %151 : vector<8x32xf32>
    %153 = arith.mulf %144, %126 : vector<8x32xf32>
    %154 = arith.mulf %138, %146 : vector<8x32xf32>
    %155 = arith.addf %153, %154 : vector<8x32xf32>
    %156 = math.tanh %155 : vector<8x32xf32>
    %157 = arith.mulf %152, %156 : vector<8x32xf32>
    %c32 = arith.constant 32 : index
    %c0_39 = arith.constant 0 : index
    %158 = vector.load %arg16[%c32, %c0_39] : memref<64x32xf32, #tpu.memory_space<vmem>>, vector<8x32xf32>
    tpu.vector_store %arg16[%c32, %c0_39], %157 {strides = array<i32>} : memref<64x32xf32, #tpu.memory_space<vmem>>, vector<8x32xf32>,
    %159 = vector.extract_strided_slice %10 {offsets = [40, 0], sizes = [8, 128], strides = [1, 1]} : vector<64x128xf32> to vector<8x128xf32>
    %cst_40 = arith.constant dense<0.000000e+00> : vector<8x128xf32>
    %160 = tpu.matmul %157, %11, %cst_40 {dimension_numbers = #tpu.dot_dimension_numbers<[1], [0], [0], [1], [0, 0, 1, 1], [], []>} : vector<8x32xf32>, vector<32x128xf32>, vector<8x128xf32> -> vector<8x128xf32>
    %161 = arith.addf %159, %160 : vector<8x128xf32>
    %162 = vector.extract_strided_slice %161 {offsets = [0, 0], sizes = [8, 32], strides = [1, 1]} : vector<8x128xf32> to vector<8x32xf32>
    %163 = arith.negf %162 : vector<8x32xf32>
    %164 = math.exp %163 : vector<8x32xf32>
    %cst_41 = arith.constant 1.000000e+00 : f32
    %165 = vector.broadcast %cst_41 : f32 to vector<8x32xf32>
    %166 = arith.addf %165, %164 : vector<8x32xf32>
    %167 = arith.divf %165, %166 : vector<8x32xf32>
    %168 = vector.extract_strided_slice %161 {offsets = [0, 32], sizes = [8, 32], strides = [1, 1]} : vector<8x128xf32> to vector<8x32xf32>
    %169 = arith.negf %168 : vector<8x32xf32>
    %170 = math.exp %169 : vector<8x32xf32>
    %cst_42 = arith.constant 1.000000e+00 : f32
    %171 = vector.broadcast %cst_42 : f32 to vector<8x32xf32>
    %172 = arith.addf %171, %170 : vector<8x32xf32>
    %173 = arith.divf %171, %172 : vector<8x32xf32>
    %174 = vector.extract_strided_slice %161 {offsets = [0, 64], sizes = [8, 32], strides = [1, 1]} : vector<8x128xf32> to vector<8x32xf32>
    %175 = math.tanh %174 : vector<8x32xf32>
    %176 = vector.extract_strided_slice %161 {offsets = [0, 96], sizes = [8, 32], strides = [1, 1]} : vector<8x128xf32> to vector<8x32xf32>
    %177 = arith.negf %176 : vector<8x32xf32>
    %178 = math.exp %177 : vector<8x32xf32>
    %cst_43 = arith.constant 1.000000e+00 : f32
    %179 = vector.broadcast %cst_43 : f32 to vector<8x32xf32>
    %180 = arith.addf %179, %178 : vector<8x32xf32>
    %181 = arith.divf %179, %180 : vector<8x32xf32>
    %182 = arith.mulf %173, %155 : vector<8x32xf32>
    %183 = arith.mulf %167, %175 : vector<8x32xf32>
    %184 = arith.addf %182, %183 : vector<8x32xf32>
    %185 = math.tanh %184 : vector<8x32xf32>
    %186 = arith.mulf %181, %185 : vector<8x32xf32>
    %c40 = arith.constant 40 : index
    %c0_44 = arith.constant 0 : index
    %187 = vector.load %arg16[%c40, %c0_44] : memref<64x32xf32, #tpu.memory_space<vmem>>, vector<8x32xf32>
    tpu.vector_store %arg16[%c40, %c0_44], %186 {strides = array<i32>} : memref<64x32xf32, #tpu.memory_space<vmem>>, vector<8x32xf32>,
    %188 = vector.extract_strided_slice %10 {offsets = [48, 0], sizes = [8, 128], strides = [1, 1]} : vector<64x128xf32> to vector<8x128xf32>
    %cst_45 = arith.constant dense<0.000000e+00> : vector<8x128xf32>
    %189 = tpu.matmul %186, %11, %cst_45 {dimension_numbers = #tpu.dot_dimension_numbers<[1], [0], [0], [1], [0, 0, 1, 1], [], []>} : vector<8x32xf32>, vector<32x128xf32>, vector<8x128xf32> -> vector<8x128xf32>
    %190 = arith.addf %188, %189 : vector<8x128xf32>
    %191 = vector.extract_strided_slice %190 {offsets = [0, 0], sizes = [8, 32], strides = [1, 1]} : vector<8x128xf32> to vector<8x32xf32>
    %192 = arith.negf %191 : vector<8x32xf32>
    %193 = math.exp %192 : vector<8x32xf32>
    %cst_46 = arith.constant 1.000000e+00 : f32
    %194 = vector.broadcast %cst_46 : f32 to vector<8x32xf32>
    %195 = arith.addf %194, %193 : vector<8x32xf32>
    %196 = arith.divf %194, %195 : vector<8x32xf32>
    %197 = vector.extract_strided_slice %190 {offsets = [0, 32], sizes = [8, 32], strides = [1, 1]} : vector<8x128xf32> to vector<8x32xf32>
    %198 = arith.negf %197 : vector<8x32xf32>
    %199 = math.exp %198 : vector<8x32xf32>
    %cst_47 = arith.constant 1.000000e+00 : f32
    %200 = vector.broadcast %cst_47 : f32 to vector<8x32xf32>
    %201 = arith.addf %200, %199 : vector<8x32xf32>
    %202 = arith.divf %200, %201 : vector<8x32xf32>
    %203 = vector.extract_strided_slice %190 {offsets = [0, 64], sizes = [8, 32], strides = [1, 1]} : vector<8x128xf32> to vector<8x32xf32>
    %204 = math.tanh %203 : vector<8x32xf32>
    %205 = vector.extract_strided_slice %190 {offsets = [0, 96], sizes = [8, 32], strides = [1, 1]} : vector<8x128xf32> to vector<8x32xf32>
    %206 = arith.negf %205 : vector<8x32xf32>
    %207 = math.exp %206 : vector<8x32xf32>
    %cst_48 = arith.constant 1.000000e+00 : f32
    %208 = vector.broadcast %cst_48 : f32 to vector<8x32xf32>
    %209 = arith.addf %208, %207 : vector<8x32xf32>
    %210 = arith.divf %208, %209 : vector<8x32xf32>
    %211 = arith.mulf %202, %184 : vector<8x32xf32>
    %212 = arith.mulf %196, %204 : vector<8x32xf32>
    %213 = arith.addf %211, %212 : vector<8x32xf32>
    %214 = math.tanh %213 : vector<8x32xf32>
    %215 = arith.mulf %210, %214 : vector<8x32xf32>
    %c48 = arith.constant 48 : index
    %c0_49 = arith.constant 0 : index
    %216 = vector.load %arg16[%c48, %c0_49] : memref<64x32xf32, #tpu.memory_space<vmem>>, vector<8x32xf32>
    tpu.vector_store %arg16[%c48, %c0_49], %215 {strides = array<i32>} : memref<64x32xf32, #tpu.memory_space<vmem>>, vector<8x32xf32>,
    %217 = vector.extract_strided_slice %10 {offsets = [56, 0], sizes = [8, 128], strides = [1, 1]} : vector<64x128xf32> to vector<8x128xf32>
    %cst_50 = arith.constant dense<0.000000e+00> : vector<8x128xf32>
    %218 = tpu.matmul %215, %11, %cst_50 {dimension_numbers = #tpu.dot_dimension_numbers<[1], [0], [0], [1], [0, 0, 1, 1], [], []>} : vector<8x32xf32>, vector<32x128xf32>, vector<8x128xf32> -> vector<8x128xf32>
    %219 = arith.addf %217, %218 : vector<8x128xf32>
    %220 = vector.extract_strided_slice %219 {offsets = [0, 0], sizes = [8, 32], strides = [1, 1]} : vector<8x128xf32> to vector<8x32xf32>
    %221 = arith.negf %220 : vector<8x32xf32>
    %222 = math.exp %221 : vector<8x32xf32>
    %cst_51 = arith.constant 1.000000e+00 : f32
    %223 = vector.broadcast %cst_51 : f32 to vector<8x32xf32>
    %224 = arith.addf %223, %222 : vector<8x32xf32>
    %225 = arith.divf %223, %224 : vector<8x32xf32>
    %226 = vector.extract_strided_slice %219 {offsets = [0, 32], sizes = [8, 32], strides = [1, 1]} : vector<8x128xf32> to vector<8x32xf32>
    %227 = arith.negf %226 : vector<8x32xf32>
    %228 = math.exp %227 : vector<8x32xf32>
    %cst_52 = arith.constant 1.000000e+00 : f32
    %229 = vector.broadcast %cst_52 : f32 to vector<8x32xf32>
    %230 = arith.addf %229, %228 : vector<8x32xf32>
    %231 = arith.divf %229, %230 : vector<8x32xf32>
    %232 = vector.extract_strided_slice %219 {offsets = [0, 64], sizes = [8, 32], strides = [1, 1]} : vector<8x128xf32> to vector<8x32xf32>
    %233 = math.tanh %232 : vector<8x32xf32>
    %234 = vector.extract_strided_slice %219 {offsets = [0, 96], sizes = [8, 32], strides = [1, 1]} : vector<8x128xf32> to vector<8x32xf32>
    %235 = arith.negf %234 : vector<8x32xf32>
    %236 = math.exp %235 : vector<8x32xf32>
    %cst_53 = arith.constant 1.000000e+00 : f32
    %237 = vector.broadcast %cst_53 : f32 to vector<8x32xf32>
    %238 = arith.addf %237, %236 : vector<8x32xf32>
    %239 = arith.divf %237, %238 : vector<8x32xf32>
    %240 = arith.mulf %231, %213 : vector<8x32xf32>
    %241 = arith.mulf %225, %233 : vector<8x32xf32>
    %242 = arith.addf %240, %241 : vector<8x32xf32>
    %243 = math.tanh %242 : vector<8x32xf32>
    %244 = arith.mulf %239, %243 : vector<8x32xf32>
    %c56 = arith.constant 56 : index
    %c0_54 = arith.constant 0 : index
    %245 = vector.load %arg16[%c56, %c0_54] : memref<64x32xf32, #tpu.memory_space<vmem>>, vector<8x32xf32>
    tpu.vector_store %arg16[%c56, %c0_54], %244 {strides = array<i32>} : memref<64x32xf32, #tpu.memory_space<vmem>>, vector<8x32xf32>,
    %c0_55 = arith.constant 0 : index
    %c0_56 = arith.constant 0 : index
    %246 = vector.load %arg5[%c0_55, %c0_56] : memref<32x128xf32, #tpu.memory_space<vmem>>, vector<32x128xf32>
    %cst_57 = arith.constant 0.000000e+00 : f32
    %247 = vector.broadcast %cst_57 : f32 to vector<8x32xf32>
    %cst_58 = arith.constant 0.000000e+00 : f32
    %248 = vector.broadcast %cst_58 : f32 to vector<8x32xf32>
    %249 = vector.extract_strided_slice %5 {offsets = [56, 0], sizes = [8, 128], strides = [1, 1]} : vector<64x128xf32> to vector<8x128xf32>
    %cst_59 = arith.constant dense<0.000000e+00> : vector<8x128xf32>
    %250 = tpu.matmul %247, %246, %cst_59 {dimension_numbers = #tpu.dot_dimension_numbers<[1], [0], [0], [1], [0, 0, 1, 1], [], []>} : vector<8x32xf32>, vector<32x128xf32>, vector<8x128xf32> -> vector<8x128xf32>
    %251 = arith.addf %249, %250 : vector<8x128xf32>
    %252 = vector.extract_strided_slice %251 {offsets = [0, 0], sizes = [8, 32], strides = [1, 1]} : vector<8x128xf32> to vector<8x32xf32>
    %253 = arith.negf %252 : vector<8x32xf32>
    %254 = math.exp %253 : vector<8x32xf32>
    %cst_60 = arith.constant 1.000000e+00 : f32
    %255 = vector.broadcast %cst_60 : f32 to vector<8x32xf32>
    %256 = arith.addf %255, %254 : vector<8x32xf32>
    %257 = arith.divf %255, %256 : vector<8x32xf32>
    %258 = vector.extract_strided_slice %251 {offsets = [0, 32], sizes = [8, 32], strides = [1, 1]} : vector<8x128xf32> to vector<8x32xf32>
    %259 = arith.negf %258 : vector<8x32xf32>
    %260 = math.exp %259 : vector<8x32xf32>
    %cst_61 = arith.constant 1.000000e+00 : f32
    %261 = vector.broadcast %cst_61 : f32 to vector<8x32xf32>
    %262 = arith.addf %261, %260 : vector<8x32xf32>
    %263 = arith.divf %261, %262 : vector<8x32xf32>
    %264 = vector.extract_strided_slice %251 {offsets = [0, 64], sizes = [8, 32], strides = [1, 1]} : vector<8x128xf32> to vector<8x32xf32>
    %265 = math.tanh %264 : vector<8x32xf32>
    %266 = vector.extract_strided_slice %251 {offsets = [0, 96], sizes = [8, 32], strides = [1, 1]} : vector<8x128xf32> to vector<8x32xf32>
    %267 = arith.negf %266 : vector<8x32xf32>
    %268 = math.exp %267 : vector<8x32xf32>
    %cst_62 = arith.constant 1.000000e+00 : f32
    %269 = vector.broadcast %cst_62 : f32 to vector<8x32xf32>
    %270 = arith.addf %269, %268 : vector<8x32xf32>
    %271 = arith.divf %269, %270 : vector<8x32xf32>
    %272 = arith.mulf %263, %248 : vector<8x32xf32>
    %273 = arith.mulf %257, %265 : vector<8x32xf32>
    %274 = arith.addf %272, %273 : vector<8x32xf32>
    %275 = math.tanh %274 : vector<8x32xf32>
    %276 = arith.mulf %271, %275 : vector<8x32xf32>
    %c56_63 = arith.constant 56 : index
    %c0_64 = arith.constant 0 : index
    %277 = vector.load %arg17[%c56_63, %c0_64] : memref<64x32xf32, #tpu.memory_space<vmem>>, vector<8x32xf32>
    tpu.vector_store %arg17[%c56_63, %c0_64], %276 {strides = array<i32>} : memref<64x32xf32, #tpu.memory_space<vmem>>, vector<8x32xf32>,
    %278 = vector.extract_strided_slice %5 {offsets = [48, 0], sizes = [8, 128], strides = [1, 1]} : vector<64x128xf32> to vector<8x128xf32>
    %cst_65 = arith.constant dense<0.000000e+00> : vector<8x128xf32>
    %279 = tpu.matmul %276, %246, %cst_65 {dimension_numbers = #tpu.dot_dimension_numbers<[1], [0], [0], [1], [0, 0, 1, 1], [], []>} : vector<8x32xf32>, vector<32x128xf32>, vector<8x128xf32> -> vector<8x128xf32>
    %280 = arith.addf %278, %279 : vector<8x128xf32>
    %281 = vector.extract_strided_slice %280 {offsets = [0, 0], sizes = [8, 32], strides = [1, 1]} : vector<8x128xf32> to vector<8x32xf32>
    %282 = arith.negf %281 : vector<8x32xf32>
    %283 = math.exp %282 : vector<8x32xf32>
    %cst_66 = arith.constant 1.000000e+00 : f32
    %284 = vector.broadcast %cst_66 : f32 to vector<8x32xf32>
    %285 = arith.addf %284, %283 : vector<8x32xf32>
    %286 = arith.divf %284, %285 : vector<8x32xf32>
    %287 = vector.extract_strided_slice %280 {offsets = [0, 32], sizes = [8, 32], strides = [1, 1]} : vector<8x128xf32> to vector<8x32xf32>
    %288 = arith.negf %287 : vector<8x32xf32>
    %289 = math.exp %288 : vector<8x32xf32>
    %cst_67 = arith.constant 1.000000e+00 : f32
    %290 = vector.broadcast %cst_67 : f32 to vector<8x32xf32>
    %291 = arith.addf %290, %289 : vector<8x32xf32>
    %292 = arith.divf %290, %291 : vector<8x32xf32>
    %293 = vector.extract_strided_slice %280 {offsets = [0, 64], sizes = [8, 32], strides = [1, 1]} : vector<8x128xf32> to vector<8x32xf32>
    %294 = math.tanh %293 : vector<8x32xf32>
    %295 = vector.extract_strided_slice %280 {offsets = [0, 96], sizes = [8, 32], strides = [1, 1]} : vector<8x128xf32> to vector<8x32xf32>
    %296 = arith.negf %295 : vector<8x32xf32>
    %297 = math.exp %296 : vector<8x32xf32>
    %cst_68 = arith.constant 1.000000e+00 : f32
    %298 = vector.broadcast %cst_68 : f32 to vector<8x32xf32>
    %299 = arith.addf %298, %297 : vector<8x32xf32>
    %300 = arith.divf %298, %299 : vector<8x32xf32>
    %301 = arith.mulf %292, %274 : vector<8x32xf32>
    %302 = arith.mulf %286, %294 : vector<8x32xf32>
    %303 = arith.addf %301, %302 : vector<8x32xf32>
    %304 = math.tanh %303 : vector<8x32xf32>
    %305 = arith.mulf %300, %304 : vector<8x32xf32>
    %c48_69 = arith.constant 48 : index
    %c0_70 = arith.constant 0 : index
    %306 = vector.load %arg17[%c48_69, %c0_70] : memref<64x32xf32, #tpu.memory_space<vmem>>, vector<8x32xf32>
    tpu.vector_store %arg17[%c48_69, %c0_70], %305 {strides = array<i32>} : memref<64x32xf32, #tpu.memory_space<vmem>>, vector<8x32xf32>,
    %307 = vector.extract_strided_slice %5 {offsets = [40, 0], sizes = [8, 128], strides = [1, 1]} : vector<64x128xf32> to vector<8x128xf32>
    %cst_71 = arith.constant dense<0.000000e+00> : vector<8x128xf32>
    %308 = tpu.matmul %305, %246, %cst_71 {dimension_numbers = #tpu.dot_dimension_numbers<[1], [0], [0], [1], [0, 0, 1, 1], [], []>} : vector<8x32xf32>, vector<32x128xf32>, vector<8x128xf32> -> vector<8x128xf32>
    %309 = arith.addf %307, %308 : vector<8x128xf32>
    %310 = vector.extract_strided_slice %309 {offsets = [0, 0], sizes = [8, 32], strides = [1, 1]} : vector<8x128xf32> to vector<8x32xf32>
    %311 = arith.negf %310 : vector<8x32xf32>
    %312 = math.exp %311 : vector<8x32xf32>
    %cst_72 = arith.constant 1.000000e+00 : f32
    %313 = vector.broadcast %cst_72 : f32 to vector<8x32xf32>
    %314 = arith.addf %313, %312 : vector<8x32xf32>
    %315 = arith.divf %313, %314 : vector<8x32xf32>
    %316 = vector.extract_strided_slice %309 {offsets = [0, 32], sizes = [8, 32], strides = [1, 1]} : vector<8x128xf32> to vector<8x32xf32>
    %317 = arith.negf %316 : vector<8x32xf32>
    %318 = math.exp %317 : vector<8x32xf32>
    %cst_73 = arith.constant 1.000000e+00 : f32
    %319 = vector.broadcast %cst_73 : f32 to vector<8x32xf32>
    %320 = arith.addf %319, %318 : vector<8x32xf32>
    %321 = arith.divf %319, %320 : vector<8x32xf32>
    %322 = vector.extract_strided_slice %309 {offsets = [0, 64], sizes = [8, 32], strides = [1, 1]} : vector<8x128xf32> to vector<8x32xf32>
    %323 = math.tanh %322 : vector<8x32xf32>
    %324 = vector.extract_strided_slice %309 {offsets = [0, 96], sizes = [8, 32], strides = [1, 1]} : vector<8x128xf32> to vector<8x32xf32>
    %325 = arith.negf %324 : vector<8x32xf32>
    %326 = math.exp %325 : vector<8x32xf32>
    %cst_74 = arith.constant 1.000000e+00 : f32
    %327 = vector.broadcast %cst_74 : f32 to vector<8x32xf32>
    %328 = arith.addf %327, %326 : vector<8x32xf32>
    %329 = arith.divf %327, %328 : vector<8x32xf32>
    %330 = arith.mulf %321, %303 : vector<8x32xf32>
    %331 = arith.mulf %315, %323 : vector<8x32xf32>
    %332 = arith.addf %330, %331 : vector<8x32xf32>
    %333 = math.tanh %332 : vector<8x32xf32>
    %334 = arith.mulf %329, %333 : vector<8x32xf32>
    %c40_75 = arith.constant 40 : index
    %c0_76 = arith.constant 0 : index
    %335 = vector.load %arg17[%c40_75, %c0_76] : memref<64x32xf32, #tpu.memory_space<vmem>>, vector<8x32xf32>
    tpu.vector_store %arg17[%c40_75, %c0_76], %334 {strides = array<i32>} : memref<64x32xf32, #tpu.memory_space<vmem>>, vector<8x32xf32>,
    %336 = vector.extract_strided_slice %5 {offsets = [32, 0], sizes = [8, 128], strides = [1, 1]} : vector<64x128xf32> to vector<8x128xf32>
    %cst_77 = arith.constant dense<0.000000e+00> : vector<8x128xf32>
    %337 = tpu.matmul %334, %246, %cst_77 {dimension_numbers = #tpu.dot_dimension_numbers<[1], [0], [0], [1], [0, 0, 1, 1], [], []>} : vector<8x32xf32>, vector<32x128xf32>, vector<8x128xf32> -> vector<8x128xf32>
    %338 = arith.addf %336, %337 : vector<8x128xf32>
    %339 = vector.extract_strided_slice %338 {offsets = [0, 0], sizes = [8, 32], strides = [1, 1]} : vector<8x128xf32> to vector<8x32xf32>
    %340 = arith.negf %339 : vector<8x32xf32>
    %341 = math.exp %340 : vector<8x32xf32>
    %cst_78 = arith.constant 1.000000e+00 : f32
    %342 = vector.broadcast %cst_78 : f32 to vector<8x32xf32>
    %343 = arith.addf %342, %341 : vector<8x32xf32>
    %344 = arith.divf %342, %343 : vector<8x32xf32>
    %345 = vector.extract_strided_slice %338 {offsets = [0, 32], sizes = [8, 32], strides = [1, 1]} : vector<8x128xf32> to vector<8x32xf32>
    %346 = arith.negf %345 : vector<8x32xf32>
    %347 = math.exp %346 : vector<8x32xf32>
    %cst_79 = arith.constant 1.000000e+00 : f32
    %348 = vector.broadcast %cst_79 : f32 to vector<8x32xf32>
    %349 = arith.addf %348, %347 : vector<8x32xf32>
    %350 = arith.divf %348, %349 : vector<8x32xf32>
    %351 = vector.extract_strided_slice %338 {offsets = [0, 64], sizes = [8, 32], strides = [1, 1]} : vector<8x128xf32> to vector<8x32xf32>
    %352 = math.tanh %351 : vector<8x32xf32>
    %353 = vector.extract_strided_slice %338 {offsets = [0, 96], sizes = [8, 32], strides = [1, 1]} : vector<8x128xf32> to vector<8x32xf32>
    %354 = arith.negf %353 : vector<8x32xf32>
    %355 = math.exp %354 : vector<8x32xf32>
    %cst_80 = arith.constant 1.000000e+00 : f32
    %356 = vector.broadcast %cst_80 : f32 to vector<8x32xf32>
    %357 = arith.addf %356, %355 : vector<8x32xf32>
    %358 = arith.divf %356, %357 : vector<8x32xf32>
    %359 = arith.mulf %350, %332 : vector<8x32xf32>
    %360 = arith.mulf %344, %352 : vector<8x32xf32>
    %361 = arith.addf %359, %360 : vector<8x32xf32>
    %362 = math.tanh %361 : vector<8x32xf32>
    %363 = arith.mulf %358, %362 : vector<8x32xf32>
    %c32_81 = arith.constant 32 : index
    %c0_82 = arith.constant 0 : index
    %364 = vector.load %arg17[%c32_81, %c0_82] : memref<64x32xf32, #tpu.memory_space<vmem>>, vector<8x32xf32>
    tpu.vector_store %arg17[%c32_81, %c0_82], %363 {strides = array<i32>} : memref<64x32xf32, #tpu.memory_space<vmem>>, vector<8x32xf32>,
    %365 = vector.extract_strided_slice %5 {offsets = [24, 0], sizes = [8, 128], strides = [1, 1]} : vector<64x128xf32> to vector<8x128xf32>
    %cst_83 = arith.constant dense<0.000000e+00> : vector<8x128xf32>
    %366 = tpu.matmul %363, %246, %cst_83 {dimension_numbers = #tpu.dot_dimension_numbers<[1], [0], [0], [1], [0, 0, 1, 1], [], []>} : vector<8x32xf32>, vector<32x128xf32>, vector<8x128xf32> -> vector<8x128xf32>
    %367 = arith.addf %365, %366 : vector<8x128xf32>
    %368 = vector.extract_strided_slice %367 {offsets = [0, 0], sizes = [8, 32], strides = [1, 1]} : vector<8x128xf32> to vector<8x32xf32>
    %369 = arith.negf %368 : vector<8x32xf32>
    %370 = math.exp %369 : vector<8x32xf32>
    %cst_84 = arith.constant 1.000000e+00 : f32
    %371 = vector.broadcast %cst_84 : f32 to vector<8x32xf32>
    %372 = arith.addf %371, %370 : vector<8x32xf32>
    %373 = arith.divf %371, %372 : vector<8x32xf32>
    %374 = vector.extract_strided_slice %367 {offsets = [0, 32], sizes = [8, 32], strides = [1, 1]} : vector<8x128xf32> to vector<8x32xf32>
    %375 = arith.negf %374 : vector<8x32xf32>
    %376 = math.exp %375 : vector<8x32xf32>
    %cst_85 = arith.constant 1.000000e+00 : f32
    %377 = vector.broadcast %cst_85 : f32 to vector<8x32xf32>
    %378 = arith.addf %377, %376 : vector<8x32xf32>
    %379 = arith.divf %377, %378 : vector<8x32xf32>
    %380 = vector.extract_strided_slice %367 {offsets = [0, 64], sizes = [8, 32], strides = [1, 1]} : vector<8x128xf32> to vector<8x32xf32>
    %381 = math.tanh %380 : vector<8x32xf32>
    %382 = vector.extract_strided_slice %367 {offsets = [0, 96], sizes = [8, 32], strides = [1, 1]} : vector<8x128xf32> to vector<8x32xf32>
    %383 = arith.negf %382 : vector<8x32xf32>
    %384 = math.exp %383 : vector<8x32xf32>
    %cst_86 = arith.constant 1.000000e+00 : f32
    %385 = vector.broadcast %cst_86 : f32 to vector<8x32xf32>
    %386 = arith.addf %385, %384 : vector<8x32xf32>
    %387 = arith.divf %385, %386 : vector<8x32xf32>
    %388 = arith.mulf %379, %361 : vector<8x32xf32>
    %389 = arith.mulf %373, %381 : vector<8x32xf32>
    %390 = arith.addf %388, %389 : vector<8x32xf32>
    %391 = math.tanh %390 : vector<8x32xf32>
    %392 = arith.mulf %387, %391 : vector<8x32xf32>
    %c24_87 = arith.constant 24 : index
    %c0_88 = arith.constant 0 : index
    %393 = vector.load %arg17[%c24_87, %c0_88] : memref<64x32xf32, #tpu.memory_space<vmem>>, vector<8x32xf32>
    tpu.vector_store %arg17[%c24_87, %c0_88], %392 {strides = array<i32>} : memref<64x32xf32, #tpu.memory_space<vmem>>, vector<8x32xf32>,
    %394 = vector.extract_strided_slice %5 {offsets = [16, 0], sizes = [8, 128], strides = [1, 1]} : vector<64x128xf32> to vector<8x128xf32>
    %cst_89 = arith.constant dense<0.000000e+00> : vector<8x128xf32>
    %395 = tpu.matmul %392, %246, %cst_89 {dimension_numbers = #tpu.dot_dimension_numbers<[1], [0], [0], [1], [0, 0, 1, 1], [], []>} : vector<8x32xf32>, vector<32x128xf32>, vector<8x128xf32> -> vector<8x128xf32>
    %396 = arith.addf %394, %395 : vector<8x128xf32>
    %397 = vector.extract_strided_slice %396 {offsets = [0, 0], sizes = [8, 32], strides = [1, 1]} : vector<8x128xf32> to vector<8x32xf32>
    %398 = arith.negf %397 : vector<8x32xf32>
    %399 = math.exp %398 : vector<8x32xf32>
    %cst_90 = arith.constant 1.000000e+00 : f32
    %400 = vector.broadcast %cst_90 : f32 to vector<8x32xf32>
    %401 = arith.addf %400, %399 : vector<8x32xf32>
    %402 = arith.divf %400, %401 : vector<8x32xf32>
    %403 = vector.extract_strided_slice %396 {offsets = [0, 32], sizes = [8, 32], strides = [1, 1]} : vector<8x128xf32> to vector<8x32xf32>
    %404 = arith.negf %403 : vector<8x32xf32>
    %405 = math.exp %404 : vector<8x32xf32>
    %cst_91 = arith.constant 1.000000e+00 : f32
    %406 = vector.broadcast %cst_91 : f32 to vector<8x32xf32>
    %407 = arith.addf %406, %405 : vector<8x32xf32>
    %408 = arith.divf %406, %407 : vector<8x32xf32>
    %409 = vector.extract_strided_slice %396 {offsets = [0, 64], sizes = [8, 32], strides = [1, 1]} : vector<8x128xf32> to vector<8x32xf32>
    %410 = math.tanh %409 : vector<8x32xf32>
    %411 = vector.extract_strided_slice %396 {offsets = [0, 96], sizes = [8, 32], strides = [1, 1]} : vector<8x128xf32> to vector<8x32xf32>
    %412 = arith.negf %411 : vector<8x32xf32>
    %413 = math.exp %412 : vector<8x32xf32>
    %cst_92 = arith.constant 1.000000e+00 : f32
    %414 = vector.broadcast %cst_92 : f32 to vector<8x32xf32>
    %415 = arith.addf %414, %413 : vector<8x32xf32>
    %416 = arith.divf %414, %415 : vector<8x32xf32>
    %417 = arith.mulf %408, %390 : vector<8x32xf32>
    %418 = arith.mulf %402, %410 : vector<8x32xf32>
    %419 = arith.addf %417, %418 : vector<8x32xf32>
    %420 = math.tanh %419 : vector<8x32xf32>
    %421 = arith.mulf %416, %420 : vector<8x32xf32>
    %c16_93 = arith.constant 16 : index
    %c0_94 = arith.constant 0 : index
    %422 = vector.load %arg17[%c16_93, %c0_94] : memref<64x32xf32, #tpu.memory_space<vmem>>, vector<8x32xf32>
    tpu.vector_store %arg17[%c16_93, %c0_94], %421 {strides = array<i32>} : memref<64x32xf32, #tpu.memory_space<vmem>>, vector<8x32xf32>,
    %423 = vector.extract_strided_slice %5 {offsets = [8, 0], sizes = [8, 128], strides = [1, 1]} : vector<64x128xf32> to vector<8x128xf32>
    %cst_95 = arith.constant dense<0.000000e+00> : vector<8x128xf32>
    %424 = tpu.matmul %421, %246, %cst_95 {dimension_numbers = #tpu.dot_dimension_numbers<[1], [0], [0], [1], [0, 0, 1, 1], [], []>} : vector<8x32xf32>, vector<32x128xf32>, vector<8x128xf32> -> vector<8x128xf32>
    %425 = arith.addf %423, %424 : vector<8x128xf32>
    %426 = vector.extract_strided_slice %425 {offsets = [0, 0], sizes = [8, 32], strides = [1, 1]} : vector<8x128xf32> to vector<8x32xf32>
    %427 = arith.negf %426 : vector<8x32xf32>
    %428 = math.exp %427 : vector<8x32xf32>
    %cst_96 = arith.constant 1.000000e+00 : f32
    %429 = vector.broadcast %cst_96 : f32 to vector<8x32xf32>
    %430 = arith.addf %429, %428 : vector<8x32xf32>
    %431 = arith.divf %429, %430 : vector<8x32xf32>
    %432 = vector.extract_strided_slice %425 {offsets = [0, 32], sizes = [8, 32], strides = [1, 1]} : vector<8x128xf32> to vector<8x32xf32>
    %433 = arith.negf %432 : vector<8x32xf32>
    %434 = math.exp %433 : vector<8x32xf32>
    %cst_97 = arith.constant 1.000000e+00 : f32
    %435 = vector.broadcast %cst_97 : f32 to vector<8x32xf32>
    %436 = arith.addf %435, %434 : vector<8x32xf32>
    %437 = arith.divf %435, %436 : vector<8x32xf32>
    %438 = vector.extract_strided_slice %425 {offsets = [0, 64], sizes = [8, 32], strides = [1, 1]} : vector<8x128xf32> to vector<8x32xf32>
    %439 = math.tanh %438 : vector<8x32xf32>
    %440 = vector.extract_strided_slice %425 {offsets = [0, 96], sizes = [8, 32], strides = [1, 1]} : vector<8x128xf32> to vector<8x32xf32>
    %441 = arith.negf %440 : vector<8x32xf32>
    %442 = math.exp %441 : vector<8x32xf32>
    %cst_98 = arith.constant 1.000000e+00 : f32
    %443 = vector.broadcast %cst_98 : f32 to vector<8x32xf32>
    %444 = arith.addf %443, %442 : vector<8x32xf32>
    %445 = arith.divf %443, %444 : vector<8x32xf32>
    %446 = arith.mulf %437, %419 : vector<8x32xf32>
    %447 = arith.mulf %431, %439 : vector<8x32xf32>
    %448 = arith.addf %446, %447 : vector<8x32xf32>
    %449 = math.tanh %448 : vector<8x32xf32>
    %450 = arith.mulf %445, %449 : vector<8x32xf32>
    %c8_99 = arith.constant 8 : index
    %c0_100 = arith.constant 0 : index
    %451 = vector.load %arg17[%c8_99, %c0_100] : memref<64x32xf32, #tpu.memory_space<vmem>>, vector<8x32xf32>
    tpu.vector_store %arg17[%c8_99, %c0_100], %450 {strides = array<i32>} : memref<64x32xf32, #tpu.memory_space<vmem>>, vector<8x32xf32>,
    %452 = vector.extract_strided_slice %5 {offsets = [0, 0], sizes = [8, 128], strides = [1, 1]} : vector<64x128xf32> to vector<8x128xf32>
    %cst_101 = arith.constant dense<0.000000e+00> : vector<8x128xf32>
    %453 = tpu.matmul %450, %246, %cst_101 {dimension_numbers = #tpu.dot_dimension_numbers<[1], [0], [0], [1], [0, 0, 1, 1], [], []>} : vector<8x32xf32>, vector<32x128xf32>, vector<8x128xf32> -> vector<8x128xf32>
    %454 = arith.addf %452, %453 : vector<8x128xf32>
    %455 = vector.extract_strided_slice %454 {offsets = [0, 0], sizes = [8, 32], strides = [1, 1]} : vector<8x128xf32> to vector<8x32xf32>
    %456 = arith.negf %455 : vector<8x32xf32>
    %457 = math.exp %456 : vector<8x32xf32>
    %cst_102 = arith.constant 1.000000e+00 : f32
    %458 = vector.broadcast %cst_102 : f32 to vector<8x32xf32>
    %459 = arith.addf %458, %457 : vector<8x32xf32>
    %460 = arith.divf %458, %459 : vector<8x32xf32>
    %461 = vector.extract_strided_slice %454 {offsets = [0, 32], sizes = [8, 32], strides = [1, 1]} : vector<8x128xf32> to vector<8x32xf32>
    %462 = arith.negf %461 : vector<8x32xf32>
    %463 = math.exp %462 : vector<8x32xf32>
    %cst_103 = arith.constant 1.000000e+00 : f32
    %464 = vector.broadcast %cst_103 : f32 to vector<8x32xf32>
    %465 = arith.addf %464, %463 : vector<8x32xf32>
    %466 = arith.divf %464, %465 : vector<8x32xf32>
    %467 = vector.extract_strided_slice %454 {offsets = [0, 64], sizes = [8, 32], strides = [1, 1]} : vector<8x128xf32> to vector<8x32xf32>
    %468 = math.tanh %467 : vector<8x32xf32>
    %469 = vector.extract_strided_slice %454 {offsets = [0, 96], sizes = [8, 32], strides = [1, 1]} : vector<8x128xf32> to vector<8x32xf32>
    %470 = arith.negf %469 : vector<8x32xf32>
    %471 = math.exp %470 : vector<8x32xf32>
    %cst_104 = arith.constant 1.000000e+00 : f32
    %472 = vector.broadcast %cst_104 : f32 to vector<8x32xf32>
    %473 = arith.addf %472, %471 : vector<8x32xf32>
    %474 = arith.divf %472, %473 : vector<8x32xf32>
    %475 = arith.mulf %466, %448 : vector<8x32xf32>
    %476 = arith.mulf %460, %468 : vector<8x32xf32>
    %477 = arith.addf %475, %476 : vector<8x32xf32>
    %478 = math.tanh %477 : vector<8x32xf32>
    %479 = arith.mulf %474, %478 : vector<8x32xf32>
    %c0_105 = arith.constant 0 : index
    %c0_106 = arith.constant 0 : index
    %480 = vector.load %arg17[%c0_105, %c0_106] : memref<64x32xf32, #tpu.memory_space<vmem>>, vector<8x32xf32>
    tpu.vector_store %arg17[%c0_105, %c0_106], %479 {strides = array<i32>} : memref<64x32xf32, #tpu.memory_space<vmem>>, vector<8x32xf32>,
    %c0_107 = arith.constant 0 : index
    %c0_108 = arith.constant 0 : index
    %481 = vector.load %arg16[%c0_107, %c0_108] : memref<64x32xf32, #tpu.memory_space<vmem>>, vector<64x32xf32>
    %c0_109 = arith.constant 0 : index
    %c0_110 = arith.constant 0 : index
    %482 = vector.load %arg17[%c0_109, %c0_110] : memref<64x32xf32, #tpu.memory_space<vmem>>, vector<64x32xf32>
    %c0_111 = arith.constant 0 : index
    %c0_112 = arith.constant 0 : index
    %483 = vector.load %arg10[%c0_111, %c0_112] : memref<64x128xf32, #tpu.memory_space<vmem>>, vector<64x128xf32>
    %484 = vector.extract_strided_slice %483 {offsets = [0, 0], sizes = [32, 128], strides = [1, 1]} : vector<64x128xf32> to vector<32x128xf32>
    %cst_113 = arith.constant dense<0.000000e+00> : vector<64x128xf32>
    %485 = tpu.matmul %481, %484, %cst_113 {dimension_numbers = #tpu.dot_dimension_numbers<[1], [0], [0], [1], [0, 0, 1, 1], [], []>} : vector<64x32xf32>, vector<32x128xf32>, vector<64x128xf32> -> vector<64x128xf32>
    %486 = vector.extract_strided_slice %483 {offsets = [32, 0], sizes = [32, 128], strides = [1, 1]} : vector<64x128xf32> to vector<32x128xf32>
    %cst_114 = arith.constant dense<0.000000e+00> : vector<64x128xf32>
    %487 = tpu.matmul %482, %486, %cst_114 {dimension_numbers = #tpu.dot_dimension_numbers<[1], [0], [0], [1], [0, 0, 1, 1], [], []>} : vector<64x32xf32>, vector<32x128xf32>, vector<64x128xf32> -> vector<64x128xf32>
    %488 = arith.addf %485, %487 : vector<64x128xf32>
    %c0_115 = arith.constant 0 : index
    %c0_116 = arith.constant 0 : index
    %489 = vector.load %arg12[%c0_115, %c0_116] : memref<1x128xf32, #tpu.memory_space<vmem>>, vector<1x128xf32>
    %490 = vector.broadcast %489 : vector<1x128xf32> to vector<64x128xf32>
    %491 = arith.addf %488, %490 : vector<64x128xf32>
    %c0_117 = arith.constant 0 : index
    %c0_118 = arith.constant 0 : index
    %492 = vector.load %arg11[%c0_117, %c0_118] : memref<32x128xf32, #tpu.memory_space<vmem>>, vector<32x128xf32>
    %cst_119 = arith.constant 0.000000e+00 : f32
    %493 = vector.broadcast %cst_119 : f32 to vector<8x32xf32>
    %cst_120 = arith.constant 0.000000e+00 : f32
    %494 = vector.broadcast %cst_120 : f32 to vector<8x32xf32>
    %495 = vector.extract_strided_slice %491 {offsets = [56, 0], sizes = [8, 128], strides = [1, 1]} : vector<64x128xf32> to vector<8x128xf32>
    %cst_121 = arith.constant dense<0.000000e+00> : vector<8x128xf32>
    %496 = tpu.matmul %493, %492, %cst_121 {dimension_numbers = #tpu.dot_dimension_numbers<[1], [0], [0], [1], [0, 0, 1, 1], [], []>} : vector<8x32xf32>, vector<32x128xf32>, vector<8x128xf32> -> vector<8x128xf32>
    %497 = arith.addf %495, %496 : vector<8x128xf32>
    %498 = vector.extract_strided_slice %497 {offsets = [0, 0], sizes = [8, 32], strides = [1, 1]} : vector<8x128xf32> to vector<8x32xf32>
    %499 = arith.negf %498 : vector<8x32xf32>
    %500 = math.exp %499 : vector<8x32xf32>
    %cst_122 = arith.constant 1.000000e+00 : f32
    %501 = vector.broadcast %cst_122 : f32 to vector<8x32xf32>
    %502 = arith.addf %501, %500 : vector<8x32xf32>
    %503 = arith.divf %501, %502 : vector<8x32xf32>
    %504 = vector.extract_strided_slice %497 {offsets = [0, 32], sizes = [8, 32], strides = [1, 1]} : vector<8x128xf32> to vector<8x32xf32>
    %505 = arith.negf %504 : vector<8x32xf32>
    %506 = math.exp %505 : vector<8x32xf32>
    %cst_123 = arith.constant 1.000000e+00 : f32
    %507 = vector.broadcast %cst_123 : f32 to vector<8x32xf32>
    %508 = arith.addf %507, %506 : vector<8x32xf32>
    %509 = arith.divf %507, %508 : vector<8x32xf32>
    %510 = vector.extract_strided_slice %497 {offsets = [0, 64], sizes = [8, 32], strides = [1, 1]} : vector<8x128xf32> to vector<8x32xf32>
    %511 = math.tanh %510 : vector<8x32xf32>
    %512 = vector.extract_strided_slice %497 {offsets = [0, 96], sizes = [8, 32], strides = [1, 1]} : vector<8x128xf32> to vector<8x32xf32>
    %513 = arith.negf %512 : vector<8x32xf32>
    %514 = math.exp %513 : vector<8x32xf32>
    %cst_124 = arith.constant 1.000000e+00 : f32
    %515 = vector.broadcast %cst_124 : f32 to vector<8x32xf32>
    %516 = arith.addf %515, %514 : vector<8x32xf32>
    %517 = arith.divf %515, %516 : vector<8x32xf32>
    %518 = arith.mulf %509, %494 : vector<8x32xf32>
    %519 = arith.mulf %503, %511 : vector<8x32xf32>
    %520 = arith.addf %518, %519 : vector<8x32xf32>
    %521 = math.tanh %520 : vector<8x32xf32>
    %522 = arith.mulf %517, %521 : vector<8x32xf32>
    %523 = vector.extract_strided_slice %491 {offsets = [48, 0], sizes = [8, 128], strides = [1, 1]} : vector<64x128xf32> to vector<8x128xf32>
    %cst_125 = arith.constant dense<0.000000e+00> : vector<8x128xf32>
    %524 = tpu.matmul %522, %492, %cst_125 {dimension_numbers = #tpu.dot_dimension_numbers<[1], [0], [0], [1], [0, 0, 1, 1], [], []>} : vector<8x32xf32>, vector<32x128xf32>, vector<8x128xf32> -> vector<8x128xf32>
    %525 = arith.addf %523, %524 : vector<8x128xf32>
    %526 = vector.extract_strided_slice %525 {offsets = [0, 0], sizes = [8, 32], strides = [1, 1]} : vector<8x128xf32> to vector<8x32xf32>
    %527 = arith.negf %526 : vector<8x32xf32>
    %528 = math.exp %527 : vector<8x32xf32>
    %cst_126 = arith.constant 1.000000e+00 : f32
    %529 = vector.broadcast %cst_126 : f32 to vector<8x32xf32>
    %530 = arith.addf %529, %528 : vector<8x32xf32>
    %531 = arith.divf %529, %530 : vector<8x32xf32>
    %532 = vector.extract_strided_slice %525 {offsets = [0, 32], sizes = [8, 32], strides = [1, 1]} : vector<8x128xf32> to vector<8x32xf32>
    %533 = arith.negf %532 : vector<8x32xf32>
    %534 = math.exp %533 : vector<8x32xf32>
    %cst_127 = arith.constant 1.000000e+00 : f32
    %535 = vector.broadcast %cst_127 : f32 to vector<8x32xf32>
    %536 = arith.addf %535, %534 : vector<8x32xf32>
    %537 = arith.divf %535, %536 : vector<8x32xf32>
    %538 = vector.extract_strided_slice %525 {offsets = [0, 64], sizes = [8, 32], strides = [1, 1]} : vector<8x128xf32> to vector<8x32xf32>
    %539 = math.tanh %538 : vector<8x32xf32>
    %540 = vector.extract_strided_slice %525 {offsets = [0, 96], sizes = [8, 32], strides = [1, 1]} : vector<8x128xf32> to vector<8x32xf32>
    %541 = arith.negf %540 : vector<8x32xf32>
    %542 = math.exp %541 : vector<8x32xf32>
    %cst_128 = arith.constant 1.000000e+00 : f32
    %543 = vector.broadcast %cst_128 : f32 to vector<8x32xf32>
    %544 = arith.addf %543, %542 : vector<8x32xf32>
    %545 = arith.divf %543, %544 : vector<8x32xf32>
    %546 = arith.mulf %537, %520 : vector<8x32xf32>
    %547 = arith.mulf %531, %539 : vector<8x32xf32>
    %548 = arith.addf %546, %547 : vector<8x32xf32>
    %549 = math.tanh %548 : vector<8x32xf32>
    %550 = arith.mulf %545, %549 : vector<8x32xf32>
    %551 = vector.extract_strided_slice %491 {offsets = [40, 0], sizes = [8, 128], strides = [1, 1]} : vector<64x128xf32> to vector<8x128xf32>
    %cst_129 = arith.constant dense<0.000000e+00> : vector<8x128xf32>
    %552 = tpu.matmul %550, %492, %cst_129 {dimension_numbers = #tpu.dot_dimension_numbers<[1], [0], [0], [1], [0, 0, 1, 1], [], []>} : vector<8x32xf32>, vector<32x128xf32>, vector<8x128xf32> -> vector<8x128xf32>
    %553 = arith.addf %551, %552 : vector<8x128xf32>
    %554 = vector.extract_strided_slice %553 {offsets = [0, 0], sizes = [8, 32], strides = [1, 1]} : vector<8x128xf32> to vector<8x32xf32>
    %555 = arith.negf %554 : vector<8x32xf32>
    %556 = math.exp %555 : vector<8x32xf32>
    %cst_130 = arith.constant 1.000000e+00 : f32
    %557 = vector.broadcast %cst_130 : f32 to vector<8x32xf32>
    %558 = arith.addf %557, %556 : vector<8x32xf32>
    %559 = arith.divf %557, %558 : vector<8x32xf32>
    %560 = vector.extract_strided_slice %553 {offsets = [0, 32], sizes = [8, 32], strides = [1, 1]} : vector<8x128xf32> to vector<8x32xf32>
    %561 = arith.negf %560 : vector<8x32xf32>
    %562 = math.exp %561 : vector<8x32xf32>
    %cst_131 = arith.constant 1.000000e+00 : f32
    %563 = vector.broadcast %cst_131 : f32 to vector<8x32xf32>
    %564 = arith.addf %563, %562 : vector<8x32xf32>
    %565 = arith.divf %563, %564 : vector<8x32xf32>
    %566 = vector.extract_strided_slice %553 {offsets = [0, 64], sizes = [8, 32], strides = [1, 1]} : vector<8x128xf32> to vector<8x32xf32>
    %567 = math.tanh %566 : vector<8x32xf32>
    %568 = vector.extract_strided_slice %553 {offsets = [0, 96], sizes = [8, 32], strides = [1, 1]} : vector<8x128xf32> to vector<8x32xf32>
    %569 = arith.negf %568 : vector<8x32xf32>
    %570 = math.exp %569 : vector<8x32xf32>
    %cst_132 = arith.constant 1.000000e+00 : f32
    %571 = vector.broadcast %cst_132 : f32 to vector<8x32xf32>
    %572 = arith.addf %571, %570 : vector<8x32xf32>
    %573 = arith.divf %571, %572 : vector<8x32xf32>
    %574 = arith.mulf %565, %548 : vector<8x32xf32>
    %575 = arith.mulf %559, %567 : vector<8x32xf32>
    %576 = arith.addf %574, %575 : vector<8x32xf32>
    %577 = math.tanh %576 : vector<8x32xf32>
    %578 = arith.mulf %573, %577 : vector<8x32xf32>
    %579 = vector.extract_strided_slice %491 {offsets = [32, 0], sizes = [8, 128], strides = [1, 1]} : vector<64x128xf32> to vector<8x128xf32>
    %cst_133 = arith.constant dense<0.000000e+00> : vector<8x128xf32>
    %580 = tpu.matmul %578, %492, %cst_133 {dimension_numbers = #tpu.dot_dimension_numbers<[1], [0], [0], [1], [0, 0, 1, 1], [], []>} : vector<8x32xf32>, vector<32x128xf32>, vector<8x128xf32> -> vector<8x128xf32>
    %581 = arith.addf %579, %580 : vector<8x128xf32>
    %582 = vector.extract_strided_slice %581 {offsets = [0, 0], sizes = [8, 32], strides = [1, 1]} : vector<8x128xf32> to vector<8x32xf32>
    %583 = arith.negf %582 : vector<8x32xf32>
    %584 = math.exp %583 : vector<8x32xf32>
    %cst_134 = arith.constant 1.000000e+00 : f32
    %585 = vector.broadcast %cst_134 : f32 to vector<8x32xf32>
    %586 = arith.addf %585, %584 : vector<8x32xf32>
    %587 = arith.divf %585, %586 : vector<8x32xf32>
    %588 = vector.extract_strided_slice %581 {offsets = [0, 32], sizes = [8, 32], strides = [1, 1]} : vector<8x128xf32> to vector<8x32xf32>
    %589 = arith.negf %588 : vector<8x32xf32>
    %590 = math.exp %589 : vector<8x32xf32>
    %cst_135 = arith.constant 1.000000e+00 : f32
    %591 = vector.broadcast %cst_135 : f32 to vector<8x32xf32>
    %592 = arith.addf %591, %590 : vector<8x32xf32>
    %593 = arith.divf %591, %592 : vector<8x32xf32>
    %594 = vector.extract_strided_slice %581 {offsets = [0, 64], sizes = [8, 32], strides = [1, 1]} : vector<8x128xf32> to vector<8x32xf32>
    %595 = math.tanh %594 : vector<8x32xf32>
    %596 = vector.extract_strided_slice %581 {offsets = [0, 96], sizes = [8, 32], strides = [1, 1]} : vector<8x128xf32> to vector<8x32xf32>
    %597 = arith.negf %596 : vector<8x32xf32>
    %598 = math.exp %597 : vector<8x32xf32>
    %cst_136 = arith.constant 1.000000e+00 : f32
    %599 = vector.broadcast %cst_136 : f32 to vector<8x32xf32>
    %600 = arith.addf %599, %598 : vector<8x32xf32>
    %601 = arith.divf %599, %600 : vector<8x32xf32>
    %602 = arith.mulf %593, %576 : vector<8x32xf32>
    %603 = arith.mulf %587, %595 : vector<8x32xf32>
    %604 = arith.addf %602, %603 : vector<8x32xf32>
    %605 = math.tanh %604 : vector<8x32xf32>
    %606 = arith.mulf %601, %605 : vector<8x32xf32>
    %607 = vector.extract_strided_slice %491 {offsets = [24, 0], sizes = [8, 128], strides = [1, 1]} : vector<64x128xf32> to vector<8x128xf32>
    %cst_137 = arith.constant dense<0.000000e+00> : vector<8x128xf32>
    %608 = tpu.matmul %606, %492, %cst_137 {dimension_numbers = #tpu.dot_dimension_numbers<[1], [0], [0], [1], [0, 0, 1, 1], [], []>} : vector<8x32xf32>, vector<32x128xf32>, vector<8x128xf32> -> vector<8x128xf32>
    %609 = arith.addf %607, %608 : vector<8x128xf32>
    %610 = vector.extract_strided_slice %609 {offsets = [0, 0], sizes = [8, 32], strides = [1, 1]} : vector<8x128xf32> to vector<8x32xf32>
    %611 = arith.negf %610 : vector<8x32xf32>
    %612 = math.exp %611 : vector<8x32xf32>
    %cst_138 = arith.constant 1.000000e+00 : f32
    %613 = vector.broadcast %cst_138 : f32 to vector<8x32xf32>
    %614 = arith.addf %613, %612 : vector<8x32xf32>
    %615 = arith.divf %613, %614 : vector<8x32xf32>
    %616 = vector.extract_strided_slice %609 {offsets = [0, 32], sizes = [8, 32], strides = [1, 1]} : vector<8x128xf32> to vector<8x32xf32>
    %617 = arith.negf %616 : vector<8x32xf32>
    %618 = math.exp %617 : vector<8x32xf32>
    %cst_139 = arith.constant 1.000000e+00 : f32
    %619 = vector.broadcast %cst_139 : f32 to vector<8x32xf32>
    %620 = arith.addf %619, %618 : vector<8x32xf32>
    %621 = arith.divf %619, %620 : vector<8x32xf32>
    %622 = vector.extract_strided_slice %609 {offsets = [0, 64], sizes = [8, 32], strides = [1, 1]} : vector<8x128xf32> to vector<8x32xf32>
    %623 = math.tanh %622 : vector<8x32xf32>
    %624 = vector.extract_strided_slice %609 {offsets = [0, 96], sizes = [8, 32], strides = [1, 1]} : vector<8x128xf32> to vector<8x32xf32>
    %625 = arith.negf %624 : vector<8x32xf32>
    %626 = math.exp %625 : vector<8x32xf32>
    %cst_140 = arith.constant 1.000000e+00 : f32
    %627 = vector.broadcast %cst_140 : f32 to vector<8x32xf32>
    %628 = arith.addf %627, %626 : vector<8x32xf32>
    %629 = arith.divf %627, %628 : vector<8x32xf32>
    %630 = arith.mulf %621, %604 : vector<8x32xf32>
    %631 = arith.mulf %615, %623 : vector<8x32xf32>
    %632 = arith.addf %630, %631 : vector<8x32xf32>
    %633 = math.tanh %632 : vector<8x32xf32>
    %634 = arith.mulf %629, %633 : vector<8x32xf32>
    %635 = vector.extract_strided_slice %491 {offsets = [16, 0], sizes = [8, 128], strides = [1, 1]} : vector<64x128xf32> to vector<8x128xf32>
    %cst_141 = arith.constant dense<0.000000e+00> : vector<8x128xf32>
    %636 = tpu.matmul %634, %492, %cst_141 {dimension_numbers = #tpu.dot_dimension_numbers<[1], [0], [0], [1], [0, 0, 1, 1], [], []>} : vector<8x32xf32>, vector<32x128xf32>, vector<8x128xf32> -> vector<8x128xf32>
    %637 = arith.addf %635, %636 : vector<8x128xf32>
    %638 = vector.extract_strided_slice %637 {offsets = [0, 0], sizes = [8, 32], strides = [1, 1]} : vector<8x128xf32> to vector<8x32xf32>
    %639 = arith.negf %638 : vector<8x32xf32>
    %640 = math.exp %639 : vector<8x32xf32>
    %cst_142 = arith.constant 1.000000e+00 : f32
    %641 = vector.broadcast %cst_142 : f32 to vector<8x32xf32>
    %642 = arith.addf %641, %640 : vector<8x32xf32>
    %643 = arith.divf %641, %642 : vector<8x32xf32>
    %644 = vector.extract_strided_slice %637 {offsets = [0, 32], sizes = [8, 32], strides = [1, 1]} : vector<8x128xf32> to vector<8x32xf32>
    %645 = arith.negf %644 : vector<8x32xf32>
    %646 = math.exp %645 : vector<8x32xf32>
    %cst_143 = arith.constant 1.000000e+00 : f32
    %647 = vector.broadcast %cst_143 : f32 to vector<8x32xf32>
    %648 = arith.addf %647, %646 : vector<8x32xf32>
    %649 = arith.divf %647, %648 : vector<8x32xf32>
    %650 = vector.extract_strided_slice %637 {offsets = [0, 64], sizes = [8, 32], strides = [1, 1]} : vector<8x128xf32> to vector<8x32xf32>
    %651 = math.tanh %650 : vector<8x32xf32>
    %652 = vector.extract_strided_slice %637 {offsets = [0, 96], sizes = [8, 32], strides = [1, 1]} : vector<8x128xf32> to vector<8x32xf32>
    %653 = arith.negf %652 : vector<8x32xf32>
    %654 = math.exp %653 : vector<8x32xf32>
    %cst_144 = arith.constant 1.000000e+00 : f32
    %655 = vector.broadcast %cst_144 : f32 to vector<8x32xf32>
    %656 = arith.addf %655, %654 : vector<8x32xf32>
    %657 = arith.divf %655, %656 : vector<8x32xf32>
    %658 = arith.mulf %649, %632 : vector<8x32xf32>
    %659 = arith.mulf %643, %651 : vector<8x32xf32>
    %660 = arith.addf %658, %659 : vector<8x32xf32>
    %661 = math.tanh %660 : vector<8x32xf32>
    %662 = arith.mulf %657, %661 : vector<8x32xf32>
    %663 = vector.extract_strided_slice %491 {offsets = [8, 0], sizes = [8, 128], strides = [1, 1]} : vector<64x128xf32> to vector<8x128xf32>
    %cst_145 = arith.constant dense<0.000000e+00> : vector<8x128xf32>
    %664 = tpu.matmul %662, %492, %cst_145 {dimension_numbers = #tpu.dot_dimension_numbers<[1], [0], [0], [1], [0, 0, 1, 1], [], []>} : vector<8x32xf32>, vector<32x128xf32>, vector<8x128xf32> -> vector<8x128xf32>
    %665 = arith.addf %663, %664 : vector<8x128xf32>
    %666 = vector.extract_strided_slice %665 {offsets = [0, 0], sizes = [8, 32], strides = [1, 1]} : vector<8x128xf32> to vector<8x32xf32>
    %667 = arith.negf %666 : vector<8x32xf32>
    %668 = math.exp %667 : vector<8x32xf32>
    %cst_146 = arith.constant 1.000000e+00 : f32
    %669 = vector.broadcast %cst_146 : f32 to vector<8x32xf32>
    %670 = arith.addf %669, %668 : vector<8x32xf32>
    %671 = arith.divf %669, %670 : vector<8x32xf32>
    %672 = vector.extract_strided_slice %665 {offsets = [0, 32], sizes = [8, 32], strides = [1, 1]} : vector<8x128xf32> to vector<8x32xf32>
    %673 = arith.negf %672 : vector<8x32xf32>
    %674 = math.exp %673 : vector<8x32xf32>
    %cst_147 = arith.constant 1.000000e+00 : f32
    %675 = vector.broadcast %cst_147 : f32 to vector<8x32xf32>
    %676 = arith.addf %675, %674 : vector<8x32xf32>
    %677 = arith.divf %675, %676 : vector<8x32xf32>
    %678 = vector.extract_strided_slice %665 {offsets = [0, 64], sizes = [8, 32], strides = [1, 1]} : vector<8x128xf32> to vector<8x32xf32>
    %679 = math.tanh %678 : vector<8x32xf32>
    %680 = vector.extract_strided_slice %665 {offsets = [0, 96], sizes = [8, 32], strides = [1, 1]} : vector<8x128xf32> to vector<8x32xf32>
    %681 = arith.negf %680 : vector<8x32xf32>
    %682 = math.exp %681 : vector<8x32xf32>
    %cst_148 = arith.constant 1.000000e+00 : f32
    %683 = vector.broadcast %cst_148 : f32 to vector<8x32xf32>
    %684 = arith.addf %683, %682 : vector<8x32xf32>
    %685 = arith.divf %683, %684 : vector<8x32xf32>
    %686 = arith.mulf %677, %660 : vector<8x32xf32>
    %687 = arith.mulf %671, %679 : vector<8x32xf32>
    %688 = arith.addf %686, %687 : vector<8x32xf32>
    %689 = math.tanh %688 : vector<8x32xf32>
    %690 = arith.mulf %685, %689 : vector<8x32xf32>
    %691 = vector.extract_strided_slice %491 {offsets = [0, 0], sizes = [8, 128], strides = [1, 1]} : vector<64x128xf32> to vector<8x128xf32>
    %cst_149 = arith.constant dense<0.000000e+00> : vector<8x128xf32>
    %692 = tpu.matmul %690, %492, %cst_149 {dimension_numbers = #tpu.dot_dimension_numbers<[1], [0], [0], [1], [0, 0, 1, 1], [], []>} : vector<8x32xf32>, vector<32x128xf32>, vector<8x128xf32> -> vector<8x128xf32>
    %693 = arith.addf %691, %692 : vector<8x128xf32>
    %694 = vector.extract_strided_slice %693 {offsets = [0, 0], sizes = [8, 32], strides = [1, 1]} : vector<8x128xf32> to vector<8x32xf32>
    %695 = arith.negf %694 : vector<8x32xf32>
    %696 = math.exp %695 : vector<8x32xf32>
    %cst_150 = arith.constant 1.000000e+00 : f32
    %697 = vector.broadcast %cst_150 : f32 to vector<8x32xf32>
    %698 = arith.addf %697, %696 : vector<8x32xf32>
    %699 = arith.divf %697, %698 : vector<8x32xf32>
    %700 = vector.extract_strided_slice %693 {offsets = [0, 32], sizes = [8, 32], strides = [1, 1]} : vector<8x128xf32> to vector<8x32xf32>
    %701 = arith.negf %700 : vector<8x32xf32>
    %702 = math.exp %701 : vector<8x32xf32>
    %cst_151 = arith.constant 1.000000e+00 : f32
    %703 = vector.broadcast %cst_151 : f32 to vector<8x32xf32>
    %704 = arith.addf %703, %702 : vector<8x32xf32>
    %705 = arith.divf %703, %704 : vector<8x32xf32>
    %706 = vector.extract_strided_slice %693 {offsets = [0, 64], sizes = [8, 32], strides = [1, 1]} : vector<8x128xf32> to vector<8x32xf32>
    %707 = math.tanh %706 : vector<8x32xf32>
    %708 = vector.extract_strided_slice %693 {offsets = [0, 96], sizes = [8, 32], strides = [1, 1]} : vector<8x128xf32> to vector<8x32xf32>
    %709 = arith.negf %708 : vector<8x32xf32>
    %710 = math.exp %709 : vector<8x32xf32>
    %cst_152 = arith.constant 1.000000e+00 : f32
    %711 = vector.broadcast %cst_152 : f32 to vector<8x32xf32>
    %712 = arith.addf %711, %710 : vector<8x32xf32>
    %713 = arith.divf %711, %712 : vector<8x32xf32>
    %714 = arith.mulf %705, %688 : vector<8x32xf32>
    %715 = arith.mulf %699, %707 : vector<8x32xf32>
    %716 = arith.addf %714, %715 : vector<8x32xf32>
    %717 = math.tanh %716 : vector<8x32xf32>
    %718 = arith.mulf %713, %717 : vector<8x32xf32>
    %c0_153 = arith.constant 0 : index
    %c0_154 = arith.constant 0 : index
    %719 = vector.load %arg13[%c0_153, %c0_154] : memref<1x32xf32, #tpu.memory_space<vmem>>, vector<1x32xf32>
    %720 = vector.broadcast %719 : vector<1x32xf32> to vector<8x32xf32>
    %721 = arith.mulf %718, %720 : vector<8x32xf32>
    %cst_155 = arith.constant dense<0.000000e+00> : vector<8xf32>
    %722 = vector.multi_reduction <add>, %721, %cst_155 [1] : vector<8x32xf32> to vector<8xf32>
    %723 = vector.shape_cast %722 : vector<8xf32> to vector<8x1xf32>
    %c0_156 = arith.constant 0 : index
    %c0_157 = arith.constant 0 : index
    %724 = vector.load %arg14[%c0_156, %c0_157] : memref<1x1xf32, #tpu.memory_space<vmem>>, vector<1x1xf32>
    %725 = vector.broadcast %724 : vector<1x1xf32> to vector<8x1xf32>
    %726 = arith.addf %723, %725 : vector<8x1xf32>
    %c0_158 = arith.constant 0 : index
    %c0_159 = arith.constant 0 : index
    %727 = vector.load %arg15[%c0_158, %c0_159] : memref<8x1xf32, #tpu.memory_space<vmem>>, vector<8x1xf32>
    tpu.vector_store %arg15[%c0_158, %c0_159], %726 {strides = array<i32>} : memref<8x1xf32, #tpu.memory_space<vmem>>, vector<8x1xf32>,
    return
  }
}

</mosaic_0001>

<bundles_post_ra>
// kernel: model_lstm_forward.1
= control target key start
LH: loop header
LB: loop body
LE: loop exit
PB: predicated region body
PF: predicated region fallthrough
CT: control target
= control target key end

     0   :  { %s2956_s0 = inlined_call_operand.vmem [shape: f32[64,16], index: 0, kind: input, shape index: {}]   ;;  %s2957_s1 = inlined_call_operand.vmem [shape: f32[16,128], index: 1, kind: input, shape index: {}]   ;;  %s2958_s2 = inlined_call_operand.vmem [shape: f32[32,128], index: 2, kind: input, shape index: {}]   ;;  %s2959_s3 = inlined_call_operand.vmem [shape: f32[1,128], index: 3, kind: input, shape index: {}]   ;;  %s2960_s4 = inlined_call_operand.hbm [shape: f32[16,128], index: 4, kind: input, shape index: {}]   ;;  %s2961_s5 = inlined_call_operand.hbm [shape: f32[32,128], index: 5, kind: input, shape index: {}]   ;;  %s2962_s6 = inlined_call_operand.vmem [shape: f32[1,128], index: 6, kind: input, shape index: {}]   ;;  %s2963_s7 = inlined_call_operand.vmem [shape: f32[64,128], index: 7, kind: input, shape index: {}]   ;;  %s2964_s8 = inlined_call_operand.hbm [shape: f32[32,128], index: 8, kind: input, shape index: {}]   ;;  %s2965_s9 = inlined_call_operand.vmem [shape: f32[1,128], index: 9, kind: input, shape index: {}]   ;;  %s2966_s10 = inlined_call_operand.hbm [shape: f32[64,128], index: 10, kind: input, shape index: {}]   ;;  %s2967_s11 = inlined_call_operand.hbm [shape: f32[32,128], index: 11, kind: input, shape index: {}]   ;;  %s2968_s12 = inlined_call_operand.vmem [shape: f32[1,128], index: 12, kind: input, shape index: {}]   ;;  %s2969_s13 = inlined_call_operand.vmem [shape: f32[1,32], index: 13, kind: input, shape index: {}]   ;;  %s2970_s14 = inlined_call_operand.<no memory space> [shape: f32[1,1], index: 14, kind: input, shape index: {}]   ;;  %s2971_s15 = inlined_call_operand.vmem [shape: f32[8,1], index: 15, kind: output, shape index: {}]  }
   0x1   :  { %v20_v0 = vstv %s2970_s14 }
   0x2   :  { %21 = vst [vmem:[#allocation4] sm:$0x1] %v20_v0 }
   0x3   :  { %22 = vsyncpa [#allocation6], 0 }
   0x4   :  { %23 = vsyncpa [#allocation8], 0 }
   0x5   :  { %24 = vsyncpa [#allocation11], 0  ;;  %s50_s20 = sshll.u32 %s2961_s5, 4  ;;  %s2418_s21 = smov [#allocation7]   ;;  %s51_s20 = int_to_ptr.hbm [resolvable:$true] %s50_s20 }
   0x6   :  { %s52_s22 = sshll.u32 %s2418_s21, 4  ;;  %s82_s25 = sshll.u32 %s2966_s10, 4  ;;  %s53_s22 = int_to_ptr.vmem [resolvable:$true] %s52_s22  ;;  %s83_s25 = int_to_ptr.hbm [resolvable:$true] %s82_s25 }
   0x7   :  { %s2419_s26 = smov 128   ;;  %s2420_s27 = smov 8  }
   0x8   :  { %58 = dma.hbm_to_vmem [thread:$0]  %s51_s20, 512, %s53_s22, [#allocation8], %s2419_s26, %s2419_s26, %s2420_s27  }
   0x9   :  { %s2421_s14 = smov [#allocation10]   ;;  %s37_s30 = sshll.u32 %s2960_s4, 4  ;;  %s38_s30 = int_to_ptr.hbm [resolvable:$true] %s37_s30 }
   0xa   :  { %s84_s28 = sshll.u32 %s2421_s14, 4  ;;  %s67_s17 = sshll.u32 %s2964_s8, 4  ;;  %s85_s28 = int_to_ptr.vmem [resolvable:$true] %s84_s28  ;;  %s68_s17 = int_to_ptr.hbm [resolvable:$true] %s67_s17 }
   0xb   :  { %90 = dma.hbm_to_vmem [thread:$0]  %s83_s25, 1024, %s85_s28, [#allocation11], %s2419_s26, %s2419_s26, %s2420_s27  }
   0xc   :  { %s2422_s9 = smov [#allocation5]   ;;  %s2423_s10 = smov [#allocation9]  }
   0xd   :  { %s39_s18 = sshll.u32 %s2422_s9, 4  ;;  %s69_s19 = sshll.u32 %s2423_s10, 4  ;;  %s40_s18 = int_to_ptr.vmem [resolvable:$true] %s39_s18  ;;  %s70_s19 = int_to_ptr.vmem [resolvable:$true] %s69_s19 }
   0xe   :  { %45 = dma.hbm_to_vmem [thread:$0]  %s38_s30, 256, %s40_s18, [#allocation6], %s2419_s26, %s2419_s26, %s2420_s27  }
   0xf   :  { %s95_s22 = sshll.u32 %s2967_s11, 4  ;;  %s2424_s4 = smov [#allocation12]   ;;  %s96_s22 = int_to_ptr.hbm [resolvable:$true] %s95_s22 }
  0x10   :  { %75 = dma.hbm_to_vmem [thread:$0]  %s68_s17, 512, %s70_s19, [#allocation8], %s2419_s26, %s2419_s26, %s2420_s27  }
  0x11   :  { %s97_s23 = sshll.u32 %s2424_s4, 4  ;;  %s98_s23 = int_to_ptr.vmem [resolvable:$true] %s97_s23 }
  0x12   :  { %103 = dma.hbm_to_vmem [thread:$0]  %s96_s22, 512, %s98_s23, [#allocation11], %s2419_s26, %s2419_s26, %s2420_s27  }
  0x13   :  { %2412 = dma.done.wait [#allocation6], 256  }
  0x14   :  { %2413 = vsyncadd [#allocation6], 4294967040 }
  0x15   :  { %2414 = dma.done.wait [#allocation8], 1024  }
  0x16   :  { %2415 = vsyncadd [#allocation8], 4294966272 }
  0x17   :  { %2416 = dma.done.wait [#allocation11], 1536  }
  0x18   :  { %2417 = vsyncadd [#allocation11], 4294965760  ;;  %v139_v1 = vld [vmem:[#allocation5 + $0x8] sm:$0xff]  ;;  %v138_v2 = vld [vmem:[#allocation5] sm:$0xff]  ;;  %vm144_vm0 = vcmask 130048   ;;  %v2425_v12 = vmov 0.0  }
  0x19   :  { %2079 = vmatpush.msra.mxu2 %v139_v1  ;;  %v136_v3 = vld [vmem:[%s2956_s0 + $0x30] sm:$0xff]  ;;  %183 = vmatpush.msra.mxu0 %v139_v1  ;;  %v2533_v4 = vld [vmem:[%s2958_s2 + $0x18] sm:$0xff]  ;;  %v211_v5 = vld [vmem:[%s2957_s1 + $0x8] sm:$0xff]  ;;  %s2426_s20 = smov 64   ;;  %s2427_s21 = smov 32   ;;  %vm261_vm5 = vcmask 261120  }
  0x1a   :  { %230 = vmatpush.msra.mxu1 %v211_v5  ;;  %v210_v6 = vld [vmem:[%s2957_s1] sm:$0xff]  ;;  %v2548_v8 = vld [vmem:[%s2958_s2 + $0x10] sm:$0xff]  ;;  %2081 = vmatpush.msra.mxu3 %v211_v5  ;;  %v2554_v9 = vld [vmem:[%s2958_s2 + $0x8] sm:$0xff]  ;;  %s2428_s5 = smov 96  }
  0x1b   :  { %2080 = vmatpush.msra.mxu2 %v138_v2  ;;  %v130_v7 = vld [vmem:[%s2956_s0] sm:$0xff]  ;;  %184 = vmatpush.msra.mxu0 %v138_v2  ;;  %v137_v11 = vld [vmem:[%s2956_s0 + $0x38] sm:$0xff]  ;;  %v131_v40 = vld [vmem:[%s2956_s0 + $0x8] sm:$0xff] }
  0x1c   :  { %2008 = vmatmul.msk.f32.vlgmr.msra.gmra.mxu2 %vm144_vm0, %v136_v3  ;;  %231 = vmatpush.msra.mxu1 %v210_v6  ;;  %v2562_v10 = vld [vmem:[%s2958_s2] sm:$0xff]  ;;  %v132_v41 = vld [vmem:[%s2956_s0 + $0x10] sm:$0xff]  ;;  %v133_v42 = vld [vmem:[%s2956_s0 + $0x18] sm:$0xff] }
  0x1d   :  { %277 = vmatpush.msrb.mxu2 %v2533_v4  ;;  %2010 = vmatmul.msk.f32.vlgmr.msra.gmra.mxu1 %vm144_vm0, %v130_v7  ;;  %v2596_v15 = vld [vmem:[%s2959_s3] ss:$0 sm:$0xff]  ;;  %v135_v46 = vld [vmem:[%s2956_s0 + $0x28] sm:$0xff]  ;;  %v1321_v50 = vld [vmem:[#allocation10] sm:$0xff] }
  0x1e   :  { %2082 = vmatpush.msra.mxu3 %v210_v6  ;;  %2002 = vmatmul.msk.f32.vlgmr.msra.gmra.mxu0 %vm144_vm0, %v130_v7  ;;  %v134_v43 = vld [vmem:[%s2956_s0 + $0x20] sm:$0xff]  ;;  %v1324_v47 = vld [vmem:[#allocation10 + $0x18] sm:$0xff] }
  0x1f   :  { %278 = vmatpush.msrb.mxu2 %v2548_v8  ;;  %2016 = vmatmul.msk.f32.vlgmr.msra.gmra.mxu3 %vm144_vm0, %v136_v3  ;;  %v1323_v48 = vld [vmem:[#allocation10 + $0x10] sm:$0xff]  ;;  %v1322_v49 = vld [vmem:[#allocation10 + $0x8] sm:$0xff] }
  0x20   :  { %342 = vmatpush.msrb.mxu3 %v2533_v4  ;;  %1430 = vmatpush.msrb.mxu1 %v1324_v47 }
  0x21   :  { %279 = vmatpush.msrb.mxu2 %v2554_v9 }
  0x22   :  { %343 = vmatpush.msrb.mxu3 %v2548_v8  ;;  %1431 = vmatpush.msrb.mxu1 %v1323_v48 }
  0x23   :  { %280 = vmatpush.msrb.mxu2 %v2562_v10 }
  0x24   :  { %2009 = vmatmul.msk.f32.gmra.mxu2 %vm144_vm0, %v137_v11  ;;  %344 = vmatpush.msrb.mxu3 %v2554_v9 }
  0x25   :  { %407 = vmatpush.msra.mxu2 %v2533_v4  ;;  %2011 = vmatmul.msk.f32.gmra.mxu1 %vm144_vm0, %v131_v40 }
  0x26   :  { %345 = vmatpush.msrb.mxu3 %v2562_v10  ;;  %2003 = vmatmul.msk.f32.gmra.mxu0 %vm144_vm0, %v131_v40 }
  0x27   :  { %2017 = vmatmul.msk.f32.gmra.mxu3 %vm144_vm0, %v137_v11  ;;  %408 = vmatpush.msra.mxu2 %v2548_v8 }
  0x28   :  { %472 = vmatpush.msra.mxu3 %v2533_v4  ;;  %1432 = vmatpush.msrb.mxu1 %v1322_v49 }
  0x29   :  { %409 = vmatpush.msra.mxu2 %v2554_v9 }
  0x2a   :  { %473 = vmatpush.msra.mxu3 %v2548_v8  ;;  %1433 = vmatpush.msrb.mxu1 %v1321_v50 }
  0x2b   :  { %410 = vmatpush.msra.mxu2 %v2562_v10 }
  0x2c   :  { %281 = vmatmul.f32.vlgmr.msrb.gmra.mxu2 %v2425_v12  ;;  %474 = vmatpush.msra.mxu3 %v2554_v9 }
  0x2d   :  { %537 = vmatpush.msrb.mxu2 %v2533_v4  ;;  %2012 = vmatmul.msk.f32.gmra.mxu1 %vm144_vm0, %v132_v41 }
  0x2e   :  { %475 = vmatpush.msra.mxu3 %v2562_v10  ;;  %2004 = vmatmul.msk.f32.gmra.mxu0 %vm144_vm0, %v132_v41 }
  0x2f   :  { %538 = vmatpush.msrb.mxu2 %v2548_v8 }
  0x31   :  { %539 = vmatpush.msrb.mxu2 %v2554_v9 }
  0x33   :  { %540 = vmatpush.msrb.mxu2 %v2562_v10 }
  0x35   :  { %2013 = vmatmul.msk.f32.gmra.mxu1 %vm144_vm0, %v133_v42 }
  0x36   :  { %2005 = vmatmul.msk.f32.gmra.mxu0 %vm144_vm0, %v133_v42 }
  0x3d   :  { %2014 = vmatmul.msk.f32.gmra.mxu1 %vm144_vm0, %v134_v43 }
  0x3e   :  { %2006 = vmatmul.msk.f32.gmra.mxu0 %vm144_vm0, %v134_v43 }
  0x45   :  { %2015 = vmatmul.msk.f32.gmra.mxu1 %vm144_vm0, %v135_v46 }
  0x46   :  { %2007 = vmatmul.msk.f32.gmra.mxu0 %vm144_vm0, %v135_v46 }
  0x9a   :  { %v233_v16 = vpop.f32.mrf.mxu1 }
  0x9b   :  { %v234_v17 = vadd.f32 %v2596_v15, %v233_v16 }
  0x9f   :  { %v2589_v13 = vpop.f32.mrf.mxu2 }
  0xa2   :  { %v2638_v53 = vpop.f32.mrf.mxu3  ;;  %v236_v55 = vpop.f32.mrf.mxu1 }
  0xa3   :  { %v237_v56 = vadd.f32 %v2596_v15, %v236_v55 }
  0xa7   :  { %v2591_v14 = vpop.f32.mrf.mxu2 }
  0xaa   :  { %v2640_v54 = vpop.f32.mrf.mxu3 }
  0xaf   :  { %v282_v18 = vpop.f32.mrf.mxu2 }
  0xb0   :  { %v285_v19 = vadd.f32 %v282_v18, %v234_v17 }
  0xb2   :  { %2099 = vtanh.f32 %v285_v19  ;;  %v2018_v21 = vmul.f32 -1.442695, %v285_v19 }
  0xb4   :  { %2101 = vpow2.f32 %v2018_v21 }
  0xb8   :  { %v2100_v20 = vpop.eup %2099 }
  0xb9   :  { %308 = vrot.lane.b32.xlu0 %v2100_v20, %s2426_s20 }
  0xba   :  { %v2102_v22 = vpop.eup %2101 }
  0xbb   :  { %v289_v23 = vadd.f32 1.0, %v2102_v22 }
  0xbd   :  { %2103 = vrcp.f32 %v289_v23  ;;  %v301_v29 = vand.u32 2147483648, %v289_v23  ;;  %vm295_vm2 = vweird.f32 %v289_v23  ;;  %v299_v30 = vand.u32 2147483647, %v289_v23 }
  0xbf   :  { %v302_v32 = vor.u32 1.1754944e-38, %v301_v29  ;;  %vm300_vm4 = vcmp.eq.f32.partialorder %v299_v30, 8.507059e+37 }
  0xc3   :  { %v2104_v24 = vpop.eup %2103 }
  0xc4   :  { %v291_v25 = vmul.f32 %v2104_v24, %v289_v23  ;;  %vm296_vm1 = vweird.f32 %v2104_v24 }
  0xc5   :  { %vm297_vm3 = vmor %vm295_vm2, %vm296_vm1 }
  0xc6   :  { %v292_v26 = vsub.f32 1.0, %v291_v25 }
  0xc8   :  { %v293_v27 = vmul.f32 %v2104_v24, %v292_v26 }
  0xca   :  { %v294_v28 = vadd.f32 %v2104_v24, %v293_v27  ;;  %v239_v27 = vpop.f32.mrf.mxu1 }
  0xcc   :  { %v298_v31 = vsel %vm297_vm3, %v2104_v24, %v294_v28  ;;  %v240_v28 = vadd.f32 %v2596_v15, %v239_v27 }
  0xcd   :  { %v303_v34 = vsel %vm300_vm4, %v302_v32, %v298_v31 }
  0xce   :  { %v306_v36 = vmul.f32 0.0, %v303_v34 }
 0x12b   :  { %v309_v33 = vpop.permute.xlu0 %308 }
 0x12c   :  { %v311_v35 = vmul.f32 %v309_v33, %v303_v34 }
 0x12e   :  { %313 = vrot.lane.b32.xlu0 %v311_v35, %s2427_s21 }
 0x1a0   :  { %v314_v37 = vpop.permute.xlu0 %313 }
 0x1a1   :  { %v2601_v38 = vadd.f32 %v314_v37, %v306_v36 }
 0x1a3   :  { %2105 = vtanh.f32 %v2601_v38 }
 0x1a9   :  { %v2106_v39 = vpop.eup %2105 }
 0x1aa   :  { %319 = vrot.lane.b32.xlu1 %v2106_v39, %s2426_s20 }
 0x21c   :  { %v320_v44 = vpop.permute.xlu1 %319 }
 0x21d   :  { %v322_v45 = vmul.f32 %v320_v44, %v303_v34 }
 0x21f   :  { %324 = vrot.lane.b32.xlu1 %v322_v45, %s2427_s21 }
 0x291   :  { %v325_v51 = vpop.permute.xlu1 %324 }
 0x292   :  { %327 = vst.msk [vmem:[#allocation2] sm:$0xff] %vm261_vm5, %v325_v51  ;;  %2019 = vmatmul.msk.f32.vlgmr.msrb.gmra.mxu3 %vm261_vm5, %v325_v51 }
 0x293   :  { %602 = vmatpush.msrb.mxu3 %v2533_v4 }
 0x295   :  { %603 = vmatpush.msrb.mxu3 %v2548_v8 }
 0x297   :  { %604 = vmatpush.msrb.mxu3 %v2554_v9 }
 0x299   :  { %v1305_v52 = vld [vmem:[#allocation2] sm:$0xff]  ;;  %605 = vmatpush.msrb.mxu3 %v2562_v10 }
 0x29a   :  { %2056 = vmatmul.msk.f32.vlgmr.msrb.gmra.mxu1 %vm261_vm5, %v1305_v52 }
 0x315   :  { %v347_v57 = vpop.f32.mrf.mxu3 }
 0x316   :  { %v350_v58 = vadd.f32 %v347_v57, %v237_v56  ;;  %v242_v57 = vpop.f32.mrf.mxu1 }
 0x318   :  { %2107 = vtanh.f32 %v350_v58  ;;  %v2020_v60 = vmul.f32 -1.442695, %v350_v58  ;;  %v243_v58 = vadd.f32 %v2596_v15, %v242_v57 }
 0x31a   :  { %2109 = vpow2.f32 %v2020_v60 }
 0x31e   :  { %v2108_v59 = vpop.eup %2107 }
 0x31f   :  { %373 = vrot.lane.b32.xlu2 %v2108_v59, %s2426_s20 }
 0x320   :  { %v2110_v61 = vpop.eup %2109 }
 0x321   :  { %v354_v62 = vadd.f32 1.0, %v2110_v61 }
 0x323   :  { %2111 = vrcp.f32 %v354_v62  ;;  %v366_v5 = vand.u32 2147483648, %v354_v62  ;;  %vm360_vm7 = vweird.f32 %v354_v62  ;;  %v364_v6 = vand.u32 2147483647, %v354_v62 }
 0x325   :  { %v367_v11 = vor.u32 1.1754944e-38, %v366_v5  ;;  %vm365_vm9 = vcmp.eq.f32.partialorder %v364_v6, 8.507059e+37 }
 0x329   :  { %v2112_v63 = vpop.eup %2111 }
 0x32a   :  { %v356_v0 = vmul.f32 %v2112_v63, %v354_v62  ;;  %vm361_vm6 = vweird.f32 %v2112_v63 }
 0x32b   :  { %vm362_vm8 = vmor %vm360_vm7, %vm361_vm6 }
 0x32c   :  { %v357_v1 = vsub.f32 1.0, %v356_v0 }
 0x32e   :  { %v358_v2 = vmul.f32 %v2112_v63, %v357_v1 }
 0x330   :  { %v359_v3 = vadd.f32 %v2112_v63, %v358_v2 }
 0x332   :  { %v363_v7 = vsel %vm362_vm8, %v2112_v63, %v359_v3 }
 0x333   :  { %v368_v17 = vsel %vm365_vm9, %v367_v11, %v363_v7 }
 0x334   :  { %v371_v19 = vmul.f32 %v368_v17, %v2601_v38 }
 0x379   :  { %v374_v16 = vpop.permute.xlu2 %373 }
 0x37a   :  { %v376_v18 = vmul.f32 %v374_v16, %v368_v17 }
 0x37c   :  { %378 = vrot.lane.b32.xlu2 %v376_v18, %s2427_s21 }
 0x3d6   :  { %v379_v20 = vpop.permute.xlu2 %378 }
 0x3d7   :  { %v381_v21 = vadd.f32 %v379_v20, %v371_v19 }
 0x3d9   :  { %2113 = vtanh.f32 %v381_v21 }
 0x3df   :  { %v2114_v22 = vpop.eup %2113 }
 0x3e0   :  { %384 = vrot.lane.b32.xlu0 %v2114_v22, %s2426_s20 }
 0x452   :  { %v385_v23 = vpop.permute.xlu0 %384 }
 0x453   :  { %v387_v24 = vmul.f32 %v385_v23, %v368_v17 }
 0x455   :  { %389 = vrot.lane.b32.xlu1 %v387_v24, %s2427_s21 }
 0x4c7   :  { %v390_v25 = vpop.permute.xlu1 %389 }
 0x4c8   :  { %392 = vst.msk [vmem:[#allocation2 + $0x8] sm:$0xff] %vm261_vm5, %v390_v25  ;;  %2021 = vmatmul.msk.f32.vlgmr.msra.gmra.mxu2 %vm261_vm5, %v390_v25  ;;  %v245_v25 = vpop.f32.mrf.mxu1 }
 0x4c9   :  { %667 = vmatpush.msra.mxu2 %v2533_v4 }
 0x4cb   :  { %668 = vmatpush.msra.mxu2 %v2548_v8 }
 0x4cd   :  { %669 = vmatpush.msra.mxu2 %v2554_v9 }
 0x4cf   :  { %v1306_v26 = vld [vmem:[#allocation2 + $0x8] sm:$0xff]  ;;  %670 = vmatpush.msra.mxu2 %v2562_v10 }
 0x4d0   :  { %2057 = vmatmul.msk.f32.gmra.mxu1 %vm261_vm5, %v1306_v26  ;;  %v246_v26 = vadd.f32 %v2596_v15, %v245_v25 }
 0x54b   :  { %v412_v29 = vpop.f32.mrf.mxu2 }
 0x54c   :  { %v415_v30 = vadd.f32 %v412_v29, %v240_v28 }
 0x54e   :  { %2115 = vtanh.f32 %v415_v30  ;;  %v2022_v32 = vmul.f32 -1.442695, %v415_v30 }
 0x550   :  { %2117 = vpow2.f32 %v2022_v32 }
 0x554   :  { %v2116_v31 = vpop.eup %2115 }
 0x555   :  { %438 = vrot.lane.b32.xlu2 %v2116_v31, %s2426_s20 }
 0x556   :  { %v2118_v33 = vpop.eup %2117 }
 0x557   :  { %v419_v34 = vadd.f32 1.0, %v2118_v33 }
 0x559   :  { %2119 = vrcp.f32 %v419_v34  ;;  %v431_v40 = vand.u32 2147483648, %v419_v34  ;;  %vm425_vm11 = vweird.f32 %v419_v34  ;;  %v429_v41 = vand.u32 2147483647, %v419_v34 }
 0x55b   :  { %v432_v43 = vor.u32 1.1754944e-38, %v431_v40  ;;  %vm430_vm13 = vcmp.eq.f32.partialorder %v429_v41, 8.507059e+37 }
 0x55f   :  { %v2120_v35 = vpop.eup %2119 }
 0x560   :  { %v421_v36 = vmul.f32 %v2120_v35, %v419_v34  ;;  %vm426_vm10 = vweird.f32 %v2120_v35 }
 0x561   :  { %vm427_vm12 = vmor %vm425_vm11, %vm426_vm10 }
 0x562   :  { %v422_v37 = vsub.f32 1.0, %v421_v36 }
 0x564   :  { %v423_v38 = vmul.f32 %v2120_v35, %v422_v37 }
 0x566   :  { %v424_v39 = vadd.f32 %v2120_v35, %v423_v38 }
 0x568   :  { %v428_v42 = vsel %vm427_vm12, %v2120_v35, %v424_v39 }
 0x569   :  { %v433_v45 = vsel %vm430_vm13, %v432_v43, %v428_v42 }
 0x56a   :  { %v436_v47 = vmul.f32 %v433_v45, %v381_v21 }
 0x5af   :  { %v439_v44 = vpop.permute.xlu2 %438 }
 0x5b0   :  { %v441_v46 = vmul.f32 %v439_v44, %v433_v45 }
 0x5b2   :  { %443 = vrot.lane.b32.xlu0 %v441_v46, %s2427_s21 }
 0x624   :  { %v444_v48 = vpop.permute.xlu0 %443 }
 0x625   :  { %v446_v49 = vadd.f32 %v444_v48, %v436_v47 }
 0x627   :  { %2121 = vtanh.f32 %v446_v49 }
 0x62d   :  { %v2122_v50 = vpop.eup %2121 }
 0x62e   :  { %449 = vrot.lane.b32.xlu1 %v2122_v50, %s2426_s20 }
 0x6a0   :  { %v450_v51 = vpop.permute.xlu1 %449 }
 0x6a1   :  { %v452_v52 = vmul.f32 %v450_v51, %v433_v45 }
 0x6a3   :  { %454 = vrot.lane.b32.xlu2 %v452_v52, %s2427_s21 }
 0x6fd   :  { %v455_v55 = vpop.permute.xlu2 %454 }
 0x6fe   :  { %457 = vst.msk [vmem:[#allocation2 + $0x10] sm:$0xff] %vm261_vm5, %v455_v55  ;;  %2023 = vmatmul.msk.f32.vlgmr.msra.gmra.mxu3 %vm261_vm5, %v455_v55  ;;  %v248_v55 = vpop.f32.mrf.mxu1 }
 0x6ff   :  { %732 = vmatpush.msra.mxu3 %v2533_v4 }
 0x701   :  { %733 = vmatpush.msra.mxu3 %v2548_v8 }
 0x703   :  { %734 = vmatpush.msra.mxu3 %v2554_v9 }
 0x705   :  { %v1307_v56 = vld [vmem:[#allocation2 + $0x10] sm:$0xff]  ;;  %735 = vmatpush.msra.mxu3 %v2562_v10 }
 0x706   :  { %2058 = vmatmul.msk.f32.gmra.mxu1 %vm261_vm5, %v1307_v56  ;;  %v249_v56 = vadd.f32 %v2596_v15, %v248_v55 }
 0x781   :  { %v477_v59 = vpop.f32.mrf.mxu3 }
 0x782   :  { %v480_v60 = vadd.f32 %v477_v59, %v243_v58 }
 0x784   :  { %2123 = vtanh.f32 %v480_v60  ;;  %v2024_v62 = vmul.f32 -1.442695, %v480_v60 }
 0x786   :  { %2125 = vpow2.f32 %v2024_v62 }
 0x78a   :  { %v2124_v61 = vpop.eup %2123 }
 0x78b   :  { %503 = vrot.lane.b32.xlu0 %v2124_v61, %s2426_s20 }
 0x78c   :  { %v2126_v4 = vpop.eup %2125 }
 0x78d   :  { %v484_v8 = vadd.f32 1.0, %v2126_v4 }
 0x78f   :  { %2127 = vrcp.f32 %v484_v8  ;;  %v496_v2 = vand.u32 2147483648, %v484_v8  ;;  %vm490_vm15 = vweird.f32 %v484_v8  ;;  %v494_v3 = vand.u32 2147483647, %v484_v8 }
 0x791   :  { %v497_v6 = vor.u32 1.1754944e-38, %v496_v2  ;;  %vm495_vm1 = vcmp.eq.f32.partialorder %v494_v3, 8.507059e+37 }
 0x795   :  { %v2128_v9 = vpop.eup %2127 }
 0x796   :  { %v486_v63 = vmul.f32 %v2128_v9, %v484_v8  ;;  %vm491_vm14 = vweird.f32 %v2128_v9 }
 0x797   :  { %vm492_vm0 = vmor %vm490_vm15, %vm491_vm14 }
 0x798   :  { %v487_v0 = vsub.f32 1.0, %v486_v63 }
 0x79a   :  { %v488_v10 = vmul.f32 %v2128_v9, %v487_v0 }
 0x79c   :  { %v489_v1 = vadd.f32 %v2128_v9, %v488_v10 }
 0x79e   :  { %v493_v5 = vsel %vm492_vm0, %v2128_v9, %v489_v1 }
 0x79f   :  { %v498_v11 = vsel %vm495_vm1, %v497_v6, %v493_v5 }
 0x7a0   :  { %v501_v17 = vmul.f32 %v498_v11, %v446_v49 }
 0x7fd   :  { %v504_v7 = vpop.permute.xlu0 %503 }
 0x7fe   :  { %v506_v16 = vmul.f32 %v504_v7, %v498_v11 }
 0x800   :  { %508 = vrot.lane.b32.xlu1 %v506_v16, %s2427_s21 }
 0x872   :  { %v509_v18 = vpop.permute.xlu1 %508 }
 0x873   :  { %v511_v19 = vadd.f32 %v509_v18, %v501_v17 }
 0x875   :  { %2129 = vtanh.f32 %v511_v19 }
 0x87b   :  { %v2130_v20 = vpop.eup %2129 }
 0x87c   :  { %514 = vrot.lane.b32.xlu2 %v2130_v20, %s2426_s20 }
 0x8d6   :  { %v515_v21 = vpop.permute.xlu2 %514 }
 0x8d7   :  { %v517_v22 = vmul.f32 %v515_v21, %v498_v11  ;;  %v2691_v21 = vld [vmem:[#allocation7 + $0x18] sm:$0xff] }
 0x8d9   :  { %519 = vrot.lane.b32.xlu0 %v517_v22, %s2427_s21  ;;  %v2693_v22 = vld [vmem:[#allocation7 + $0x10] sm:$0xff] }
 0x94b   :  { %v520_v23 = vpop.permute.xlu0 %519 }
 0x94c   :  { %522 = vst.msk [vmem:[#allocation2 + $0x18] sm:$0xff] %vm261_vm5, %v520_v23  ;;  %2025 = vmatmul.msk.f32.vlgmr.msrb.gmra.mxu2 %vm261_vm5, %v520_v23  ;;  %v2697_v23 = vld [vmem:[#allocation7 + $0x8] sm:$0xff] }
 0x94d   :  { %799 = vmatpush.msrb.mxu2 %v2691_v21 }
 0x94f   :  { %800 = vmatpush.msrb.mxu2 %v2693_v22 }
 0x951   :  { %801 = vmatpush.msrb.mxu2 %v2697_v23 }
 0x953   :  { %v1308_v24 = vld [vmem:[#allocation2 + $0x18] sm:$0xff] }
 0x954   :  { %2059 = vmatmul.msk.f32.gmra.mxu1 %vm261_vm5, %v1308_v24  ;;  %v2701_v24 = vld [vmem:[#allocation7] sm:$0xff] }
 0x955   :  { %802 = vmatpush.msrb.mxu2 %v2701_v24 }
 0x9cf   :  { %v542_v27 = vpop.f32.mrf.mxu2 }
 0x9d0   :  { %v545_v28 = vadd.f32 %v542_v27, %v246_v26  ;;  %v252_v27 = vadd.f32 %v2596_v15, %v2638_v53 }
 0x9d2   :  { %2131 = vtanh.f32 %v545_v28  ;;  %v2026_v30 = vmul.f32 -1.442695, %v545_v28 }
 0x9d4   :  { %2133 = vpow2.f32 %v2026_v30  ;;  %v2724_v30 = vld [vmem:[%s2962_s6] ss:$0 sm:$0xff] }
 0x9d8   :  { %v2132_v29 = vpop.eup %2131 }
 0x9d9   :  { %568 = vrot.lane.b32.xlu1 %v2132_v29, %s2426_s20 }
 0x9da   :  { %v2134_v31 = vpop.eup %2133 }
 0x9db   :  { %v549_v32 = vadd.f32 1.0, %v2134_v31  ;;  %v208_v31 = vadd.f32 %v2724_v30, %v2591_v14 }
 0x9dd   :  { %2135 = vrcp.f32 %v549_v32  ;;  %v561_v38 = vand.u32 2147483648, %v549_v32  ;;  %vm555_vm3 = vweird.f32 %v549_v32  ;;  %v559_v39 = vand.u32 2147483647, %v549_v32 }
 0x9df   :  { %v562_v41 = vor.u32 1.1754944e-38, %v561_v38  ;;  %vm560_vm6 = vcmp.eq.f32.partialorder %v559_v39, 8.507059e+37 }
 0x9e3   :  { %v2136_v33 = vpop.eup %2135 }
 0x9e4   :  { %v551_v34 = vmul.f32 %v2136_v33, %v549_v32  ;;  %vm556_vm2 = vweird.f32 %v2136_v33 }
 0x9e5   :  { %vm557_vm4 = vmor %vm555_vm3, %vm556_vm2 }
 0x9e6   :  { %v552_v35 = vsub.f32 1.0, %v551_v34 }
 0x9e8   :  { %v553_v36 = vmul.f32 %v2136_v33, %v552_v35 }
 0x9ea   :  { %v554_v37 = vadd.f32 %v2136_v33, %v553_v36 }
 0x9ec   :  { %v558_v40 = vsel %vm557_vm4, %v2136_v33, %v554_v37 }
 0x9ed   :  { %v563_v43 = vsel %vm560_vm6, %v562_v41, %v558_v40 }
 0x9ee   :  { %v566_v45 = vmul.f32 %v563_v43, %v511_v19 }
 0xa4b   :  { %v569_v42 = vpop.permute.xlu1 %568 }
 0xa4c   :  { %v571_v44 = vmul.f32 %v569_v42, %v563_v43 }
 0xa4e   :  { %573 = vrot.lane.b32.xlu2 %v571_v44, %s2427_s21 }
 0xaa8   :  { %v574_v46 = vpop.permute.xlu2 %573 }
 0xaa9   :  { %v576_v47 = vadd.f32 %v574_v46, %v566_v45 }
 0xaab   :  { %2137 = vtanh.f32 %v576_v47 }
 0xab1   :  { %v2138_v48 = vpop.eup %2137 }
 0xab2   :  { %579 = vrot.lane.b32.xlu0 %v2138_v48, %s2426_s20 }
 0xb24   :  { %v580_v49 = vpop.permute.xlu0 %579 }
 0xb25   :  { %v582_v50 = vmul.f32 %v580_v49, %v563_v43 }
 0xb27   :  { %584 = vrot.lane.b32.xlu1 %v582_v50, %s2427_s21 }
 0xb99   :  { %v585_v51 = vpop.permute.xlu1 %584 }
 0xb9a   :  { %587 = vst.msk [vmem:[#allocation2 + $0x20] sm:$0xff] %vm261_vm5, %v585_v51  ;;  %2027 = vmatmul.msk.f32.vlgmr.msrb.gmra.mxu3 %vm261_vm5, %v585_v51 }
 0xb9b   :  { %864 = vmatpush.msrb.mxu3 %v2691_v21 }
 0xb9d   :  { %865 = vmatpush.msrb.mxu3 %v2693_v22 }
 0xb9f   :  { %866 = vmatpush.msrb.mxu3 %v2697_v23 }
 0xba1   :  { %v1309_v52 = vld [vmem:[#allocation2 + $0x20] sm:$0xff]  ;;  %867 = vmatpush.msrb.mxu3 %v2701_v24 }
 0xba2   :  { %2060 = vmatmul.msk.f32.gmra.mxu1 %vm261_vm5, %v1309_v52 }
 0xc1d   :  { %v607_v57 = vpop.f32.mrf.mxu3 }
 0xc1e   :  { %v610_v58 = vadd.f32 %v607_v57, %v249_v56 }
 0xc20   :  { %2139 = vtanh.f32 %v610_v58  ;;  %v2028_v60 = vmul.f32 -1.442695, %v610_v58 }
 0xc22   :  { %2141 = vpow2.f32 %v2028_v60 }
 0xc26   :  { %v2140_v59 = vpop.eup %2139 }
 0xc27   :  { %633 = vrot.lane.b32.xlu2 %v2140_v59, %s2426_s20 }
 0xc28   :  { %v2142_v61 = vpop.eup %2141 }
 0xc29   :  { %v614_v62 = vadd.f32 1.0, %v2142_v61 }
 0xc2b   :  { %2143 = vrcp.f32 %v614_v62  ;;  %v626_v10 = vand.u32 2147483648, %v614_v62  ;;  %vm620_vm8 = vweird.f32 %v614_v62  ;;  %v624_v1 = vand.u32 2147483647, %v614_v62 }
 0xc2d   :  { %v627_v3 = vor.u32 1.1754944e-38, %v626_v10  ;;  %vm625_vm10 = vcmp.eq.f32.partialorder %v624_v1, 8.507059e+37 }
 0xc31   :  { %v2144_v4 = vpop.eup %2143 }
 0xc32   :  { %v616_v8 = vmul.f32 %v2144_v4, %v614_v62  ;;  %vm621_vm7 = vweird.f32 %v2144_v4 }
 0xc33   :  { %vm622_vm9 = vmor %vm620_vm8, %vm621_vm7 }
 0xc34   :  { %v617_v9 = vsub.f32 1.0, %v616_v8 }
 0xc36   :  { %v618_v63 = vmul.f32 %v2144_v4, %v617_v9 }
 0xc38   :  { %v619_v0 = vadd.f32 %v2144_v4, %v618_v63 }
 0xc3a   :  { %v623_v2 = vsel %vm622_vm9, %v2144_v4, %v619_v0 }
 0xc3b   :  { %v628_v6 = vsel %vm625_vm10, %v627_v3, %v623_v2 }
 0xc3c   :  { %v631_v11 = vmul.f32 %v628_v6, %v576_v47 }
 0xc81   :  { %v634_v5 = vpop.permute.xlu2 %633 }
 0xc82   :  { %v636_v7 = vmul.f32 %v634_v5, %v628_v6 }
 0xc84   :  { %638 = vrot.lane.b32.xlu0 %v636_v7, %s2427_s21 }
 0xcf6   :  { %v639_v16 = vpop.permute.xlu0 %638 }
 0xcf7   :  { %v2686_v17 = vadd.f32 %v639_v16, %v631_v11 }
 0xcf9   :  { %2145 = vtanh.f32 %v2686_v17 }
 0xcff   :  { %v2146_v18 = vpop.eup %2145 }
 0xd00   :  { %644 = vrot.lane.b32.xlu1 %v2146_v18, %s2426_s20 }
 0xd72   :  { %v645_v19 = vpop.permute.xlu1 %644 }
 0xd73   :  { %v647_v20 = vmul.f32 %v645_v19, %v628_v6 }
 0xd75   :  { %649 = vrot.lane.b32.xlu2 %v647_v20, %s2427_s21 }
 0xdcf   :  { %v650_v25 = vpop.permute.xlu2 %649 }
 0xdd0   :  { %652 = vst.msk [vmem:[#allocation2 + $0x28] sm:$0xff] %vm261_vm5, %v650_v25  ;;  %2029 = vmatmul.msk.f32.vlgmr.msra.gmra.mxu2 %vm261_vm5, %v650_v25  ;;  %v205_v25 = vadd.f32 %v2724_v30, %v2589_v13 }
 0xdd1   :  { %929 = vmatpush.msra.mxu2 %v2691_v21 }
 0xdd3   :  { %930 = vmatpush.msra.mxu2 %v2693_v22 }
 0xdd5   :  { %931 = vmatpush.msra.mxu2 %v2697_v23 }
 0xdd7   :  { %v1310_v26 = vld [vmem:[#allocation2 + $0x28] sm:$0xff]  ;;  %932 = vmatpush.msra.mxu2 %v2701_v24 }
 0xdd8   :  { %803 = vmatmul.f32.vlgmr.msrb.gmra.mxu2 %v2425_v12  ;;  %2061 = vmatmul.msk.f32.gmra.mxu1 %vm261_vm5, %v1310_v26 }
 0xdd9   :  { %1059 = vmatpush.msrb.mxu2 %v2691_v21 }
 0xddb   :  { %1060 = vmatpush.msrb.mxu2 %v2693_v22 }
 0xddd   :  { %1061 = vmatpush.msrb.mxu2 %v2697_v23 }
 0xddf   :  { %1062 = vmatpush.msrb.mxu2 %v2701_v24 }
 0xe53   :  { %v672_v28 = vpop.f32.mrf.mxu2 }
 0xe54   :  { %v675_v29 = vadd.f32 %v672_v28, %v252_v27 }
 0xe56   :  { %2147 = vtanh.f32 %v675_v29  ;;  %v2030_v15 = vmul.f32 -1.442695, %v675_v29 }
 0xe5b   :  { %v804_v32 = vpop.f32.mrf.mxu2 }
 0xe5c   :  { %v2148_v33 = vpop.eup %2147  ;;  %v807_v34 = vadd.f32 %v804_v32, %v208_v31 }
 0xe5d   :  { %698 = vrot.lane.b32.xlu0 %v2148_v33, %s2426_s20 }
 0xe5e   :  { %2149 = vtanh.f32 %v807_v34  ;;  %v2033_v53 = vmul.f32 -1.442695, %v807_v34 }
 0xe5f   :  { %2151 = vpow2.f32 %v2030_v15 }
 0xe60   :  { %2153 = vpow2.f32 %v2033_v53 }
 0xe64   :  { %v2150_v35 = vpop.eup %2149 }
 0xe65   :  { %830 = vrot.lane.b32.xlu1 %v2150_v35, %s2426_s20  ;;  %v2152_v36 = vpop.eup %2151 }
 0xe66   :  { %v679_v37 = vadd.f32 1.0, %v2152_v36  ;;  %v2154_v38 = vpop.eup %2153 }
 0xe67   :  { %v811_v39 = vadd.f32 1.0, %v2154_v38 }
 0xe68   :  { %2155 = vrcp.f32 %v679_v37  ;;  %v691_v47 = vand.u32 2147483648, %v679_v37  ;;  %vm685_vm12 = vweird.f32 %v679_v37  ;;  %v689_v48 = vand.u32 2147483647, %v679_v37 }
 0xe69   :  { %2157 = vrcp.f32 %v811_v39  ;;  %v823_v58 = vand.u32 2147483648, %v811_v39  ;;  %vm817_vm0 = vweird.f32 %v811_v39  ;;  %v821_v59 = vand.u32 2147483647, %v811_v39 }
 0xe6a   :  { %v692_v51 = vor.u32 1.1754944e-38, %v691_v47  ;;  %vm690_vm14 = vcmp.eq.f32.partialorder %v689_v48, 8.507059e+37  ;;  %v2767_v48 = vpop.f32.mrf.mxu0 }
 0xe6b   :  { %v824_v61 = vor.u32 1.1754944e-38, %v823_v58  ;;  %vm822_vm2 = vcmp.eq.f32.partialorder %v821_v59, 8.507059e+37 }
 0xe6e   :  { %v2156_v40 = vpop.eup %2155 }
 0xe6f   :  { %v681_v14 = vmul.f32 %v2156_v40, %v679_v37  ;;  %v2158_v42 = vpop.eup %2157  ;;  %vm686_vm11 = vweird.f32 %v2156_v40 }
 0xe70   :  { %v813_v44 = vmul.f32 %v2158_v42, %v811_v39  ;;  %vm687_vm13 = vmor %vm685_vm12, %vm686_vm11  ;;  %vm818_vm15 = vweird.f32 %v2158_v42 }
 0xe71   :  { %v682_v41 = vsub.f32 1.0, %v681_v14  ;;  %vm819_vm1 = vmor %vm817_vm0, %vm818_vm15 }
 0xe72   :  { %v814_v46 = vsub.f32 1.0, %v813_v44 }
 0xe73   :  { %v683_v43 = vmul.f32 %v2156_v40, %v682_v41 }
 0xe74   :  { %v815_v50 = vmul.f32 %v2158_v42, %v814_v46 }
 0xe75   :  { %v684_v45 = vadd.f32 %v2156_v40, %v683_v43 }
 0xe76   :  { %v816_v57 = vadd.f32 %v2158_v42, %v815_v50 }
 0xe77   :  { %v688_v49 = vsel %vm687_vm13, %v2156_v40, %v684_v45 }
 0xe78   :  { %v693_v55 = vsel %vm690_vm14, %v692_v51, %v688_v49  ;;  %v820_v60 = vsel %vm819_vm1, %v2158_v42, %v816_v57  ;;  %v2769_v49 = vpop.f32.mrf.mxu0 }
 0xe79   :  { %v825_v4 = vsel %vm822_vm2, %v824_v61, %v820_v60  ;;  %v696_v9 = vmul.f32 %v693_v55, %v2686_v17 }
 0xe7a   :  { %v828_v1 = vmul.f32 0.0, %v825_v4 }
 0xe80   :  { %v2771_v50 = vpop.f32.mrf.mxu0 }
 0xe88   :  { %v2773_v51 = vpop.f32.mrf.mxu0 }
 0xecf   :  { %v699_v52 = vpop.permute.xlu0 %698 }
 0xed0   :  { %v701_v56 = vmul.f32 %v699_v52, %v693_v55  ;;  %v198_v52 = vpop.f32.mrf.mxu0 }
 0xed2   :  { %703 = vrot.lane.b32.xlu2 %v701_v56, %s2427_s21 }
 0xed7   :  { %v831_v62 = vpop.permute.xlu1 %830 }
 0xed8   :  { %v833_v8 = vmul.f32 %v831_v62, %v825_v4 }
 0xeda   :  { %835 = vrot.lane.b32.xlu0 %v833_v8, %s2427_s21 }
 0xf2c   :  { %v704_v63 = vpop.permute.xlu2 %703 }
 0xf2d   :  { %v2733_v0 = vadd.f32 %v704_v63, %v696_v9 }
 0xf2f   :  { %2159 = vtanh.f32 %v2733_v0 }
 0xf35   :  { %v2160_v10 = vpop.eup %2159 }
 0xf36   :  { %709 = vrot.lane.b32.xlu1 %v2160_v10, %s2426_s20 }
 0xf4c   :  { %v836_v2 = vpop.permute.xlu0 %835 }
 0xf4d   :  { %v838_v3 = vadd.f32 %v836_v2, %v828_v1 }
 0xf4f   :  { %2161 = vtanh.f32 %v838_v3 }
 0xf55   :  { %v2162_v5 = vpop.eup %2161 }
 0xf56   :  { %841 = vrot.lane.b32.xlu2 %v2162_v5, %s2426_s20 }
 0xfa8   :  { %v710_v6 = vpop.permute.xlu1 %709 }
 0xfa9   :  { %v712_v7 = vmul.f32 %v710_v6, %v693_v55  ;;  %v201_v55 = vpop.f32.mrf.mxu0 }
 0xfaa   :  { %v202_v56 = vadd.f32 %v2724_v30, %v201_v55 }
 0xfab   :  { %714 = vrot.lane.b32.xlu0 %v712_v7, %s2427_s21 }
 0xfb0   :  { %v842_v11 = vpop.permute.xlu2 %841 }
 0xfb1   :  { %v844_v16 = vmul.f32 %v842_v11, %v825_v4 }
 0xfb3   :  { %846 = vrot.lane.b32.xlu1 %v844_v16, %s2427_s21 }
0x101d   :  { %v715_v17 = vpop.permute.xlu0 %714 }
0x101e   :  { %717 = vst.msk [vmem:[#allocation2 + $0x30] sm:$0xff] %vm261_vm5, %v715_v17  ;;  %2031 = vmatmul.msk.f32.vlgmr.msra.gmra.mxu3 %vm261_vm5, %v715_v17 }
0x101f   :  { %994 = vmatpush.msra.mxu3 %v2691_v21 }
0x1021   :  { %995 = vmatpush.msra.mxu3 %v2693_v22 }
0x1023   :  { %996 = vmatpush.msra.mxu3 %v2697_v23 }
0x1025   :  { %v847_v18 = vpop.permute.xlu1 %846  ;;  %v1311_v19 = vld [vmem:[#allocation2 + $0x30] sm:$0xff]  ;;  %997 = vmatpush.msra.mxu3 %v2701_v24 }
0x1026   :  { %849 = vst.msk [vmem:[#allocation3 + $0x38] sm:$0xff] %vm261_vm5, %v847_v18  ;;  %2034 = vmatmul.msk.f32.vlgmr.msrb.gmra.mxu3 %vm261_vm5, %v847_v18  ;;  %2062 = vmatmul.msk.f32.gmra.mxu1 %vm261_vm5, %v1311_v19 }
0x1027   :  { %1124 = vmatpush.msrb.mxu3 %v2691_v21 }
0x1029   :  { %1125 = vmatpush.msrb.mxu3 %v2693_v22 }
0x102b   :  { %1126 = vmatpush.msrb.mxu3 %v2697_v23 }
0x102d   :  { %1127 = vmatpush.msrb.mxu3 %v2701_v24 }
0x10a1   :  { %v2753_v20 = vpop.f32.mrf.mxu3 }
0x10a9   :  { %v869_v26 = vpop.f32.mrf.mxu3 }
0x10aa   :  { %v872_v27 = vadd.f32 %v869_v26, %v205_v25 }
0x10ac   :  { %2163 = vtanh.f32 %v872_v27  ;;  %v2035_v29 = vmul.f32 -1.442695, %v872_v27 }
0x10ae   :  { %2165 = vpow2.f32 %v2035_v29 }
0x10b2   :  { %v2164_v28 = vpop.eup %2163 }
0x10b3   :  { %895 = vrot.lane.b32.xlu2 %v2164_v28, %s2426_s20  ;;  %v199_v28 = vadd.f32 %v2724_v30, %v198_v52 }
0x10b4   :  { %v2166_v31 = vpop.eup %2165 }
0x10b5   :  { %v876_v32 = vadd.f32 1.0, %v2166_v31 }
0x10b7   :  { %2167 = vrcp.f32 %v876_v32  ;;  %v888_v36 = vand.u32 2147483648, %v876_v32  ;;  %vm882_vm4 = vweird.f32 %v876_v32  ;;  %v886_v13 = vand.u32 2147483647, %v876_v32 }
0x10b9   :  { %v889_v38 = vor.u32 1.1754944e-38, %v888_v36  ;;  %vm887_vm7 = vcmp.eq.f32.partialorder %v886_v13, 8.507059e+37 }
0x10bd   :  { %v2168_v33 = vpop.eup %2167 }
0x10be   :  { %v878_v34 = vmul.f32 %v2168_v33, %v876_v32  ;;  %vm883_vm3 = vweird.f32 %v2168_v33 }
0x10bf   :  { %vm884_vm6 = vmor %vm882_vm4, %vm883_vm3 }
0x10c0   :  { %v879_v35 = vsub.f32 1.0, %v878_v34 }
0x10c2   :  { %v880_v15 = vmul.f32 %v2168_v33, %v879_v35 }
0x10c4   :  { %v881_v53 = vadd.f32 %v2168_v33, %v880_v15 }
0x10c6   :  { %v885_v37 = vsel %vm884_vm6, %v2168_v33, %v881_v53 }
0x10c7   :  { %v890_v40 = vsel %vm887_vm7, %v889_v38, %v885_v37 }
0x10c8   :  { %v893_v41 = vmul.f32 %v890_v40, %v838_v3 }
0x110d   :  { %v896_v39 = vpop.permute.xlu2 %895 }
0x110e   :  { %v898_v14 = vmul.f32 %v896_v39, %v890_v40 }
0x1110   :  { %900 = vrot.lane.b32.xlu0 %v898_v14, %s2427_s21 }
0x1182   :  { %v901_v42 = vpop.permute.xlu0 %900 }
0x1183   :  { %v903_v43 = vadd.f32 %v901_v42, %v893_v41 }
0x1185   :  { %2169 = vtanh.f32 %v903_v43 }
0x118b   :  { %v2170_v44 = vpop.eup %2169 }
0x118c   :  { %906 = vrot.lane.b32.xlu1 %v2170_v44, %s2426_s20 }
0x11fe   :  { %v907_v45 = vpop.permute.xlu1 %906 }
0x11ff   :  { %v909_v46 = vmul.f32 %v907_v45, %v890_v40 }
0x1201   :  { %911 = vrot.lane.b32.xlu2 %v909_v46, %s2427_s21 }
0x125b   :  { %v912_v47 = vpop.permute.xlu2 %911 }
0x125c   :  { %914 = vst.msk [vmem:[#allocation3 + $0x30] sm:$0xff] %vm261_vm5, %v912_v47  ;;  %2036 = vmatmul.msk.f32.vlgmr.msra.gmra.mxu2 %vm261_vm5, %v912_v47  ;;  %v196_v47 = vadd.f32 %v2724_v30, %v2773_v51 }
0x125d   :  { %1189 = vmatpush.msra.mxu2 %v2691_v21 }
0x125f   :  { %1190 = vmatpush.msra.mxu2 %v2693_v22 }
0x1261   :  { %1191 = vmatpush.msra.mxu2 %v2697_v23 }
0x1263   :  { %1192 = vmatpush.msra.mxu2 %v2701_v24 }
0x12df   :  { %v934_v57 = vpop.f32.mrf.mxu2 }
0x12e0   :  { %v937_v58 = vadd.f32 %v934_v57, %v202_v56 }
0x12e2   :  { %2171 = vtanh.f32 %v937_v58  ;;  %v2037_v60 = vmul.f32 -1.442695, %v937_v58 }
0x12e4   :  { %2173 = vpow2.f32 %v2037_v60 }
0x12e8   :  { %v2172_v59 = vpop.eup %2171 }
0x12e9   :  { %960 = vrot.lane.b32.xlu0 %v2172_v59, %s2426_s20 }
0x12ea   :  { %v2174_v61 = vpop.eup %2173 }
0x12eb   :  { %v941_v62 = vadd.f32 1.0, %v2174_v61 }
0x12ed   :  { %2175 = vrcp.f32 %v941_v62  ;;  %v953_v1 = vand.u32 2147483648, %v941_v62  ;;  %vm947_vm9 = vweird.f32 %v941_v62  ;;  %v951_v2 = vand.u32 2147483647, %v941_v62 }
0x12ef   :  { %v954_v5 = vor.u32 1.1754944e-38, %v953_v1  ;;  %vm952_vm11 = vcmp.eq.f32.partialorder %v951_v2, 8.507059e+37 }
0x12f3   :  { %v2176_v4 = vpop.eup %2175 }
0x12f4   :  { %v943_v8 = vmul.f32 %v2176_v4, %v941_v62  ;;  %vm948_vm8 = vweird.f32 %v2176_v4 }
0x12f5   :  { %vm949_vm10 = vmor %vm947_vm9, %vm948_vm8 }
0x12f6   :  { %v944_v9 = vsub.f32 1.0, %v943_v8 }
0x12f8   :  { %v945_v63 = vmul.f32 %v2176_v4, %v944_v9 }
0x12fa   :  { %v946_v10 = vadd.f32 %v2176_v4, %v945_v63 }
0x12fc   :  { %v950_v3 = vsel %vm949_vm10, %v2176_v4, %v946_v10 }
0x12fd   :  { %v955_v7 = vsel %vm952_vm11, %v954_v5, %v950_v3 }
0x12fe   :  { %v958_v16 = vmul.f32 %v955_v7, %v903_v43 }
0x135b   :  { %v961_v6 = vpop.permute.xlu0 %960 }
0x135c   :  { %v963_v11 = vmul.f32 %v961_v6, %v955_v7 }
0x135e   :  { %965 = vrot.lane.b32.xlu1 %v963_v11, %s2427_s21 }
0x13d0   :  { %v966_v17 = vpop.permute.xlu1 %965 }
0x13d1   :  { %v968_v18 = vadd.f32 %v966_v17, %v958_v16 }
0x13d3   :  { %2177 = vtanh.f32 %v968_v18 }
0x13d9   :  { %v2178_v19 = vpop.eup %2177 }
0x13da   :  { %971 = vrot.lane.b32.xlu2 %v2178_v19, %s2426_s20  ;;  %v193_v19 = vadd.f32 %v2724_v30, %v2771_v50 }
0x1434   :  { %v972_v25 = vpop.permute.xlu2 %971 }
0x1435   :  { %v974_v26 = vmul.f32 %v972_v25, %v955_v7 }
0x1437   :  { %976 = vrot.lane.b32.xlu0 %v974_v26, %s2427_s21 }
0x14a9   :  { %v977_v27 = vpop.permute.xlu0 %976 }
0x14aa   :  { %979 = vst.msk [vmem:[#allocation3 + $0x28] sm:$0xff] %vm261_vm5, %v977_v27  ;;  %2038 = vmatmul.msk.f32.vlgmr.msra.gmra.mxu3 %vm261_vm5, %v977_v27 }
0x14ab   :  { %1254 = vmatpush.msra.mxu3 %v2691_v21 }
0x14ad   :  { %1255 = vmatpush.msra.mxu3 %v2693_v22 }
0x14af   :  { %1256 = vmatpush.msra.mxu3 %v2697_v23 }
0x14b1   :  { %1257 = vmatpush.msra.mxu3 %v2701_v24 }
0x152d   :  { %v999_v29 = vpop.f32.mrf.mxu3 }
0x152e   :  { %v1002_v31 = vadd.f32 %v999_v29, %v199_v28 }
0x1530   :  { %2179 = vtanh.f32 %v1002_v31  ;;  %v2039_v33 = vmul.f32 -1.442695, %v1002_v31 }
0x1532   :  { %2181 = vpow2.f32 %v2039_v33 }
0x1536   :  { %v2180_v32 = vpop.eup %2179 }
0x1537   :  { %1025 = vrot.lane.b32.xlu1 %v2180_v32, %s2426_s20 }
0x1538   :  { %v2182_v34 = vpop.eup %2181 }
0x1539   :  { %v1006_v35 = vadd.f32 1.0, %v2182_v34 }
0x153b   :  { %2183 = vrcp.f32 %v1006_v35  ;;  %v1018_v24 = vand.u32 2147483648, %v1006_v35  ;;  %vm1012_vm13 = vweird.f32 %v1006_v35  ;;  %v1016_v36 = vand.u32 2147483647, %v1006_v35 }
0x153d   :  { %v1019_v37 = vor.u32 1.1754944e-38, %v1018_v24  ;;  %vm1017_vm15 = vcmp.eq.f32.partialorder %v1016_v36, 8.507059e+37 }
0x1541   :  { %v2184_v21 = vpop.eup %2183 }
0x1542   :  { %v1008_v15 = vmul.f32 %v2184_v21, %v1006_v35  ;;  %vm1013_vm12 = vweird.f32 %v2184_v21 }
0x1543   :  { %vm1014_vm14 = vmor %vm1012_vm13, %vm1013_vm12 }
0x1544   :  { %v1009_v22 = vsub.f32 1.0, %v1008_v15 }
0x1546   :  { %v1010_v53 = vmul.f32 %v2184_v21, %v1009_v22 }
0x1548   :  { %v1011_v23 = vadd.f32 %v2184_v21, %v1010_v53 }
0x154a   :  { %v1015_v13 = vsel %vm1014_vm14, %v2184_v21, %v1011_v23 }
0x154b   :  { %v1020_v39 = vsel %vm1017_vm15, %v1019_v37, %v1015_v13 }
0x154c   :  { %v1023_v14 = vmul.f32 %v1020_v39, %v968_v18 }
0x15a9   :  { %v1026_v38 = vpop.permute.xlu1 %1025 }
0x15aa   :  { %v1028_v40 = vmul.f32 %v1026_v38, %v1020_v39 }
0x15ac   :  { %1030 = vrot.lane.b32.xlu2 %v1028_v40, %s2427_s21 }
0x1606   :  { %v1031_v41 = vpop.permute.xlu2 %1030 }
0x1607   :  { %v1033_v42 = vadd.f32 %v1031_v41, %v1023_v14 }
0x1609   :  { %2185 = vtanh.f32 %v1033_v42 }
0x160f   :  { %v2186_v43 = vpop.eup %2185 }
0x1610   :  { %1036 = vrot.lane.b32.xlu0 %v2186_v43, %s2426_s20 }
0x1682   :  { %v1037_v44 = vpop.permute.xlu0 %1036 }
0x1683   :  { %v1039_v45 = vmul.f32 %v1037_v44, %v1020_v39 }
0x1685   :  { %1041 = vrot.lane.b32.xlu1 %v1039_v45, %s2427_s21 }
0x16f7   :  { %v1042_v46 = vpop.permute.xlu1 %1041 }
0x16f8   :  { %1044 = vst.msk [vmem:[#allocation3 + $0x20] sm:$0xff] %vm261_vm5, %v1042_v46  ;;  %2040 = vmatmul.msk.f32.vlgmr.msrb.gmra.mxu2 %vm261_vm5, %v1042_v46 }
0x177b   :  { %v1064_v52 = vpop.f32.mrf.mxu2 }
0x177c   :  { %v1067_v55 = vadd.f32 %v1064_v52, %v196_v47 }
0x177e   :  { %2187 = vtanh.f32 %v1067_v55  ;;  %v2041_v57 = vmul.f32 -1.442695, %v1067_v55 }
0x1780   :  { %2189 = vpow2.f32 %v2041_v57 }
0x1784   :  { %v2188_v56 = vpop.eup %2187 }
0x1785   :  { %1090 = vrot.lane.b32.xlu2 %v2188_v56, %s2426_s20 }
0x1786   :  { %v2190_v58 = vpop.eup %2189 }
0x1787   :  { %v1071_v59 = vadd.f32 1.0, %v2190_v58 }
0x1789   :  { %2191 = vrcp.f32 %v1071_v59  ;;  %v1083_v9 = vand.u32 2147483648, %v1071_v59  ;;  %vm1077_vm1 = vweird.f32 %v1071_v59  ;;  %v1081_v51 = vand.u32 2147483647, %v1071_v59 }
0x178b   :  { %v1084_v10 = vor.u32 1.1754944e-38, %v1083_v9  ;;  %vm1082_vm3 = vcmp.eq.f32.partialorder %v1081_v51, 8.507059e+37 }
0x178f   :  { %v2192_v60 = vpop.eup %2191 }
0x1790   :  { %v1073_v61 = vmul.f32 %v2192_v60, %v1071_v59  ;;  %vm1078_vm0 = vweird.f32 %v2192_v60 }
0x1791   :  { %vm1079_vm2 = vmor %vm1077_vm1, %vm1078_vm0 }
0x1792   :  { %v1074_v62 = vsub.f32 1.0, %v1073_v61 }
0x1794   :  { %v1075_v4 = vmul.f32 %v2192_v60, %v1074_v62 }
0x1796   :  { %v1076_v8 = vadd.f32 %v2192_v60, %v1075_v4 }
0x1798   :  { %v1080_v63 = vsel %vm1079_vm2, %v2192_v60, %v1076_v8 }
0x1799   :  { %v1085_v2 = vsel %vm1082_vm3, %v1084_v10, %v1080_v63 }
0x179a   :  { %v1088_v5 = vmul.f32 %v1085_v2, %v1033_v42  ;;  %v190_v42 = vadd.f32 %v2724_v30, %v2769_v49 }
0x17df   :  { %v1091_v1 = vpop.permute.xlu2 %1090 }
0x17e0   :  { %v1093_v3 = vmul.f32 %v1091_v1, %v1085_v2 }
0x17e2   :  { %1095 = vrot.lane.b32.xlu0 %v1093_v3, %s2427_s21 }
0x1854   :  { %v1096_v6 = vpop.permute.xlu0 %1095 }
0x1855   :  { %v1098_v7 = vadd.f32 %v1096_v6, %v1088_v5 }
0x1857   :  { %2193 = vtanh.f32 %v1098_v7 }
0x185d   :  { %v2194_v11 = vpop.eup %2193 }
0x185e   :  { %1101 = vrot.lane.b32.xlu1 %v2194_v11, %s2426_s20 }
0x18d0   :  { %v1102_v16 = vpop.permute.xlu1 %1101 }
0x18d1   :  { %v1104_v17 = vmul.f32 %v1102_v16, %v1085_v2  ;;  %v2291_v2 = vld [vmem:[%s2959_s3] ss:$0 sm:$0xff] }
0x18d2   :  { %v255_v3 = vadd.f32 %v2291_v2, %v2640_v54 }
0x18d3   :  { %1106 = vrot.lane.b32.xlu2 %v1104_v17, %s2427_s21  ;;  %v187_v17 = vadd.f32 %v2724_v30, %v2767_v48 }
0x18d4   :  { %v740_v5 = vadd.f32 %v2753_v20, %v255_v3  ;;  %v2847_v3 = vld [vmem:[#allocation12 + $0x10] sm:$0xff] }
0x192d   :  { %v1107_v18 = vpop.permute.xlu2 %1106 }
0x192e   :  { %1109 = vst.msk [vmem:[#allocation3 + $0x18] sm:$0xff] %vm261_vm5, %v1107_v18  ;;  %2042 = vmatmul.msk.f32.vlgmr.msrb.gmra.mxu3 %vm261_vm5, %v1107_v18 }
0x19b1   :  { %v1129_v25 = vpop.f32.mrf.mxu3 }
0x19b2   :  { %v1132_v26 = vadd.f32 %v1129_v25, %v193_v19  ;;  %v2032_v25 = vmul.f32 -1.442695, %v740_v5 }
0x19b4   :  { %2195 = vtanh.f32 %v1132_v26  ;;  %v2043_v28 = vmul.f32 -1.442695, %v1132_v26 }
0x19b6   :  { %2197 = vpow2.f32 %v2043_v28 }
0x19ba   :  { %v2196_v27 = vpop.eup %2195 }
0x19bb   :  { %1155 = vrot.lane.b32.xlu0 %v2196_v27, %s2426_s20 }
0x19bc   :  { %v2198_v29 = vpop.eup %2197 }
0x19bd   :  { %v1136_v31 = vadd.f32 1.0, %v2198_v29 }
0x19bf   :  { %2199 = vrcp.f32 %v1136_v31  ;;  %v1148_v15 = vand.u32 2147483648, %v1136_v31  ;;  %vm1142_vm6 = vweird.f32 %v1136_v31  ;;  %v1146_v50 = vand.u32 2147483647, %v1136_v31 }
0x19c1   :  { %v1149_v53 = vor.u32 1.1754944e-38, %v1148_v15  ;;  %vm1147_vm8 = vcmp.eq.f32.partialorder %v1146_v50, 8.507059e+37 }
0x19c5   :  { %v2200_v32 = vpop.eup %2199 }
0x19c6   :  { %v1138_v33 = vmul.f32 %v2200_v32, %v1136_v31  ;;  %vm1143_vm4 = vweird.f32 %v2200_v32 }
0x19c7   :  { %vm1144_vm7 = vmor %vm1142_vm6, %vm1143_vm4 }
0x19c8   :  { %v1139_v34 = vsub.f32 1.0, %v1138_v33 }
0x19ca   :  { %v1140_v35 = vmul.f32 %v2200_v32, %v1139_v34 }
0x19cc   :  { %v1141_v21 = vadd.f32 %v2200_v32, %v1140_v35 }
0x19ce   :  { %v1145_v22 = vsel %vm1144_vm7, %v2200_v32, %v1141_v21 }
0x19cf   :  { %v1150_v24 = vsel %vm1147_vm8, %v1149_v53, %v1145_v22 }
0x19d0   :  { %v1153_v13 = vmul.f32 %v1150_v24, %v1098_v7 }
0x1a2d   :  { %v1156_v23 = vpop.permute.xlu0 %1155 }
0x1a2e   :  { %v1158_v36 = vmul.f32 %v1156_v23, %v1150_v24 }
0x1a30   :  { %1160 = vrot.lane.b32.xlu1 %v1158_v36, %s2427_s21 }
0x1aa2   :  { %v1161_v37 = vpop.permute.xlu1 %1160 }
0x1aa3   :  { %v1163_v38 = vadd.f32 %v1161_v37, %v1153_v13 }
0x1aa5   :  { %2201 = vtanh.f32 %v1163_v38 }
0x1aab   :  { %v2202_v39 = vpop.eup %2201 }
0x1aac   :  { %1166 = vrot.lane.b32.xlu2 %v2202_v39, %s2426_s20 }
0x1b06   :  { %v1167_v40 = vpop.permute.xlu2 %1166 }
0x1b07   :  { %v1169_v14 = vmul.f32 %v1167_v40, %v1150_v24 }
0x1b09   :  { %1171 = vrot.lane.b32.xlu0 %v1169_v14, %s2427_s21 }
0x1b7b   :  { %v1172_v41 = vpop.permute.xlu0 %1171 }
0x1b7c   :  { %1174 = vst.msk [vmem:[#allocation3 + $0x10] sm:$0xff] %vm261_vm5, %v1172_v41  ;;  %2044 = vmatmul.msk.f32.vlgmr.msra.gmra.mxu2 %vm261_vm5, %v1172_v41 }
0x1b83   :  { %v1315_v2 = vld [vmem:[#allocation3 + $0x10] sm:$0xff] }
0x1bff   :  { %v1194_v43 = vpop.f32.mrf.mxu2 }
0x1c00   :  { %v1197_v44 = vadd.f32 %v1194_v43, %v190_v42 }
0x1c02   :  { %2203 = vtanh.f32 %v1197_v44  ;;  %v2045_v46 = vmul.f32 -1.442695, %v1197_v44 }
0x1c04   :  { %2205 = vpow2.f32 %v2045_v46 }
0x1c08   :  { %v2204_v45 = vpop.eup %2203 }
0x1c09   :  { %1220 = vrot.lane.b32.xlu1 %v2204_v45, %s2426_s20 }
0x1c0a   :  { %v2206_v47 = vpop.eup %2205 }
0x1c0b   :  { %v1201_v52 = vadd.f32 1.0, %v2206_v47 }
0x1c0d   :  { %2207 = vrcp.f32 %v1201_v52  ;;  %v1213_v60 = vand.u32 2147483648, %v1201_v52  ;;  %vm1207_vm10 = vweird.f32 %v1201_v52  ;;  %v1211_v49 = vand.u32 2147483647, %v1201_v52 }
0x1c0f   :  { %v1214_v62 = vor.u32 1.1754944e-38, %v1213_v60  ;;  %vm1212_vm12 = vcmp.eq.f32.partialorder %v1211_v49, 8.507059e+37  ;;  %v1326_v60 = vld [vmem:[#allocation10 + $0x28] sm:$0xff]  ;;  %v1325_v49 = vld [vmem:[#allocation10 + $0x20] sm:$0xff] }
0x1c13   :  { %v2208_v55 = vpop.eup %2207 }
0x1c14   :  { %v1203_v56 = vmul.f32 %v2208_v55, %v1201_v52  ;;  %vm1208_vm9 = vweird.f32 %v2208_v55 }
0x1c15   :  { %vm1209_vm11 = vmor %vm1207_vm10, %vm1208_vm9 }
0x1c16   :  { %v1204_v57 = vsub.f32 1.0, %v1203_v56 }
0x1c18   :  { %v1205_v58 = vmul.f32 %v2208_v55, %v1204_v57 }
0x1c1a   :  { %v1206_v59 = vadd.f32 %v2208_v55, %v1205_v58  ;;  %v1328_v58 = vld [vmem:[#allocation10 + $0x38] sm:$0xff] }
0x1c1b   :  { %1365 = vmatpush.msrb.mxu0 %v1328_v58 }
0x1c1c   :  { %v1210_v61 = vsel %vm1209_vm11, %v2208_v55, %v1206_v59  ;;  %v1327_v59 = vld [vmem:[#allocation10 + $0x30] sm:$0xff] }
0x1c1d   :  { %v1215_v8 = vsel %vm1212_vm12, %v1214_v62, %v1210_v61  ;;  %1366 = vmatpush.msrb.mxu0 %v1327_v59 }
0x1c1e   :  { %v1218_v51 = vmul.f32 %v1215_v8, %v1163_v38 }
0x1c1f   :  { %1367 = vmatpush.msrb.mxu0 %v1326_v60 }
0x1c21   :  { %1368 = vmatpush.msrb.mxu0 %v1325_v49 }
0x1c7b   :  { %v1221_v4 = vpop.permute.xlu1 %1220 }
0x1c7c   :  { %v1223_v9 = vmul.f32 %v1221_v4, %v1215_v8 }
0x1c7e   :  { %1225 = vrot.lane.b32.xlu2 %v1223_v9, %s2427_s21 }
0x1cd8   :  { %v1226_v63 = vpop.permute.xlu2 %1225 }
0x1cd9   :  { %v2813_v10 = vadd.f32 %v1226_v63, %v1218_v51 }
0x1cdb   :  { %2209 = vtanh.f32 %v2813_v10 }
0x1cdc   :  { %2211 = vtanh.f32 %v740_v5  ;;  %v2849_v5 = vld [vmem:[#allocation12 + $0x8] sm:$0xff] }
0x1ce1   :  { %v2210_v1 = vpop.eup %2209 }
0x1ce2   :  { %1231 = vrot.lane.b32.xlu0 %v2210_v1, %s2426_s20  ;;  %v2212_v11 = vpop.eup %2211  ;;  %v2842_v1 = vld [vmem:[#allocation12 + $0x18] sm:$0xff] }
0x1ce3   :  { %1487 = vmatpush.msrb.mxu2 %v2842_v1  ;;  %1550 = vmatpush.msrb.mxu3 %v2842_v1 }
0x1ce5   :  { %1488 = vmatpush.msrb.mxu2 %v2847_v3  ;;  %1551 = vmatpush.msrb.mxu3 %v2847_v3 }
0x1ce7   :  { %1489 = vmatpush.msrb.mxu2 %v2849_v5  ;;  %1552 = vmatpush.msrb.mxu3 %v2849_v5 }
0x1d54   :  { %v1232_v6 = vpop.permute.xlu0 %1231 }
0x1d55   :  { %v1234_v7 = vmul.f32 %v1232_v6, %v1215_v8  ;;  %v2853_v6 = vld [vmem:[#allocation12] sm:$0xff] }
0x1d56   :  { %1490 = vmatpush.msrb.mxu2 %v2853_v6  ;;  %1553 = vmatpush.msrb.mxu3 %v2853_v6 }
0x1d57   :  { %1236 = vrot.lane.b32.xlu1 %v1234_v7, %s2427_s21  ;;  %1491 = vmatmul.f32.vlgmr.msrb.gmra.mxu2 %v2425_v12  ;;  %v1316_v7 = vld [vmem:[#allocation3 + $0x18] sm:$0xff]  ;;  %v1317_v12 = vld [vmem:[#allocation3 + $0x20] sm:$0xff] }
0x1d58   :  { %1613 = vmatpush.msra.mxu2 %v2842_v1 }
0x1d5a   :  { %1614 = vmatpush.msra.mxu2 %v2847_v3 }
0x1d5c   :  { %1615 = vmatpush.msra.mxu2 %v2849_v5 }
0x1d5e   :  { %1616 = vmatpush.msra.mxu2 %v2853_v6 }
0x1d5f   :  { %763 = vrot.lane.b32.xlu1 %v2212_v11, %s2426_s20  ;;  %v1318_v11 = vld [vmem:[#allocation3 + $0x28] sm:$0xff] }
0x1d60   :  { %1739 = vmatpush.msrb.mxu2 %v2842_v1 }
0x1d62   :  { %1740 = vmatpush.msrb.mxu2 %v2847_v3 }
0x1d64   :  { %1741 = vmatpush.msrb.mxu2 %v2849_v5 }
0x1d66   :  { %1742 = vmatpush.msrb.mxu2 %v2853_v6 }
0x1dc9   :  { %v1237_v16 = vpop.permute.xlu1 %1236 }
0x1dca   :  { %1239 = vst.msk [vmem:[#allocation3 + $0x8] sm:$0xff] %vm261_vm5, %v1237_v16  ;;  %2046 = vmatmul.msk.f32.vlgmr.msra.gmra.mxu3 %vm261_vm5, %v1237_v16  ;;  %v1319_v16 = vld [vmem:[#allocation3 + $0x30] sm:$0xff] }
0x1dcb   :  { %1676 = vmatpush.msra.mxu3 %v2842_v1 }
0x1dcd   :  { %1677 = vmatpush.msra.mxu3 %v2847_v3 }
0x1dcf   :  { %1678 = vmatpush.msra.mxu3 %v2849_v5 }
0x1dd1   :  { %v764_v41 = vpop.permute.xlu1 %763  ;;  %v1314_v63 = vld [vmem:[#allocation3 + $0x8] sm:$0xff]  ;;  %1679 = vmatpush.msra.mxu3 %v2853_v6 }
0x1e4d   :  { %v1259_v18 = vpop.f32.mrf.mxu3 }
0x1e4e   :  { %v1262_v54 = vadd.f32 %v1259_v18, %v187_v17  ;;  %v1320_v17 = vld [vmem:[#allocation3 + $0x38] sm:$0xff]  ;;  %v2096_v18 = vld [vmem:[%s2968_s12] ss:$0 sm:$0xff] }
0x1e50   :  { %2213 = vtanh.f32 %v1262_v54  ;;  %v2047_v19 = vmul.f32 -1.442695, %v1262_v54  ;;  %v1435_v54 = vpop.f32.mrf.mxu1 }
0x1e52   :  { %2215 = vpow2.f32 %v2047_v19 }
0x1e53   :  { %2217 = vpow2.f32 %v2032_v25 }
0x1e56   :  { %v2214_v20 = vpop.eup %2213 }
0x1e57   :  { %1285 = vrot.lane.b32.xlu2 %v2214_v20, %s2426_s20 }
0x1e58   :  { %v2216_v26 = vpop.eup %2215 }
0x1e59   :  { %v1266_v27 = vadd.f32 1.0, %v2216_v26  ;;  %v2218_v28 = vpop.eup %2217  ;;  %v1438_v26 = vpop.f32.mrf.mxu1 }
0x1e5a   :  { %v744_v29 = vadd.f32 1.0, %v2218_v28 }
0x1e5b   :  { %2219 = vrcp.f32 %v1266_v27  ;;  %v1278_v15 = vand.u32 2147483648, %v1266_v27  ;;  %vm1272_vm14 = vweird.f32 %v1266_v27  ;;  %v1276_v50 = vand.u32 2147483647, %v1266_v27 }
0x1e5c   :  { %2221 = vrcp.f32 %v744_v29  ;;  %v756_v38 = vand.u32 2147483648, %v744_v29  ;;  %vm750_vm2 = vweird.f32 %v744_v29  ;;  %v754_v39 = vand.u32 2147483647, %v744_v29 }
0x1e5d   :  { %v1279_v23 = vor.u32 1.1754944e-38, %v1278_v15  ;;  %vm1277_vm0 = vcmp.eq.f32.partialorder %v1276_v50, 8.507059e+37 }
0x1e5e   :  { %v757_v14 = vor.u32 1.1754944e-38, %v756_v38  ;;  %vm755_vm4 = vcmp.eq.f32.partialorder %v754_v39, 8.507059e+37 }
0x1e61   :  { %v2220_v31 = vpop.eup %2219 }
0x1e62   :  { %v1268_v32 = vmul.f32 %v2220_v31, %v1266_v27  ;;  %v2222_v30 = vpop.eup %2221  ;;  %vm1273_vm13 = vweird.f32 %v2220_v31 }
0x1e63   :  { %v746_v48 = vmul.f32 %v2222_v30, %v744_v29  ;;  %vm1274_vm15 = vmor %vm1272_vm14, %vm1273_vm13  ;;  %vm751_vm1 = vweird.f32 %v2222_v30 }
0x1e64   :  { %v1269_v33 = vsub.f32 1.0, %v1268_v32  ;;  %vm752_vm3 = vmor %vm750_vm2, %vm751_vm1 }
0x1e65   :  { %v747_v35 = vsub.f32 1.0, %v746_v48 }
0x1e66   :  { %v1270_v34 = vmul.f32 %v2220_v31, %v1269_v33 }
0x1e67   :  { %v748_v22 = vmul.f32 %v2222_v30, %v747_v35 }
0x1e68   :  { %v1271_v21 = vadd.f32 %v2220_v31, %v1270_v34 }
0x1e69   :  { %v749_v13 = vadd.f32 %v2222_v30, %v748_v22 }
0x1e6a   :  { %v1275_v53 = vsel %vm1274_vm15, %v2220_v31, %v1271_v21  ;;  %v1441_v31 = vpop.f32.mrf.mxu1 }
0x1e6b   :  { %v1280_v36 = vsel %vm1277_vm0, %v1279_v23, %v1275_v53  ;;  %v753_v40 = vsel %vm752_vm3, %v2222_v30, %v749_v13 }
0x1e6c   :  { %v758_v42 = vsel %vm755_vm4, %v757_v14, %v753_v40  ;;  %v1283_v44 = vmul.f32 %v1280_v36, %v2813_v10 }
0x1e6d   :  { %v766_v43 = vmul.f32 %v764_v41, %v758_v42  ;;  %v761_v47 = vmul.f32 %v758_v42, %v2733_v0 }
0x1e72   :  { %v1444_v48 = vpop.f32.mrf.mxu1 }
0x1e7a   :  { %v1447_v15 = vpop.f32.mrf.mxu1 }
0x1e82   :  { %v1450_v23 = vpop.f32.mrf.mxu1 }
0x1eb1   :  { %v1286_v24 = vpop.permute.xlu2 %1285 }
0x1eb2   :  { %v1288_v37 = vmul.f32 %v1286_v24, %v1280_v36 }
0x1eb4   :  { %1290 = vrot.lane.b32.xlu0 %v1288_v37, %s2427_s21  ;;  %v1453_v37 = vpop.f32.mrf.mxu1 }
0x1ebc   :  { %768 = vrot.lane.b32.xlu0 %v766_v43, %s2427_s21  ;;  %v1492_v43 = vpop.f32.mrf.mxu2 }
0x1f26   :  { %v1291_v45 = vpop.permute.xlu0 %1290 }
0x1f27   :  { %v1293_v46 = vadd.f32 %v1291_v45, %v1283_v44 }
0x1f29   :  { %2223 = vtanh.f32 %v1293_v46 }
0x1f2e   :  { %v769_v52 = vpop.permute.xlu0 %768 }
0x1f2f   :  { %v2224_v55 = vpop.eup %2223  ;;  %v771_v56 = vadd.f32 %v769_v52, %v761_v47 }
0x1f30   :  { %1296 = vrot.lane.b32.xlu2 %v2224_v55, %s2426_s20 }
0x1f31   :  { %2225 = vtanh.f32 %v771_v56 }
0x1f37   :  { %v2226_v57 = vpop.eup %2225 }
0x1f38   :  { %774 = vrot.lane.b32.xlu2 %v2226_v57, %s2426_s20 }
0x1f8a   :  { %v1297_v61 = vpop.permute.xlu2 %1296 }
0x1f8b   :  { %v1299_v62 = vmul.f32 %v1297_v61, %v1280_v36 }
0x1f8d   :  { %1301 = vrot.lane.b32.xlu1 %v1299_v62, %s2427_s21 }
0x1f92   :  { %v775_v0 = vpop.permute.xlu2 %774 }
0x1f93   :  { %v777_v4 = vmul.f32 %v775_v0, %v758_v42 }
0x1f95   :  { %779 = vrot.lane.b32.xlu0 %v777_v4, %s2427_s21 }
0x1fff   :  { %v1302_v8 = vpop.permute.xlu1 %1301 }
0x2000   :  { %1304 = vst.msk [vmem:[#allocation3] sm:$0xff] %vm261_vm5, %v1302_v8 }
0x2007   :  { %v780_v9 = vpop.permute.xlu0 %779  ;;  %v1313_v51 = vld [vmem:[#allocation3] sm:$0xff] }
0x2008   :  { %782 = vst.msk [vmem:[#allocation2 + $0x38] sm:$0xff] %vm261_vm5, %v780_v9  ;;  %2048 = vmatmul.msk.f32.vlgmr.msrb.gmra.mxu0 %vm261_vm5, %v1313_v51 }
0x200f   :  { %v1312_v10 = vld [vmem:[#allocation2 + $0x38] sm:$0xff] }
0x2010   :  { %2049 = vmatmul.msk.f32.gmra.mxu0 %vm261_vm5, %v1314_v63  ;;  %2063 = vmatmul.msk.f32.gmra.mxu1 %vm261_vm5, %v1312_v10 }
0x2018   :  { %2050 = vmatmul.msk.f32.gmra.mxu0 %vm261_vm5, %v1315_v2 }
0x2020   :  { %2051 = vmatmul.msk.f32.gmra.mxu0 %vm261_vm5, %v1316_v7 }
0x2028   :  { %2052 = vmatmul.msk.f32.gmra.mxu0 %vm261_vm5, %v1317_v12 }
0x2030   :  { %2053 = vmatmul.msk.f32.gmra.mxu0 %vm261_vm5, %v1318_v11 }
0x2038   :  { %2054 = vmatmul.msk.f32.gmra.mxu0 %vm261_vm5, %v1319_v16 }
0x2040   :  { %2055 = vmatmul.msk.f32.gmra.mxu0 %vm261_vm5, %v1320_v17 }
0x2085   :  { %v1370_v20 = vpop.f32.mrf.mxu0 }
0x2086   :  { %v1436_v19 = vadd.f32 %v1435_v54, %v1370_v20 }
0x2088   :  { %v2880_v25 = vadd.f32 %v2096_v18, %v1436_v19 }
0x208d   :  { %v1373_v27 = vpop.f32.mrf.mxu0  ;;  %v1456_v14 = vpop.f32.mrf.mxu1 }
0x208e   :  { %v1439_v28 = vadd.f32 %v1438_v26, %v1373_v27 }
0x2090   :  { %v2882_v29 = vadd.f32 %v2096_v18, %v1439_v28 }
0x2095   :  { %v1376_v32 = vpop.f32.mrf.mxu0 }
0x2096   :  { %v1442_v33 = vadd.f32 %v1441_v31, %v1376_v32 }
0x2098   :  { %v2884_v30 = vadd.f32 %v2096_v18, %v1442_v33 }
0x209d   :  { %v1379_v34 = vpop.f32.mrf.mxu0 }
0x209e   :  { %v1445_v35 = vadd.f32 %v1444_v48, %v1379_v34 }
0x20a0   :  { %v2886_v21 = vadd.f32 %v2096_v18, %v1445_v35 }
0x20a5   :  { %v1382_v50 = vpop.f32.mrf.mxu0 }
0x20a6   :  { %v1448_v22 = vadd.f32 %v1447_v15, %v1382_v50 }
0x20a8   :  { %v2888_v53 = vadd.f32 %v2096_v18, %v1448_v22 }
0x20ad   :  { %v1385_v24 = vpop.f32.mrf.mxu0 }
0x20ae   :  { %v1451_v36 = vadd.f32 %v1450_v23, %v1385_v24 }
0x20b0   :  { %v2890_v13 = vadd.f32 %v2096_v18, %v1451_v36 }
0x20b5   :  { %v1388_v38 = vpop.f32.mrf.mxu0 }
0x20b6   :  { %v1454_v39 = vadd.f32 %v1453_v37, %v1388_v38 }
0x20b8   :  { %v1469_v40 = vadd.f32 %v2096_v18, %v1454_v39 }
0x20bd   :  { %v1391_v41 = vpop.f32.mrf.mxu0 }
0x20be   :  { %v1457_v42 = vadd.f32 %v1456_v14, %v1391_v41 }
0x20c0   :  { %v1470_v44 = vadd.f32 %v2096_v18, %v1457_v42 }
0x20c2   :  { %v1495_v45 = vadd.f32 %v1492_v43, %v1470_v44 }
0x20c4   :  { %2227 = vtanh.f32 %v1495_v45  ;;  %v2064_v47 = vmul.f32 -1.442695, %v1495_v45 }
0x20c6   :  { %2229 = vpow2.f32 %v2064_v47 }
0x20ca   :  { %v2228_v46 = vpop.eup %2227 }
0x20cb   :  { %1518 = vrot.lane.b32.xlu1 %v2228_v46, %s2426_s20 }
0x20cc   :  { %v2230_v52 = vpop.eup %2229 }
0x20cd   :  { %v1499_v55 = vadd.f32 1.0, %v2230_v52 }
0x20cf   :  { %2231 = vrcp.f32 %v1499_v55  ;;  %v1511_v49 = vand.u32 2147483648, %v1499_v55  ;;  %vm1505_vm7 = vweird.f32 %v1499_v55  ;;  %v1509_v61 = vand.u32 2147483647, %v1499_v55 }
0x20d1   :  { %v1512_v0 = vor.u32 1.1754944e-38, %v1511_v49  ;;  %vm1510_vm9 = vcmp.eq.f32.partialorder %v1509_v61, 8.507059e+37 }
0x20d5   :  { %v2232_v56 = vpop.eup %2231 }
0x20d6   :  { %v1501_v57 = vmul.f32 %v2232_v56, %v1499_v55  ;;  %vm1506_vm6 = vweird.f32 %v2232_v56 }
0x20d7   :  { %vm1507_vm8 = vmor %vm1505_vm7, %vm1506_vm6 }
0x20d8   :  { %v1502_v58 = vsub.f32 1.0, %v1501_v57 }
0x20da   :  { %v1503_v59 = vmul.f32 %v2232_v56, %v1502_v58 }
0x20dc   :  { %v1504_v60 = vadd.f32 %v2232_v56, %v1503_v59 }
0x20de   :  { %v1508_v62 = vsel %vm1507_vm8, %v2232_v56, %v1504_v60 }
0x20df   :  { %v1513_v8 = vsel %vm1510_vm9, %v1512_v0, %v1508_v62 }
0x20e0   :  { %v1516_v51 = vmul.f32 0.0, %v1513_v8 }
0x213d   :  { %v1519_v4 = vpop.permute.xlu1 %1518 }
0x213e   :  { %v1521_v9 = vmul.f32 %v1519_v4, %v1513_v8 }
0x2140   :  { %1523 = vrot.lane.b32.xlu2 %v1521_v9, %s2427_s21 }
0x219a   :  { %v1524_v63 = vpop.permute.xlu2 %1523 }
0x219b   :  { %v1526_v10 = vadd.f32 %v1524_v63, %v1516_v51 }
0x219d   :  { %2233 = vtanh.f32 %v1526_v10 }
0x21a3   :  { %v2234_v2 = vpop.eup %2233 }
0x21a4   :  { %1529 = vrot.lane.b32.xlu0 %v2234_v2, %s2426_s20 }
0x2216   :  { %v1530_v7 = vpop.permute.xlu0 %1529 }
0x2217   :  { %v1532_v12 = vmul.f32 %v1530_v7, %v1513_v8 }
0x2219   :  { %1534 = vrot.lane.b32.xlu1 %v1532_v12, %s2427_s21 }
0x228b   :  { %v1535_v11 = vpop.permute.xlu1 %1534 }
0x228c   :  { %2065 = vmatmul.msk.f32.vlgmr.msrb.gmra.mxu3 %vm261_vm5, %v1535_v11 }
0x228d   :  { %1802 = vmatpush.msrb.mxu3 %v2842_v1 }
0x228f   :  { %1803 = vmatpush.msrb.mxu3 %v2847_v3 }
0x2291   :  { %1804 = vmatpush.msrb.mxu3 %v2849_v5 }
0x2293   :  { %1805 = vmatpush.msrb.mxu3 %v2853_v6 }
0x230f   :  { %v1555_v16 = vpop.f32.mrf.mxu3 }
0x2310   :  { %v1558_v17 = vadd.f32 %v1555_v16, %v1469_v40 }
0x2312   :  { %2235 = vtanh.f32 %v1558_v17  ;;  %v2066_v54 = vmul.f32 -1.442695, %v1558_v17 }
0x2314   :  { %2237 = vpow2.f32 %v2066_v54 }
0x2318   :  { %v2236_v18 = vpop.eup %2235 }
0x2319   :  { %1581 = vrot.lane.b32.xlu2 %v2236_v18, %s2426_s20 }
0x231a   :  { %v2238_v20 = vpop.eup %2237 }
0x231b   :  { %v1562_v19 = vadd.f32 1.0, %v2238_v20 }
0x231d   :  { %2239 = vrcp.f32 %v1562_v19  ;;  %v1574_v33 = vand.u32 2147483648, %v1562_v19  ;;  %vm1568_vm11 = vweird.f32 %v1562_v19  ;;  %v1572_v48 = vand.u32 2147483647, %v1562_v19 }
0x231f   :  { %v1575_v35 = vor.u32 1.1754944e-38, %v1574_v33  ;;  %vm1573_vm13 = vcmp.eq.f32.partialorder %v1572_v48, 8.507059e+37 }
0x2323   :  { %v2240_v26 = vpop.eup %2239 }
0x2324   :  { %v1564_v27 = vmul.f32 %v2240_v26, %v1562_v19  ;;  %vm1569_vm10 = vweird.f32 %v2240_v26 }
0x2325   :  { %vm1570_vm12 = vmor %vm1568_vm11, %vm1569_vm10 }
0x2326   :  { %v1565_v28 = vsub.f32 1.0, %v1564_v27 }
0x2328   :  { %v1566_v31 = vmul.f32 %v2240_v26, %v1565_v28 }
0x232a   :  { %v1567_v32 = vadd.f32 %v2240_v26, %v1566_v31 }
0x232c   :  { %v1571_v34 = vsel %vm1570_vm12, %v2240_v26, %v1567_v32 }
0x232d   :  { %v1576_v50 = vsel %vm1573_vm13, %v1575_v35, %v1571_v34 }
0x232e   :  { %v1579_v23 = vmul.f32 %v1576_v50, %v1526_v10 }
0x2373   :  { %v1582_v15 = vpop.permute.xlu2 %1581 }
0x2374   :  { %v1584_v22 = vmul.f32 %v1582_v15, %v1576_v50 }
0x2376   :  { %1586 = vrot.lane.b32.xlu0 %v1584_v22, %s2427_s21 }
0x23e8   :  { %v1587_v24 = vpop.permute.xlu0 %1586 }
0x23e9   :  { %v1589_v36 = vadd.f32 %v1587_v24, %v1579_v23 }
0x23eb   :  { %2241 = vtanh.f32 %v1589_v36 }
0x23f1   :  { %v2242_v37 = vpop.eup %2241 }
0x23f2   :  { %1592 = vrot.lane.b32.xlu1 %v2242_v37, %s2426_s20 }
0x2464   :  { %v1593_v38 = vpop.permute.xlu1 %1592 }
0x2465   :  { %v1595_v39 = vmul.f32 %v1593_v38, %v1576_v50 }
0x2467   :  { %1597 = vrot.lane.b32.xlu2 %v1595_v39, %s2427_s21 }
0x24c1   :  { %v1598_v40 = vpop.permute.xlu2 %1597 }
0x24c2   :  { %2067 = vmatmul.msk.f32.vlgmr.msra.gmra.mxu2 %vm261_vm5, %v1598_v40 }
0x24c3   :  { %1865 = vmatpush.msra.mxu2 %v2842_v1 }
0x24c5   :  { %1866 = vmatpush.msra.mxu2 %v2847_v3 }
0x24c7   :  { %1867 = vmatpush.msra.mxu2 %v2849_v5 }
0x24c9   :  { %1868 = vmatpush.msra.mxu2 %v2853_v6 }
0x2545   :  { %v1618_v14 = vpop.f32.mrf.mxu2 }
0x2546   :  { %v1621_v41 = vadd.f32 %v1618_v14, %v2890_v13 }
0x2548   :  { %2243 = vtanh.f32 %v1621_v41  ;;  %v2068_v43 = vmul.f32 -1.442695, %v1621_v41 }
0x254a   :  { %2245 = vpow2.f32 %v2068_v43 }
0x254e   :  { %v2244_v42 = vpop.eup %2243 }
0x254f   :  { %1644 = vrot.lane.b32.xlu0 %v2244_v42, %s2426_s20 }
0x2550   :  { %v2246_v44 = vpop.eup %2245 }
0x2551   :  { %v1625_v45 = vadd.f32 1.0, %v2246_v44 }
0x2553   :  { %2247 = vrcp.f32 %v1625_v45  ;;  %v1637_v57 = vand.u32 2147483648, %v1625_v45  ;;  %vm1631_vm15 = vweird.f32 %v1625_v45  ;;  %v1635_v58 = vand.u32 2147483647, %v1625_v45 }
0x2555   :  { %v1638_v59 = vor.u32 1.1754944e-38, %v1637_v57  ;;  %vm1636_vm1 = vcmp.eq.f32.partialorder %v1635_v58, 8.507059e+37 }
0x2559   :  { %v2248_v46 = vpop.eup %2247 }
0x255a   :  { %v1627_v47 = vmul.f32 %v2248_v46, %v1625_v45  ;;  %vm1632_vm14 = vweird.f32 %v2248_v46 }
0x255b   :  { %vm1633_vm0 = vmor %vm1631_vm15, %vm1632_vm14 }
0x255c   :  { %v1628_v52 = vsub.f32 1.0, %v1627_v47 }
0x255e   :  { %v1629_v55 = vmul.f32 %v2248_v46, %v1628_v52 }
0x2560   :  { %v1630_v56 = vadd.f32 %v2248_v46, %v1629_v55 }
0x2562   :  { %v1634_v13 = vsel %vm1633_vm0, %v2248_v46, %v1630_v56 }
0x2563   :  { %v1639_v49 = vsel %vm1636_vm1, %v1638_v59, %v1634_v13 }
0x2564   :  { %v1642_v62 = vmul.f32 %v1639_v49, %v1589_v36 }
0x25c1   :  { %v1645_v60 = vpop.permute.xlu0 %1644 }
0x25c2   :  { %v1647_v61 = vmul.f32 %v1645_v60, %v1639_v49 }
0x25c4   :  { %1649 = vrot.lane.b32.xlu1 %v1647_v61, %s2427_s21 }
0x2636   :  { %v1650_v0 = vpop.permute.xlu1 %1649 }
0x2637   :  { %v1652_v4 = vadd.f32 %v1650_v0, %v1642_v62 }
0x2639   :  { %2249 = vtanh.f32 %v1652_v4 }
0x263f   :  { %v2250_v8 = vpop.eup %2249 }
0x2640   :  { %1655 = vrot.lane.b32.xlu2 %v2250_v8, %s2426_s20 }
0x269a   :  { %v1656_v9 = vpop.permute.xlu2 %1655 }
0x269b   :  { %v1658_v51 = vmul.f32 %v1656_v9, %v1639_v49 }
0x269d   :  { %1660 = vrot.lane.b32.xlu0 %v1658_v51, %s2427_s21 }
0x270f   :  { %v1661_v63 = vpop.permute.xlu0 %1660 }
0x2710   :  { %2069 = vmatmul.msk.f32.vlgmr.msra.gmra.mxu3 %vm261_vm5, %v1661_v63 }
0x2711   :  { %1928 = vmatpush.msra.mxu3 %v2842_v1 }
0x2713   :  { %1929 = vmatpush.msra.mxu3 %v2847_v3 }
0x2715   :  { %1930 = vmatpush.msra.mxu3 %v2849_v5 }
0x2717   :  { %1931 = vmatpush.msra.mxu3 %v2853_v6 }
0x2793   :  { %v1681_v10 = vpop.f32.mrf.mxu3 }
0x2794   :  { %v1684_v2 = vadd.f32 %v1681_v10, %v2888_v53 }
0x2796   :  { %2251 = vtanh.f32 %v1684_v2  ;;  %v2070_v12 = vmul.f32 -1.442695, %v1684_v2 }
0x2798   :  { %2253 = vpow2.f32 %v2070_v12 }
0x279c   :  { %v2252_v7 = vpop.eup %2251 }
0x279d   :  { %1707 = vrot.lane.b32.xlu1 %v2252_v7, %s2426_s20 }
0x279e   :  { %v2254_v11 = vpop.eup %2253 }
0x279f   :  { %v1688_v16 = vadd.f32 1.0, %v2254_v11 }
0x27a1   :  { %2255 = vrcp.f32 %v1688_v16  ;;  %v1700_v5 = vand.u32 2147483648, %v1688_v16  ;;  %vm1694_vm3 = vweird.f32 %v1688_v16  ;;  %v1698_v6 = vand.u32 2147483647, %v1688_v16 }
0x27a3   :  { %v1701_v20 = vor.u32 1.1754944e-38, %v1700_v5  ;;  %vm1699_vm6 = vcmp.eq.f32.partialorder %v1698_v6, 8.507059e+37 }
0x27a7   :  { %v2256_v17 = vpop.eup %2255 }
0x27a8   :  { %v1690_v1 = vmul.f32 %v2256_v17, %v1688_v16  ;;  %vm1695_vm2 = vweird.f32 %v2256_v17 }
0x27a9   :  { %vm1696_vm4 = vmor %vm1694_vm3, %vm1695_vm2 }
0x27aa   :  { %v1691_v18 = vsub.f32 1.0, %v1690_v1 }
0x27ac   :  { %v1692_v3 = vmul.f32 %v2256_v17, %v1691_v18 }
0x27ae   :  { %v1693_v54 = vadd.f32 %v2256_v17, %v1692_v3 }
0x27b0   :  { %v1697_v53 = vsel %vm1696_vm4, %v2256_v17, %v1693_v54 }
0x27b1   :  { %v1702_v26 = vsel %vm1699_vm6, %v1701_v20, %v1697_v53 }
0x27b2   :  { %v1705_v28 = vmul.f32 %v1702_v26, %v1652_v4 }
0x280f   :  { %v1708_v19 = vpop.permute.xlu1 %1707 }
0x2810   :  { %v1710_v27 = vmul.f32 %v1708_v19, %v1702_v26 }
0x2812   :  { %1712 = vrot.lane.b32.xlu2 %v1710_v27, %s2427_s21 }
0x286c   :  { %v1713_v31 = vpop.permute.xlu2 %1712 }
0x286d   :  { %v1715_v32 = vadd.f32 %v1713_v31, %v1705_v28 }
0x286f   :  { %2257 = vtanh.f32 %v1715_v32 }
0x2875   :  { %v2258_v33 = vpop.eup %2257 }
0x2876   :  { %1718 = vrot.lane.b32.xlu0 %v2258_v33, %s2426_s20 }
0x28e8   :  { %v1719_v48 = vpop.permute.xlu0 %1718 }
0x28e9   :  { %v1721_v34 = vmul.f32 %v1719_v48, %v1702_v26 }
0x28eb   :  { %1723 = vrot.lane.b32.xlu1 %v1721_v34, %s2427_s21 }
0x295d   :  { %v1724_v35 = vpop.permute.xlu1 %1723 }
0x295e   :  { %2071 = vmatmul.msk.f32.vlgmr.msrb.gmra.mxu2 %vm261_vm5, %v1724_v35 }
0x29e1   :  { %v1744_v15 = vpop.f32.mrf.mxu2 }
0x29e2   :  { %v1747_v50 = vadd.f32 %v1744_v15, %v2886_v21 }
0x29e4   :  { %2259 = vtanh.f32 %v1747_v50  ;;  %v2072_v23 = vmul.f32 -1.442695, %v1747_v50 }
0x29e6   :  { %2261 = vpow2.f32 %v2072_v23 }
0x29ea   :  { %v2260_v22 = vpop.eup %2259 }
0x29eb   :  { %1770 = vrot.lane.b32.xlu2 %v2260_v22, %s2426_s20 }
0x29ec   :  { %v2262_v24 = vpop.eup %2261 }
0x29ed   :  { %v1751_v36 = vadd.f32 1.0, %v2262_v24 }
0x29ef   :  { %2263 = vrcp.f32 %v1751_v36  ;;  %v1763_v41 = vand.u32 2147483648, %v1751_v36  ;;  %vm1757_vm8 = vweird.f32 %v1751_v36  ;;  %v1761_v42 = vand.u32 2147483647, %v1751_v36 }
0x29f1   :  { %v1764_v43 = vor.u32 1.1754944e-38, %v1763_v41  ;;  %vm1762_vm10 = vcmp.eq.f32.partialorder %v1761_v42, 8.507059e+37 }
0x29f5   :  { %v2264_v37 = vpop.eup %2263 }
0x29f6   :  { %v1753_v38 = vmul.f32 %v2264_v37, %v1751_v36  ;;  %vm1758_vm7 = vweird.f32 %v2264_v37 }
0x29f7   :  { %vm1759_vm9 = vmor %vm1757_vm8, %vm1758_vm7  ;;  %vm1993_vm8 = vcmask 7168  }
0x29f8   :  { %v1754_v39 = vsub.f32 1.0, %v1753_v38 }
0x29fa   :  { %v1755_v40 = vmul.f32 %v2264_v37, %v1754_v39 }
0x29fc   :  { %v1756_v14 = vadd.f32 %v2264_v37, %v1755_v40 }
0x29fe   :  { %v1760_v21 = vsel %vm1759_vm9, %v2264_v37, %v1756_v14 }
0x29ff   :  { %v1765_v45 = vsel %vm1762_vm10, %v1764_v43, %v1760_v21 }
0x2a00   :  { %v1768_v47 = vmul.f32 %v1765_v45, %v1715_v32 }
0x2a45   :  { %v1771_v44 = vpop.permute.xlu2 %1770 }
0x2a46   :  { %v1773_v46 = vmul.f32 %v1771_v44, %v1765_v45 }
0x2a48   :  { %1775 = vrot.lane.b32.xlu0 %v1773_v46, %s2427_s21 }
0x2aba   :  { %v1776_v52 = vpop.permute.xlu0 %1775 }
0x2abb   :  { %v1778_v55 = vadd.f32 %v1776_v52, %v1768_v47 }
0x2abd   :  { %2265 = vtanh.f32 %v1778_v55 }
0x2ac3   :  { %v2266_v56 = vpop.eup %2265 }
0x2ac4   :  { %1781 = vrot.lane.b32.xlu1 %v2266_v56, %s2426_s20 }
0x2b36   :  { %v1782_v57 = vpop.permute.xlu1 %1781 }
0x2b37   :  { %v1784_v58 = vmul.f32 %v1782_v57, %v1765_v45 }
0x2b39   :  { %1786 = vrot.lane.b32.xlu2 %v1784_v58, %s2427_s21 }
0x2b93   :  { %v1787_v13 = vpop.permute.xlu2 %1786 }
0x2b94   :  { %2073 = vmatmul.msk.f32.vlgmr.msrb.gmra.mxu3 %vm261_vm5, %v1787_v13 }
0x2c17   :  { %v1807_v59 = vpop.f32.mrf.mxu3 }
0x2c18   :  { %v1810_v60 = vadd.f32 %v1807_v59, %v2884_v30 }
0x2c1a   :  { %2267 = vtanh.f32 %v1810_v60  ;;  %v2074_v61 = vmul.f32 -1.442695, %v1810_v60 }
0x2c1c   :  { %2269 = vpow2.f32 %v2074_v61 }
0x2c20   :  { %v2268_v49 = vpop.eup %2267 }
0x2c21   :  { %1833 = vrot.lane.b32.xlu0 %v2268_v49, %s2426_s20 }
0x2c22   :  { %v2270_v62 = vpop.eup %2269 }
0x2c23   :  { %v1814_v0 = vadd.f32 1.0, %v2270_v62  ;;  %v2097_v62 = vld [vmem:[%s2969_s13] ss:$0 sm:$0xff] }
0x2c25   :  { %2271 = vrcp.f32 %v1814_v0  ;;  %v1826_v10 = vand.u32 2147483648, %v1814_v0  ;;  %vm1820_vm12 = vweird.f32 %v1814_v0  ;;  %v1824_v2 = vand.u32 2147483647, %v1814_v0 }
0x2c27   :  { %v1827_v7 = vor.u32 1.1754944e-38, %v1826_v10  ;;  %vm1825_vm14 = vcmp.eq.f32.partialorder %v1824_v2, 8.507059e+37 }
0x2c2b   :  { %v2272_v4 = vpop.eup %2271 }
0x2c2c   :  { %v1816_v8 = vmul.f32 %v2272_v4, %v1814_v0  ;;  %vm1821_vm11 = vweird.f32 %v2272_v4 }
0x2c2d   :  { %vm1822_vm13 = vmor %vm1820_vm12, %vm1821_vm11 }
0x2c2e   :  { %v1817_v9 = vsub.f32 1.0, %v1816_v8 }
0x2c30   :  { %v1818_v51 = vmul.f32 %v2272_v4, %v1817_v9 }
0x2c32   :  { %v1819_v63 = vadd.f32 %v2272_v4, %v1818_v51 }
0x2c34   :  { %v1823_v30 = vsel %vm1822_vm13, %v2272_v4, %v1819_v63 }
0x2c35   :  { %v1828_v11 = vsel %vm1825_vm14, %v1827_v7, %v1823_v30 }
0x2c36   :  { %v1831_v17 = vmul.f32 %v1828_v11, %v1778_v55 }
0x2c93   :  { %v1834_v12 = vpop.permute.xlu0 %1833 }
0x2c94   :  { %v1836_v16 = vmul.f32 %v1834_v12, %v1828_v11  ;;  %v2098_v12 = vld [vmem:[#allocation4] ss:$0 sm:$0xff] }
0x2c96   :  { %1838 = vrot.lane.b32.xlu1 %v1836_v16, %s2427_s21 }
0x2d08   :  { %v1839_v1 = vpop.permute.xlu1 %1838 }
0x2d09   :  { %v1841_v18 = vadd.f32 %v1839_v1, %v1831_v17 }
0x2d0b   :  { %2273 = vtanh.f32 %v1841_v18 }
0x2d11   :  { %v2274_v3 = vpop.eup %2273 }
0x2d12   :  { %1844 = vrot.lane.b32.xlu2 %v2274_v3, %s2426_s20 }
0x2d6c   :  { %v1845_v54 = vpop.permute.xlu2 %1844 }
0x2d6d   :  { %v1847_v5 = vmul.f32 %v1845_v54, %v1828_v11 }
0x2d6f   :  { %1849 = vrot.lane.b32.xlu0 %v1847_v5, %s2427_s21 }
0x2de1   :  { %v1850_v6 = vpop.permute.xlu0 %1849 }
0x2de2   :  { %2075 = vmatmul.msk.f32.vlgmr.msra.gmra.mxu2 %vm261_vm5, %v1850_v6 }
0x2e65   :  { %v1870_v53 = vpop.f32.mrf.mxu2 }
0x2e66   :  { %v1873_v20 = vadd.f32 %v1870_v53, %v2882_v29 }
0x2e68   :  { %2275 = vtanh.f32 %v1873_v20  ;;  %v2076_v26 = vmul.f32 -1.442695, %v1873_v20 }
0x2e6a   :  { %2277 = vpow2.f32 %v2076_v26 }
0x2e6e   :  { %v2276_v19 = vpop.eup %2275 }
0x2e6f   :  { %1896 = vrot.lane.b32.xlu1 %v2276_v19, %s2426_s20 }
0x2e70   :  { %v2278_v27 = vpop.eup %2277 }
0x2e71   :  { %v1877_v28 = vadd.f32 1.0, %v2278_v27 }
0x2e73   :  { %2279 = vrcp.f32 %v1877_v28  ;;  %v1889_v35 = vand.u32 2147483648, %v1877_v28  ;;  %vm1883_vm0 = vweird.f32 %v1877_v28  ;;  %v1887_v15 = vand.u32 2147483647, %v1877_v28 }
0x2e75   :  { %v1890_v50 = vor.u32 1.1754944e-38, %v1889_v35  ;;  %vm1888_vm2 = vcmp.eq.f32.partialorder %v1887_v15, 8.507059e+37 }
0x2e79   :  { %v2280_v31 = vpop.eup %2279 }
0x2e7a   :  { %v1879_v32 = vmul.f32 %v2280_v31, %v1877_v28  ;;  %vm1884_vm15 = vweird.f32 %v2280_v31 }
0x2e7b   :  { %vm1885_vm1 = vmor %vm1883_vm0, %vm1884_vm15 }
0x2e7c   :  { %v1880_v33 = vsub.f32 1.0, %v1879_v32 }
0x2e7e   :  { %v1881_v48 = vmul.f32 %v2280_v31, %v1880_v33 }
0x2e80   :  { %v1882_v34 = vadd.f32 %v2280_v31, %v1881_v48 }
0x2e82   :  { %v1886_v29 = vsel %vm1885_vm1, %v2280_v31, %v1882_v34 }
0x2e83   :  { %v1891_v23 = vsel %vm1888_vm2, %v1890_v50, %v1886_v29 }
0x2e84   :  { %v1894_v36 = vmul.f32 %v1891_v23, %v1841_v18 }
0x2ee1   :  { %v1897_v22 = vpop.permute.xlu1 %1896 }
0x2ee2   :  { %v1899_v24 = vmul.f32 %v1897_v22, %v1891_v23 }
0x2ee4   :  { %1901 = vrot.lane.b32.xlu2 %v1899_v24, %s2427_s21 }
0x2f3e   :  { %v1902_v37 = vpop.permute.xlu2 %1901 }
0x2f3f   :  { %v1904_v38 = vadd.f32 %v1902_v37, %v1894_v36 }
0x2f41   :  { %2281 = vtanh.f32 %v1904_v38 }
0x2f47   :  { %v2282_v39 = vpop.eup %2281 }
0x2f48   :  { %1907 = vrot.lane.b32.xlu0 %v2282_v39, %s2426_s20 }
0x2fba   :  { %v1908_v40 = vpop.permute.xlu0 %1907 }
0x2fbb   :  { %v1910_v14 = vmul.f32 %v1908_v40, %v1891_v23 }
0x2fbd   :  { %1912 = vrot.lane.b32.xlu1 %v1910_v14, %s2427_s21 }
0x302f   :  { %v1913_v41 = vpop.permute.xlu1 %1912 }
0x3030   :  { %2077 = vmatmul.msk.f32.vlgmr.msra.gmra.mxu3 %vm261_vm5, %v1913_v41 }
0x30b3   :  { %v1933_v42 = vpop.f32.mrf.mxu3 }
0x30b4   :  { %v1936_v21 = vadd.f32 %v1933_v42, %v2880_v25 }
0x30b6   :  { %2283 = vtanh.f32 %v1936_v21  ;;  %v2078_v44 = vmul.f32 -1.442695, %v1936_v21 }
0x30b8   :  { %2285 = vpow2.f32 %v2078_v44 }
0x30bc   :  { %v2284_v43 = vpop.eup %2283 }
0x30bd   :  { %1959 = vrot.lane.b32.xlu2 %v2284_v43, %s2426_s20 }
0x30be   :  { %v2286_v45 = vpop.eup %2285 }
0x30bf   :  { %v1940_v46 = vadd.f32 1.0, %v2286_v45 }
0x30c1   :  { %2287 = vrcp.f32 %v1940_v46  ;;  %v1952_v58 = vand.u32 2147483648, %v1940_v46  ;;  %vm1946_vm4 = vweird.f32 %v1940_v46  ;;  %v1950_v13 = vand.u32 2147483647, %v1940_v46 }
0x30c3   :  { %v1953_v59 = vor.u32 1.1754944e-38, %v1952_v58  ;;  %vm1951_vm7 = vcmp.eq.f32.partialorder %v1950_v13, 8.507059e+37 }
0x30c5   :  { %1977 = vrot.lane.b32.xlu2 %v2097_v62, %s2428_s5 }
0x30c7   :  { %v2288_v47 = vpop.eup %2287 }
0x30c8   :  { %v1942_v52 = vmul.f32 %v2288_v47, %v1940_v46  ;;  %vm1947_vm3 = vweird.f32 %v2288_v47 }
0x30c9   :  { %vm1948_vm6 = vmor %vm1946_vm4, %vm1947_vm3 }
0x30ca   :  { %v1943_v55 = vsub.f32 1.0, %v1942_v52 }
0x30cc   :  { %v1944_v56 = vmul.f32 %v2288_v47, %v1943_v55 }
0x30ce   :  { %v1945_v57 = vadd.f32 %v2288_v47, %v1944_v56 }
0x30d0   :  { %v1949_v25 = vsel %vm1948_vm6, %v2288_v47, %v1945_v57 }
0x30d1   :  { %v1954_v49 = vsel %vm1951_vm7, %v1953_v59, %v1949_v25 }
0x30d2   :  { %v1957_v0 = vmul.f32 %v1954_v49, %v1904_v38 }
0x3117   :  { %v1960_v60 = vpop.permute.xlu2 %1959 }
0x3118   :  { %v1962_v61 = vmul.f32 %v1960_v60, %v1954_v49 }
0x311a   :  { %1964 = vrot.lane.b32.xlu0 %v1962_v61, %s2427_s21 }
0x311f   :  { %v1978_v63 = vpop.permute.xlu2 %1977 }
0x318c   :  { %v1965_v4 = vpop.permute.xlu0 %1964 }
0x318d   :  { %v1967_v8 = vadd.f32 %v1965_v4, %v1957_v0 }
0x318f   :  { %2289 = vtanh.f32 %v1967_v8 }
0x3195   :  { %v2290_v9 = vpop.eup %2289 }
0x3196   :  { %1970 = vrot.lane.b32.xlu1 %v2290_v9, %s2426_s20 }
0x3208   :  { %v1971_v51 = vpop.permute.xlu1 %1970 }
0x3209   :  { %v1973_v10 = vmul.f32 %v1971_v51, %v1954_v49 }
0x320b   :  { %v1980_v2 = vmul.f32 %v1978_v63, %v1973_v10 }
0x320d   :  { %1982 = vrot.lane.b32.xlu0 %v1980_v2, %s2427_s21 }
0x327f   :  { %v1983_v30 = vpop.permute.xlu0 %1982 }
0x3280   :  { %v1985_v7 = vsel %vm261_vm5, %v1983_v30, 0.0 }
0x3281   :  { %1986 = vadd.xlane.f32.xlu1 %v1985_v7 }
0x32f4   :  { %v1987_v11 = vpop.xlane.xlu1 %1986 }
0x32f5   :  { %v1992_v16 = vadd.f32 %v2098_v12, %v1987_v11 }
0x32f7   :  { %1994 = vst.msk [vmem:[%s2971_s15] sm:$0xff] %vm1993_vm8, %v1992_v16 }
0x32f8   :  { %1999 = vsyncpa [#allocation6], 1 }
0x32f9   :  { %2000 = vsyncpa [#allocation8], 1 }
0x32fa   :  { %2001 = vsyncpa [#allocation11], 1 }

</bundles_post_ra>
